<compile_context>
chip_gen: v7x
topology: tpu7x:2x2x1
jax: 0.10.0
libtpu: 0.0.40
codegen_flags: <defaults>
</compile_context>

<pallas_src>
import functools

import jax
import jax.numpy as jnp
import numpy as np
from jax.experimental import pallas as pl
from jax.experimental.pallas import tpu as pltpu


def _round_up(x, m):
    return ((x + m - 1) // m) * m


def _attention_kernel(
    q_ref,        # [Bt, Q]        query
    inputs_ref,   # [Bt, Tp, Dp]   encoder outputs (values)
    pinp_ref,     # [Bt, Tp, A]    processed_inputs
    im2col_ref,   # [Bt, Tp, CKp]  im2col of cat(attention_weights, attention_weights_cum)
    mask_ref,     # [Bt, Tp]       float 0/1 mask
    ac_ref,       # [Bt, Tp]       attention_weights_cum (state)
    wq_ref,       # [Q, A]         query_layer.weight.T
    weff_ref,     # [CKp, A]       fused (location_conv1d o location_dense) weight
    wv_ref,       # [1, A]         v.weight
    bv_ref,       # [1]            v.bias  (SMEM scalar)
    ctx_ref,      # [Bt, Dp]       out: context
    align_ref,    # [Bt, Tp]       out: new attention_weights (alignment)
    cum_ref,      # [Bt, Tp]       out: new attention_weights_cum
):
    Bt, Tp, A = pinp_ref.shape
    CKp = im2col_ref.shape[2]

    # fused location conv1d + location dense: a single MXU matmul over the im2col
    im2 = im2col_ref[...].reshape(Bt * Tp, CKp)                       # [Bt*Tp, 2K]
    proc_att = jnp.dot(im2, weff_ref[...],
                       preferred_element_type=jnp.float32)            # [Bt*Tp, A]
    proc_att = proc_att.reshape(Bt, Tp, A)

    # query projection (no bias)
    pq = jnp.dot(q_ref[...].astype(jnp.float32), wq_ref[...],
                 preferred_element_type=jnp.float32)                  # [Bt, A]

    # energies = v(tanh(processed_query + processed_attention + processed_inputs))
    e = jnp.tanh(pq[:, None, :] + proc_att + pinp_ref[...].astype(jnp.float32))

    # VPU multiply + lane reduce (avoids an N=1 MXU matmul and a [T,1]->[1,T] transpose)
    energies = jnp.sum(e * wv_ref[...], axis=-1) + bv_ref[0]          # [Bt, Tp]

    # masked_fill(~mask, -inf)
    energies = jnp.where(mask_ref[...] > 0.5, energies, -jnp.inf)

    # softmax over T (lane axis)
    mx = jnp.max(energies, axis=-1, keepdims=True)
    p = jnp.exp(energies - mx)
    align = p / jnp.sum(p, axis=-1, keepdims=True)                    # [Bt, Tp]

    # update_location_attention + new attention_weights
    align_ref[...] = align
    cum_ref[...] = ac_ref[...] + align

    # context = bmm(alignment.unsqueeze(1), inputs).squeeze(1)
    ctx = jnp.einsum("bqt,btd->bqd",
                     align[:, None, :].astype(inputs_ref.dtype),
                     inputs_ref[...],
                     preferred_element_type=jnp.float32)              # [Bt, 1, Dp]
    ctx_ref[...] = ctx[:, 0, :]


def original_attention_forward(query, inputs, processed_inputs, mask,
                               attention_weights, attention_weights_cum,
                               params, *, batch_tile=8):
    """Returns (context [B,D], alignment [B,T], new attention_weights_cum [B,T])."""
    B, T, D = inputs.shape
    Q = query.shape[1]
    A = params["w_query"].shape[0]          # query_layer.weight: [A, Q]
    K = params["w_conv"].shape[2]           # conv weight: [F, 2, K]
    pad = (K - 1) // 2

    f32 = jnp.float32
    Bt = batch_tile
    Bp = _round_up(B, Bt)
    Tp = _round_up(T, 128)                  # lane-dense softmax / outputs
    Dp = _round_up(D, 128)                  # lane-dense context output
    CK = 2 * K
    CKp = _round_up(CK, 8)

    # --- fused weights: W_eff[c*K + k, a] = sum_f wconv[f, c, k] * wdense[a, f]
    w_eff = jnp.einsum("fck,af->cka",
                       params["w_conv"].astype(f32),
                       params["w_dense"].astype(f32)).reshape(CK, A)
    w_eff = jnp.pad(w_eff, ((0, CKp - CK), (0, 0)))                   # [CKp, A]

    wq_t = params["w_query"].T.astype(f32)                            # [Q, A]
    wv_row = params["w_v"].astype(f32)                                # [1, A]
    bv = params["b_v"].astype(f32).reshape(1)                         # [1] (SMEM)

    # --- im2col of cat(attention_weights, attention_weights_cum) over the K taps
    aw = attention_weights.astype(f32)
    ac = attention_weights_cum.astype(f32)
    cat = jnp.stack([aw, ac], axis=1)                                 # [B, 2, T]
    cat_p = jnp.pad(cat, ((0, 0), (0, 0), (pad, pad)))                # [B, 2, T+2*pad]
    tap_idx = jnp.arange(T)[:, None] + jnp.arange(K)[None, :]         # [T, K]
    cols = cat_p[:, :, tap_idx]                                       # [B, 2, T, K]
    im2col = cols.transpose(0, 2, 1, 3).reshape(B, T, CK)             # [B, T, 2K]

    # --- pad to TPU-friendly (lane-dense) shapes
    def pad_to(x, shape):
        return jnp.pad(x, [(0, s - d) for d, s in zip(x.shape, shape)])

    q_p = pad_to(query.astype(f32), (Bp, Q))
    inputs_p = pad_to(inputs, (Bp, Tp, Dp))            # keep caller dtype for DMA
    pinp_p = pad_to(processed_inputs, (Bp, Tp, A))     # keep caller dtype for DMA
    im2col_p = pad_to(im2col, (Bp, Tp, CKp))
    ac_p = pad_to(ac, (Bp, Tp))

    mask_p = jnp.zeros((Bp, Tp), f32).at[:B, :T].set(mask.astype(f32))
    if Bp > B:
        # padded batch rows: all-valid mask keeps the in-kernel softmax finite
        mask_p = mask_p.at[B:, :].set(1.0)

    grid = (Bp // Bt,)

    out_shapes = (
        jax.ShapeDtypeStruct((Bp, Dp), f32),   # context
        jax.ShapeDtypeStruct((Bp, Tp), f32),   # alignment (new attention_weights)
        jax.ShapeDtypeStruct((Bp, Tp), f32),   # new attention_weights_cum
    )
    in_specs = [
        pl.BlockSpec((Bt, Q), lambda g: (g, 0)),               # query
        pl.BlockSpec((Bt, Tp, Dp), lambda g: (g, 0, 0)),       # inputs
        pl.BlockSpec((Bt, Tp, A), lambda g: (g, 0, 0)),        # processed_inputs
        pl.BlockSpec((Bt, Tp, CKp), lambda g: (g, 0, 0)),      # im2col
        pl.BlockSpec((Bt, Tp), lambda g: (g, 0)),              # mask
        pl.BlockSpec((Bt, Tp), lambda g: (g, 0)),              # attention_weights_cum
        pl.BlockSpec((Q, A), lambda g: (0, 0)),                # query weight
        pl.BlockSpec((CKp, A), lambda g: (0, 0)),              # fused conv+dense weight
        pl.BlockSpec((1, A), lambda g: (0, 0)),                # v weight
        pl.BlockSpec(memory_space=pltpu.MemorySpace.SMEM),     # v bias (scalar)
    ]
    out_specs = (
        pl.BlockSpec((Bt, Dp), lambda g: (g, 0)),
        pl.BlockSpec((Bt, Tp), lambda g: (g, 0)),
        pl.BlockSpec((Bt, Tp), lambda g: (g, 0)),
    )

    ctx, align, cum = pl.pallas_call(
        _attention_kernel,
        out_shape=out_shapes,
        grid=grid,
        in_specs=in_specs,
        out_specs=out_specs,
        compiler_params=pltpu.CompilerParams(
            dimension_semantics=("parallel",)),   # v7x: shard batch tiles over both TCs
    )(q_p, inputs_p, pinp_p, im2col_p, mask_p, ac_p, wq_t, w_eff, wv_row, bv)

    return ctx[:B, :D], align[:B, :T], cum[:B, :T]


def _reference(query, inputs, processed_inputs, mask, aw, ac, params):
    """Pure-JAX reference mirroring the PyTorch forward (location attn + softmax)."""
    cat = jnp.stack([aw, ac], axis=1)                                  # [B, 2, T]
    K = params["w_conv"].shape[2]
    pad = (K - 1) // 2
    conv = jax.lax.conv_general_dilated(
        cat, params["w_conv"], window_strides=(1,), padding=[(pad, pad)],
        dimension_numbers=("NCH", "OIH", "NCH"))                       # [B, F, T]
    proc_att = jnp.einsum("bft,af->bta", conv, params["w_dense"])      # [B, T, A]
    pq = jnp.einsum("bq,aq->ba", query, params["w_query"])[:, None, :]  # [B, 1, A]
    e = jnp.tanh(pq + proc_att + processed_inputs)
    energies = jnp.einsum("bta,a->bt", e, params["w_v"][0]) + params["b_v"][0]
    energies = jnp.where(mask, energies, -jnp.inf)
    align = jax.nn.softmax(energies, axis=-1)
    cum_new = ac + align
    context = jnp.einsum("bt,btd->bd", align, inputs)
    return context, align, cum_new


if __name__ == "__main__":
    # sizes (small, consistent with the module's forward)
    B, T, D_EN = 2, 8, 32        # batch, encoder length, embedding_dim
    Q_DIM = 16                   # query_dim (attention rnn size)
    A_DIM = 32                   # attention_dim
    N_FILT = 32                  # attention_location_n_filters
    K_SIZE = 31                  # attention_location_kernel_size

    key = jax.random.PRNGKey(0)
    ks = jax.random.split(key, 12)

    # deterministic parameter init (shapes as in the PyTorch module __init__)
    params = {
        "w_query":  jax.random.normal(ks[0], (A_DIM, Q_DIM), jnp.float32) * 0.1,
        "w_inputs": jax.random.normal(ks[1], (A_DIM, D_EN), jnp.float32) * 0.1,
        "w_v":      jax.random.normal(ks[2], (1, A_DIM), jnp.float32) * 0.1,
        "b_v":      jax.random.normal(ks[3], (1,), jnp.float32) * 0.1,
        "w_conv":   jax.random.normal(ks[4], (N_FILT, 2, K_SIZE), jnp.float32) * 0.1,
        "w_dense":  jax.random.normal(ks[5], (A_DIM, N_FILT), jnp.float32) * 0.1,
    }

    # inputs / states
    query = jax.random.normal(ks[6], (B, Q_DIM), jnp.float32)
    inputs = jax.random.normal(ks[7], (B, T, D_EN), jnp.float32)
    lengths = jnp.array([T, T - 2], dtype=jnp.int32)
    mask = jnp.arange(T)[None, :] < lengths[:, None]                   # [B, T] bool

    # processed_inputs = inputs_layer(inputs)  (glue; not part of forward())
    processed_inputs = jnp.einsum("btd,ad->bta", inputs, params["w_inputs"])

    # mid-decoding attention state (so the location conv path is exercised)
    aw = jax.nn.softmax(jax.random.normal(ks[8], (B, T)), axis=-1) * mask
    ac = aw + jax.nn.softmax(jax.random.normal(ks[9], (B, T)), axis=-1) * mask

    run = jax.jit(functools.partial(original_attention_forward, params=params))
    context, alignment, cum_new = run(query, inputs, processed_inputs, mask, aw, ac)
    jax.block_until_ready((context, alignment, cum_new))

    ref_ctx, ref_align, ref_cum = _reference(
        query, inputs, processed_inputs, mask, aw, ac, params)
    np.testing.assert_allclose(np.asarray(context), np.asarray(ref_ctx),
                               rtol=1e-4, atol=1e-5)
    np.testing.assert_allclose(np.asarray(alignment), np.asarray(ref_align),
                               rtol=1e-4, atol=1e-5)
    np.testing.assert_allclose(np.asarray(cum_new), np.asarray(ref_cum),
                               rtol=1e-4, atol=1e-5)

    print("KERNEL_OK")
</pallas_src>

<mosaic_0001>
module attributes {stable_mosaic.version = 11 : i64} {
  func.func @_attention_kernel(%arg0: i32, %arg1: memref<8x16xf32, #tpu.memory_space<vmem>>, %arg2: memref<8x128x128xf32, #tpu.memory_space<vmem>>, %arg3: memref<8x128x32xf32, #tpu.memory_space<vmem>>, %arg4: memref<8x128x64xf32, #tpu.memory_space<vmem>>, %arg5: memref<8x128xf32, #tpu.memory_space<vmem>>, %arg6: memref<8x128xf32, #tpu.memory_space<vmem>>, %arg7: memref<16x32xf32, #tpu.memory_space<vmem>>, %arg8: memref<64x32xf32, #tpu.memory_space<vmem>>, %arg9: memref<1x32xf32, #tpu.memory_space<vmem>>, %arg10: memref<1xf32, #tpu.memory_space<smem>>, %arg11: memref<8x128xf32, #tpu.memory_space<vmem>>, %arg12: memref<8x128xf32, #tpu.memory_space<vmem>>, %arg13: memref<8x128xf32, #tpu.memory_space<vmem>>) attributes {dimension_semantics = [#tpu.dimension_semantics<parallel>], iteration_bounds = array<i64: 1>, scalar_prefetch = 0 : i64, scratch_operands = 0 : i64, tpu.core_type = #tpu.core_type<tc>, window_params = [{transform_indices = @transform_0, window_bounds = array<i64: 8, 16>}, {transform_indices = @transform_1, window_bounds = array<i64: 8, 128, 128>}, {transform_indices = @transform_2, window_bounds = array<i64: 8, 128, 32>}, {transform_indices = @transform_3, window_bounds = array<i64: 8, 128, 64>}, {transform_indices = @transform_4, window_bounds = array<i64: 8, 128>}, {transform_indices = @transform_5, window_bounds = array<i64: 8, 128>}, {pipeline_mode = #tpu.pipeline_mode<synchronous>, transform_indices = @transform_6, window_bounds = array<i64: 16, 32>}, {pipeline_mode = #tpu.pipeline_mode<synchronous>, transform_indices = @transform_7, window_bounds = array<i64: 64, 32>}, {pipeline_mode = #tpu.pipeline_mode<synchronous>, transform_indices = @transform_8, window_bounds = array<i64: 1, 32>}, {transform_indices = @transform_9, window_bounds = array<i64: 1>}, {transform_indices = @transform_10, window_bounds = array<i64: 8, 128>}, {transform_indices = @transform_11, window_bounds = array<i64: 8, 128>}, {transform_indices = @transform_12, window_bounds = array<i64: 8, 128>}]} {
    %c0 = arith.constant 0 : index
    %c0_0 = arith.constant 0 : index
    %c0_1 = arith.constant 0 : index
    %0 = vector.load %arg4[%c0, %c0_0, %c0_1] : memref<8x128x64xf32, #tpu.memory_space<vmem>>, vector<8x128x64xf32>
    %1 = vector.shape_cast %0 : vector<8x128x64xf32> to vector<1024x64xf32>
    %c0_2 = arith.constant 0 : index
    %c0_3 = arith.constant 0 : index
    %2 = vector.load %arg8[%c0_2, %c0_3] : memref<64x32xf32, #tpu.memory_space<vmem>>, vector<64x32xf32>
    %cst = arith.constant dense<0.000000e+00> : vector<1024x32xf32>
    %3 = tpu.matmul %1, %2, %cst {dimension_numbers = #tpu.dot_dimension_numbers<[1], [0], [0], [1], [0, 0, 1, 1], [], []>} : vector<1024x64xf32>, vector<64x32xf32>, vector<1024x32xf32> -> vector<1024x32xf32>
    %4 = vector.shape_cast %3 : vector<1024x32xf32> to vector<8x128x32xf32>
    %c0_4 = arith.constant 0 : index
    %c0_5 = arith.constant 0 : index
    %5 = vector.load %arg1[%c0_4, %c0_5] : memref<8x16xf32, #tpu.memory_space<vmem>>, vector<8x16xf32>
    %c0_6 = arith.constant 0 : index
    %c0_7 = arith.constant 0 : index
    %6 = vector.load %arg7[%c0_6, %c0_7] : memref<16x32xf32, #tpu.memory_space<vmem>>, vector<16x32xf32>
    %cst_8 = arith.constant dense<0.000000e+00> : vector<8x32xf32>
    %7 = tpu.matmul %5, %6, %cst_8 {dimension_numbers = #tpu.dot_dimension_numbers<[1], [0], [0], [1], [0, 0, 1, 1], [], []>} : vector<8x16xf32>, vector<16x32xf32>, vector<8x32xf32> -> vector<8x32xf32>
    %8 = vector.shape_cast %7 : vector<8x32xf32> to vector<8x1x32xf32>
    %9 = vector.broadcast %8 : vector<8x1x32xf32> to vector<8x128x32xf32>
    %10 = arith.addf %9, %4 : vector<8x128x32xf32>
    %c0_9 = arith.constant 0 : index
    %c0_10 = arith.constant 0 : index
    %c0_11 = arith.constant 0 : index
    %11 = vector.load %arg3[%c0_9, %c0_10, %c0_11] : memref<8x128x32xf32, #tpu.memory_space<vmem>>, vector<8x128x32xf32>
    %12 = arith.addf %10, %11 : vector<8x128x32xf32>
    %13 = math.tanh %12 : vector<8x128x32xf32>
    %c0_12 = arith.constant 0 : index
    %c0_13 = arith.constant 0 : index
    %14 = vector.load %arg9[%c0_12, %c0_13] : memref<1x32xf32, #tpu.memory_space<vmem>>, vector<1x32xf32>
    %15 = vector.shape_cast %14 : vector<1x32xf32> to vector<1x1x32xf32>
    %16 = vector.broadcast %15 : vector<1x1x32xf32> to vector<8x128x32xf32>
    %17 = arith.mulf %13, %16 : vector<8x128x32xf32>
    %cst_14 = arith.constant dense<0.000000e+00> : vector<8x128xf32>
    %18 = vector.multi_reduction <add>, %17, %cst_14 [2] : vector<8x128x32xf32> to vector<8x128xf32>
    %c0_15 = arith.constant 0 : index
    %19 = memref.load %arg10[%c0_15] : memref<1xf32, #tpu.memory_space<smem>>
    %20 = vector.broadcast %19 : f32 to vector<8x128xf32>
    %21 = arith.addf %18, %20 : vector<8x128xf32>
    %c0_16 = arith.constant 0 : index
    %c0_17 = arith.constant 0 : index
    %22 = vector.load %arg5[%c0_16, %c0_17] : memref<8x128xf32, #tpu.memory_space<vmem>>, vector<8x128xf32>
    %cst_18 = arith.constant 5.000000e-01 : f32
    %23 = vector.broadcast %cst_18 : f32 to vector<8x128xf32>
    %24 = arith.cmpf ogt, %22, %23 : vector<8x128xf32>
    %cst_19 = arith.constant 0xFF800000 : f32
    %25 = vector.broadcast %cst_19 : f32 to vector<8x128xf32>
    %26 = arith.select %24, %21, %25 : vector<8x128xi1>, vector<8x128xf32>
    %cst_20 = arith.constant dense<0xFF800000> : vector<8xf32>
    %27 = vector.multi_reduction <maximumf>, %26, %cst_20 [1] : vector<8x128xf32> to vector<8xf32>
    %28 = vector.shape_cast %27 : vector<8xf32> to vector<8x1xf32>
    %29 = vector.broadcast %28 : vector<8x1xf32> to vector<8x128xf32>
    %30 = arith.subf %26, %29 : vector<8x128xf32>
    %31 = math.exp %30 : vector<8x128xf32>
    %cst_21 = arith.constant dense<0.000000e+00> : vector<8xf32>
    %32 = vector.multi_reduction <add>, %31, %cst_21 [1] : vector<8x128xf32> to vector<8xf32>
    %33 = vector.shape_cast %32 : vector<8xf32> to vector<8x1xf32>
    %34 = vector.broadcast %33 : vector<8x1xf32> to vector<8x128xf32>
    %35 = arith.divf %31, %34 : vector<8x128xf32>
    %c0_22 = arith.constant 0 : index
    %c0_23 = arith.constant 0 : index
    %36 = vector.load %arg12[%c0_22, %c0_23] : memref<8x128xf32, #tpu.memory_space<vmem>>, vector<8x128xf32>
    tpu.vector_store %arg12[%c0_22, %c0_23], %35 {strides = array<i32>} : memref<8x128xf32, #tpu.memory_space<vmem>>, vector<8x128xf32>,
    %c0_24 = arith.constant 0 : index
    %c0_25 = arith.constant 0 : index
    %37 = vector.load %arg6[%c0_24, %c0_25] : memref<8x128xf32, #tpu.memory_space<vmem>>, vector<8x128xf32>
    %38 = arith.addf %37, %35 : vector<8x128xf32>
    %c0_26 = arith.constant 0 : index
    %c0_27 = arith.constant 0 : index
    %39 = vector.load %arg13[%c0_26, %c0_27] : memref<8x128xf32, #tpu.memory_space<vmem>>, vector<8x128xf32>
    tpu.vector_store %arg13[%c0_26, %c0_27], %38 {strides = array<i32>} : memref<8x128xf32, #tpu.memory_space<vmem>>, vector<8x128xf32>,
    %40 = vector.shape_cast %35 : vector<8x128xf32> to vector<8x1x128xf32>
    %c0_28 = arith.constant 0 : index
    %c0_29 = arith.constant 0 : index
    %c0_30 = arith.constant 0 : index
    %41 = vector.load %arg2[%c0_28, %c0_29, %c0_30] : memref<8x128x128xf32, #tpu.memory_space<vmem>>, vector<8x128x128xf32>
    "tpu.trace_start"() <{level = 10 : i32, message = "bqt,btd->bqd"}> : () -> ()
    %cst_31 = arith.constant dense<0.000000e+00> : vector<8x1x128xf32>
    %42 = tpu.matmul %40, %41, %cst_31 {dimension_numbers = #tpu.dot_dimension_numbers<[2], [1], [1], [2], [0, 0, 0, 1, 1, 2], [0], [0]>} : vector<8x1x128xf32>, vector<8x128x128xf32>, vector<8x1x128xf32> -> vector<8x1x128xf32>
    "tpu.trace_stop"() : () -> ()
    %43 = vector.shape_cast %42 : vector<8x1x128xf32> to vector<8x128xf32>
    %c0_32 = arith.constant 0 : index
    %c0_33 = arith.constant 0 : index
    %44 = vector.load %arg11[%c0_32, %c0_33] : memref<8x128xf32, #tpu.memory_space<vmem>>, vector<8x128xf32>
    tpu.vector_store %arg11[%c0_32, %c0_33], %43 {strides = array<i32>} : memref<8x128xf32, #tpu.memory_space<vmem>>, vector<8x128xf32>,
    return
  }
  func.func @transform_0(%arg0: i32) -> (i32, i32) {
    %c0_i32 = arith.constant 0 : i32
    %c0_i32_0 = arith.constant 0 : i32
    return %arg0, %c0_i32 : i32, i32
  }
  func.func @transform_1(%arg0: i32) -> (i32, i32, i32) {
    %c0_i32 = arith.constant 0 : i32
    %c0_i32_0 = arith.constant 0 : i32
    %c0_i32_1 = arith.constant 0 : i32
    return %arg0, %c0_i32, %c0_i32_0 : i32, i32, i32
  }
  func.func @transform_2(%arg0: i32) -> (i32, i32, i32) {
    %c0_i32 = arith.constant 0 : i32
    %c0_i32_0 = arith.constant 0 : i32
    %c0_i32_1 = arith.constant 0 : i32
    return %arg0, %c0_i32, %c0_i32_0 : i32, i32, i32
  }
  func.func @transform_3(%arg0: i32) -> (i32, i32, i32) {
    %c0_i32 = arith.constant 0 : i32
    %c0_i32_0 = arith.constant 0 : i32
    %c0_i32_1 = arith.constant 0 : i32
    return %arg0, %c0_i32, %c0_i32_0 : i32, i32, i32
  }
  func.func @transform_4(%arg0: i32) -> (i32, i32) {
    %c0_i32 = arith.constant 0 : i32
    %c0_i32_0 = arith.constant 0 : i32
    return %arg0, %c0_i32 : i32, i32
  }
  func.func @transform_5(%arg0: i32) -> (i32, i32) {
    %c0_i32 = arith.constant 0 : i32
    %c0_i32_0 = arith.constant 0 : i32
    return %arg0, %c0_i32 : i32, i32
  }
  func.func @transform_6(%arg0: i32) -> (i32, i32) {
    %c0_i32 = arith.constant 0 : i32
    %c0_i32_0 = arith.constant 0 : i32
    %c0_i32_1 = arith.constant 0 : i32
    return %c0_i32, %c0_i32_0 : i32, i32
  }
  func.func @transform_7(%arg0: i32) -> (i32, i32) {
    %c0_i32 = arith.constant 0 : i32
    %c0_i32_0 = arith.constant 0 : i32
    %c0_i32_1 = arith.constant 0 : i32
    return %c0_i32, %c0_i32_0 : i32, i32
  }
  func.func @transform_8(%arg0: i32) -> (i32, i32) {
    %c0_i32 = arith.constant 0 : i32
    %c0_i32_0 = arith.constant 0 : i32
    %c0_i32_1 = arith.constant 0 : i32
    return %c0_i32, %c0_i32_0 : i32, i32
  }
  func.func @transform_9(%arg0: i32) -> i32 {
    %c0_i32 = arith.constant 0 : i32
    %c0_i32_0 = arith.constant 0 : i32
    return %c0_i32 : i32
  }
  func.func @transform_10(%arg0: i32) -> (i32, i32) {
    %c0_i32 = arith.constant 0 : i32
    %c0_i32_0 = arith.constant 0 : i32
    return %arg0, %c0_i32 : i32, i32
  }
  func.func @transform_11(%arg0: i32) -> (i32, i32) {
    %c0_i32 = arith.constant 0 : i32
    %c0_i32_0 = arith.constant 0 : i32
    return %arg0, %c0_i32 : i32, i32
  }
  func.func @transform_12(%arg0: i32) -> (i32, i32) {
    %c0_i32 = arith.constant 0 : i32
    %c0_i32_0 = arith.constant 0 : i32
    return %arg0, %c0_i32 : i32, i32
  }
}

</mosaic_0001>

<bundles_post_ra>
// kernel: original_attention_forward.1
= control target key start
LH: loop header
LB: loop body
LE: loop exit
PB: predicated region body
PF: predicated region fallthrough
CT: control target
= control target key end

     0   :  { %v5576_v3 = vmov 0.0|0.0   ;;  %vm8133_vm0 = vmmov 0   ;;  %v5578_v4 = vmov 0.0   ;;  %vm175_vm1 = vcmask 523264   ;;  %s8120_s7 = inlined_call_operand.vmem [shape: f32[64,32], index: 7, kind: input, shape index: {}]   ;;  %s8121_s6 = inlined_call_operand.vmem [shape: f32[16,32], index: 6, kind: input, shape index: {}]   ;;  %s8122_s3 = inlined_call_operand.vmem [shape: f32[8,128,64], index: 3, kind: input, shape index: {}]   ;;  %s8123_s0 = inlined_call_operand.vmem [shape: f32[8,16], index: 0, kind: input, shape index: {}]   ;;  %s8124_s2 = inlined_call_operand.vmem [shape: f32[8,128,32], index: 2, kind: input, shape index: {}]   ;;  %s8125_s8 = inlined_call_operand.vmem [shape: f32[1,32], index: 8, kind: input, shape index: {}]   ;;  %s8126_s9 = inlined_call_operand.<no memory space> [shape: f32[1], index: 9, kind: input, shape index: {}]   ;;  %s8127_s4 = inlined_call_operand.vmem [shape: f32[8,128], index: 4, kind: input, shape index: {}]   ;;  %s8128_s1 = inlined_call_operand.vmem [shape: f32[8,128,128], index: 1, kind: input, shape index: {}]   ;;  %s8129_s5 = inlined_call_operand.vmem [shape: f32[8,128], index: 5, kind: input, shape index: {}]   ;;  %s8130_s11 = inlined_call_operand.vmem [shape: f32[8,128], index: 11, kind: output, shape index: {1}]   ;;  %s8131_s12 = inlined_call_operand.vmem [shape: f32[8,128], index: 12, kind: output, shape index: {2}]   ;;  %s8132_s10 = inlined_call_operand.vmem [shape: f32[8,128], index: 10, kind: output, shape index: {0}]  }
   0x1   :  { %v167_v0 = vld [vmem:[%s8120_s7] sm:$0xff]  ;;  %v168_v1 = vld [vmem:[%s8120_s7 + $0x8] sm:$0xff]  ;;  %v169_v2 = vld [vmem:[%s8120_s7 + $0x10] sm:$0xff]  ;;  %5115 = vmatprep.subr.bf16.mxu1 %v5576_v3  ;;  %4816 = vmatprep.mubr.msk.f32.mxu1 %vm8133_vm0, %v5578_v4  ;;  %vm1268_vm2 = vcmask 130048   ;;  %vm2079_vm3 = vcmask 261120   ;;  %vm2735_vm4 = vcmask 130112  }
   0x2   :  { %v5099_v5 = vpack.c.bf16 %v168_v1, %v167_v0  ;;  %v170_v6 = vld [vmem:[%s8120_s7 + $0x18] sm:$0xff]  ;;  %v1266_v7 = vld [vmem:[%s8121_s6] sm:$0xff]  ;;  %v1267_v8 = vld [vmem:[%s8121_s6 + $0x8] sm:$0xff]  ;;  %vm2742_vm5 = vcmask 195712   ;;  %vm2749_vm6 = vcmask 261312   ;;  %vm2756_vm7 = vcmask 326912  }
   0x3   :  { %v5103_v9 = vpack.c.bf16 %v170_v6, %v169_v2  ;;  %v5116_v10 = vpack.c.bf16 %v1267_v8, %v1266_v7  ;;  %v171_v11 = vld [vmem:[%s8120_s7 + $0x20] sm:$0xff]  ;;  %v172_v12 = vld [vmem:[%s8120_s7 + $0x28] sm:$0xff]  ;;  %v173_v16 = vld [vmem:[%s8120_s7 + $0x30] sm:$0xff]  ;;  %vm8135_vm8 = vcmask 392512   ;;  %vm2770_vm9 = vcmask 458112  }
   0x4   :  { %5100 = vmatprep.subr.bf16.mxu0 %v5099_v5  ;;  %v39_v13 = vld [vmem:[%s8122_s3] sm:$0xff]  ;;  %v5107_v15 = vpack.c.bf16 %v172_v12, %v171_v11  ;;  %v174_v17 = vld [vmem:[%s8120_s7 + $0x38] sm:$0xff]  ;;  %v40_v19 = vld [vmem:[%s8122_s3 + $0x8] sm:$0xff]  ;;  %vm2777_vm10 = vcmask 523712   ;;  %vm2784_vm11 = vcmask 589312   ;;  %vm2791_vm12 = vcmask 654912  }
   0x5   :  { %5102 = vmatpush3.bf16.msra.mxu0 %v5099_v5  ;;  %5117 = vmatpush3.bf16.msra.mxu1 %v5116_v10  ;;  %v1265_v14 = vld [vmem:[%s8123_s0] sm:$0xff]  ;;  %v5111_v18 = vpack.c.bf16 %v174_v17, %v173_v16  ;;  %v41_v20 = vld [vmem:[%s8122_s3 + $0x10] sm:$0xff]  ;;  %v42_v21 = vld [vmem:[%s8122_s3 + $0x18] sm:$0xff]  ;;  %vm2798_vm13 = vcmask 720512   ;;  %vm2805_vm14 = vcmask 786112   ;;  %vm2812_vm15 = vcmask 851712  }
   0x6   :  { %5104 = vmatprep.subr.bf16.mxu0 %v5103_v9  ;;  %4620 = vmatprep.mubr.msk.f32.mxu0 %vm175_vm1, %v39_v13  ;;  %v43_v22 = vld [vmem:[%s8122_s3 + $0x20] sm:$0xff]  ;;  %v44_v23 = vld [vmem:[%s8122_s3 + $0x28] sm:$0xff]  ;;  %v45_v24 = vld [vmem:[%s8122_s3 + $0x30] sm:$0xff] }
   0x7   :  { %5118 = vmatprep.subr.bf16.mxu1 %v5576_v3  ;;  %v46_v25 = vld [vmem:[%s8122_s3 + $0x38] sm:$0xff]  ;;  %v47_v26 = vld [vmem:[%s8122_s3 + $0x40] sm:$0xff]  ;;  %v48_v27 = vld [vmem:[%s8122_s3 + $0x48] sm:$0xff] }
   0x8   :  { %4817 = vmatmul.mubr.msk.f32.vlgmr.msra.gmra.mrb[0].mxu1 %vm1268_vm2, %v1265_v14  ;;  %v49_v28 = vld [vmem:[%s8122_s3 + $0x50] sm:$0xff]  ;;  %v50_v29 = vld [vmem:[%s8122_s3 + $0x58] sm:$0xff]  ;;  %v51_v30 = vld [vmem:[%s8122_s3 + $0x60] sm:$0xff]  ;;  %vm2826_vm2 = vcmask 982912  }
   0x9   :  { %5106 = vmatpush3.bf16.msra.mxu0 %v5103_v9  ;;  %4851 = vmatprep.mubr.msk.f32.mxu1 %vm8133_vm0, %v5578_v4  ;;  %v52_v31 = vld [vmem:[%s8122_s3 + $0x68] sm:$0xff]  ;;  %v53_v32 = vld [vmem:[%s8122_s3 + $0x70] sm:$0xff]  ;;  %v54_v33 = vld [vmem:[%s8122_s3 + $0x78] sm:$0xff]  ;;  %vm2833_vm0 = vcmask 1048512  }
   0xa   :  { %5108 = vmatprep.subr.bf16.mxu0 %v5107_v15  ;;  %v55_v34 = vld [vmem:[%s8122_s3 + $0x80] sm:$0xff]  ;;  %v56_v35 = vld [vmem:[%s8122_s3 + $0x88] sm:$0xff]  ;;  %v57_v36 = vld [vmem:[%s8122_s3 + $0x90] sm:$0xff] }
   0xb   :  { %v58_v37 = vld [vmem:[%s8122_s3 + $0x98] sm:$0xff]  ;;  %v59_v38 = vld [vmem:[%s8122_s3 + $0xa0] sm:$0xff]  ;;  %v60_v39 = vld [vmem:[%s8122_s3 + $0xa8] sm:$0xff] }
   0xc   :  { %v61_v40 = vld [vmem:[%s8122_s3 + $0xb0] sm:$0xff]  ;;  %v62_v41 = vld [vmem:[%s8122_s3 + $0xb8] sm:$0xff]  ;;  %v63_v42 = vld [vmem:[%s8122_s3 + $0xc0] sm:$0xff] }
   0xd   :  { %5110 = vmatpush3.bf16.msra.mxu0 %v5107_v15  ;;  %v64_v43 = vld [vmem:[%s8122_s3 + $0xc8] sm:$0xff]  ;;  %v65_v44 = vld [vmem:[%s8122_s3 + $0xd0] sm:$0xff]  ;;  %v66_v45 = vld [vmem:[%s8122_s3 + $0xd8] sm:$0xff] }
   0xe   :  { %5112 = vmatprep.subr.bf16.mxu0 %v5111_v18  ;;  %v67_v46 = vld [vmem:[%s8122_s3 + $0xe0] sm:$0xff]  ;;  %v68_v47 = vld [vmem:[%s8122_s3 + $0xe8] sm:$0xff]  ;;  %v69_v48 = vld [vmem:[%s8122_s3 + $0xf0] sm:$0xff] }
   0xf   :  { %v70_v49 = vld [vmem:[%s8122_s3 + $0xf8] sm:$0xff]  ;;  %v71_v50 = vld [vmem:[%s8122_s3 + $0x100] sm:$0xff]  ;;  %v72_v51 = vld [vmem:[%s8122_s3 + $0x108] sm:$0xff] }
  0x10   :  { %v73_v52 = vld [vmem:[%s8122_s3 + $0x110] sm:$0xff]  ;;  %v74_v53 = vld [vmem:[%s8122_s3 + $0x118] sm:$0xff]  ;;  %v75_v54 = vld [vmem:[%s8122_s3 + $0x120] sm:$0xff] }
  0x11   :  { %5114 = vmatpush3.bf16.msra.mxu0 %v5111_v18  ;;  %v76_v55 = vld [vmem:[%s8122_s3 + $0x128] sm:$0xff]  ;;  %v77_v56 = vld [vmem:[%s8122_s3 + $0x130] sm:$0xff]  ;;  %v78_v57 = vld [vmem:[%s8122_s3 + $0x138] sm:$0xff] }
  0x12   :  { %v79_v58 = vld [vmem:[%s8122_s3 + $0x140] sm:$0xff]  ;;  %v80_v59 = vld [vmem:[%s8122_s3 + $0x148] sm:$0xff]  ;;  %v81_v60 = vld [vmem:[%s8122_s3 + $0x150] sm:$0xff] }
  0x13   :  { %v82_v61 = vld [vmem:[%s8122_s3 + $0x158] sm:$0xff]  ;;  %v83_v62 = vld [vmem:[%s8122_s3 + $0x160] sm:$0xff]  ;;  %v84_v63 = vld [vmem:[%s8122_s3 + $0x168] sm:$0xff] }
  0x14   :  { %4621 = vmatmul.mubr.msk.f32.vlgmr.msra.gmra.mrb[0].mxu0 %vm175_vm1, %v40_v19  ;;  %v85_v0 = vld [vmem:[%s8122_s3 + $0x170] sm:$0xff]  ;;  %v86_v1 = vld [vmem:[%s8122_s3 + $0x178] sm:$0xff]  ;;  %v87_v2 = vld [vmem:[%s8122_s3 + $0x180] sm:$0xff] }
  0x15   :  { %4623 = vmatprep.mubr.msk.f32.mxu0 %vm175_vm1, %v41_v20  ;;  %v88_v5 = vld [vmem:[%s8122_s3 + $0x188] sm:$0xff]  ;;  %v89_v6 = vld [vmem:[%s8122_s3 + $0x190] sm:$0xff]  ;;  %v90_v7 = vld [vmem:[%s8122_s3 + $0x198] sm:$0xff] }
  0x16   :  { %v91_v8 = vld [vmem:[%s8122_s3 + $0x1a0] sm:$0xff]  ;;  %v92_v9 = vld [vmem:[%s8122_s3 + $0x1a8] sm:$0xff]  ;;  %v93_v10 = vld [vmem:[%s8122_s3 + $0x1b0] sm:$0xff] }
  0x17   :  { %v94_v11 = vld [vmem:[%s8122_s3 + $0x1b8] sm:$0xff]  ;;  %v95_v12 = vld [vmem:[%s8122_s3 + $0x1c0] sm:$0xff]  ;;  %v96_v13 = vld [vmem:[%s8122_s3 + $0x1c8] sm:$0xff] }
  0x18   :  { %4624 = vmatmul.mubr.msk.f32.gmra.mrb[2].mxu0 %vm175_vm1, %v42_v21  ;;  %v97_v14 = vld [vmem:[%s8122_s3 + $0x1d0] sm:$0xff]  ;;  %v98_v15 = vld [vmem:[%s8122_s3 + $0x1d8] sm:$0xff]  ;;  %v99_v16 = vld [vmem:[%s8122_s3 + $0x1e0] sm:$0xff] }
  0x19   :  { %4626 = vmatprep.mubr.msk.f32.mxu0 %vm175_vm1, %v43_v22  ;;  %v100_v17 = vld [vmem:[%s8122_s3 + $0x1e8] sm:$0xff]  ;;  %v101_v18 = vld [vmem:[%s8122_s3 + $0x1f0] sm:$0xff]  ;;  %v102_v19 = vld [vmem:[%s8122_s3 + $0x1f8] sm:$0xff] }
  0x1a   :  { %v103_v20 = vld [vmem:[%s8122_s3 + $0x200] sm:$0xff]  ;;  %v104_v21 = vld [vmem:[%s8122_s3 + $0x208] sm:$0xff]  ;;  %v105_v22 = vld [vmem:[%s8122_s3 + $0x210] sm:$0xff] }
  0x1c   :  { %4627 = vmatmul.mubr.msk.f32.gmra.mrb[4].mxu0 %vm175_vm1, %v44_v23  ;;  %v106_v23 = vld [vmem:[%s8122_s3 + $0x218] sm:$0xff] }
  0x1d   :  { %4629 = vmatprep.mubr.msk.f32.mxu0 %vm175_vm1, %v45_v24  ;;  %v107_v24 = vld [vmem:[%s8122_s3 + $0x220] sm:$0xff] }
  0x20   :  { %4630 = vmatmul.mubr.msk.f32.gmra.mrb[6].mxu0 %vm175_vm1, %v46_v25  ;;  %v108_v25 = vld [vmem:[%s8122_s3 + $0x228] sm:$0xff] }
  0x21   :  { %4632 = vmatprep.mubr.msk.f32.mxu0 %vm175_vm1, %v47_v26  ;;  %v109_v26 = vld [vmem:[%s8122_s3 + $0x230] sm:$0xff] }
  0x24   :  { %4633 = vmatmul.mubr.msk.f32.gmra.mrb[8].mxu0 %vm175_vm1, %v48_v27  ;;  %v110_v27 = vld [vmem:[%s8122_s3 + $0x238] sm:$0xff] }
  0x25   :  { %4635 = vmatprep.mubr.msk.f32.mxu0 %vm175_vm1, %v49_v28  ;;  %v111_v28 = vld [vmem:[%s8122_s3 + $0x240] sm:$0xff] }
  0x28   :  { %4636 = vmatmul.mubr.msk.f32.gmra.mrb[10].mxu0 %vm175_vm1, %v50_v29  ;;  %v112_v29 = vld [vmem:[%s8122_s3 + $0x248] sm:$0xff] }
  0x29   :  { %4638 = vmatprep.mubr.msk.f32.mxu0 %vm175_vm1, %v51_v30  ;;  %v113_v30 = vld [vmem:[%s8122_s3 + $0x250] sm:$0xff] }
  0x2c   :  { %4639 = vmatmul.mubr.msk.f32.gmra.mrb[12].mxu0 %vm175_vm1, %v52_v31  ;;  %v114_v31 = vld [vmem:[%s8122_s3 + $0x258] sm:$0xff] }
  0x2d   :  { %4641 = vmatprep.mubr.msk.f32.mxu0 %vm175_vm1, %v53_v32  ;;  %v115_v32 = vld [vmem:[%s8122_s3 + $0x260] sm:$0xff] }
  0x30   :  { %4642 = vmatmul.mubr.msk.f32.gmra.mrb[14].mxu0 %vm175_vm1, %v54_v33  ;;  %v116_v33 = vld [vmem:[%s8122_s3 + $0x268] sm:$0xff] }
  0x31   :  { %4644 = vmatprep.mubr.msk.f32.mxu0 %vm175_vm1, %v55_v34  ;;  %v117_v34 = vld [vmem:[%s8122_s3 + $0x270] sm:$0xff] }
  0x34   :  { %4645 = vmatmul.mubr.msk.f32.gmra.mrb[16].mxu0 %vm175_vm1, %v56_v35  ;;  %v118_v35 = vld [vmem:[%s8122_s3 + $0x278] sm:$0xff] }
  0x35   :  { %4647 = vmatprep.mubr.msk.f32.mxu0 %vm175_vm1, %v57_v36  ;;  %v119_v36 = vld [vmem:[%s8122_s3 + $0x280] sm:$0xff] }
  0x38   :  { %4648 = vmatmul.mubr.msk.f32.gmra.mrb[18].mxu0 %vm175_vm1, %v58_v37  ;;  %v120_v37 = vld [vmem:[%s8122_s3 + $0x288] sm:$0xff] }
  0x39   :  { %4650 = vmatprep.mubr.msk.f32.mxu0 %vm175_vm1, %v59_v38  ;;  %v121_v38 = vld [vmem:[%s8122_s3 + $0x290] sm:$0xff] }
  0x3c   :  { %4651 = vmatmul.mubr.msk.f32.gmra.mrb[20].mxu0 %vm175_vm1, %v60_v39  ;;  %v122_v39 = vld [vmem:[%s8122_s3 + $0x298] sm:$0xff] }
  0x3d   :  { %4653 = vmatprep.mubr.msk.f32.mxu0 %vm175_vm1, %v61_v40  ;;  %v123_v40 = vld [vmem:[%s8122_s3 + $0x2a0] sm:$0xff] }
  0x40   :  { %4654 = vmatmul.mubr.msk.f32.gmra.mrb[22].mxu0 %vm175_vm1, %v62_v41  ;;  %v124_v41 = vld [vmem:[%s8122_s3 + $0x2a8] sm:$0xff] }
  0x41   :  { %4656 = vmatprep.mubr.msk.f32.mxu0 %vm175_vm1, %v63_v42  ;;  %v125_v42 = vld [vmem:[%s8122_s3 + $0x2b0] sm:$0xff] }
  0x44   :  { %4657 = vmatmul.mubr.msk.f32.gmra.mrb[24].mxu0 %vm175_vm1, %v64_v43  ;;  %v126_v43 = vld [vmem:[%s8122_s3 + $0x2b8] sm:$0xff] }
  0x45   :  { %4659 = vmatprep.mubr.msk.f32.mxu0 %vm175_vm1, %v65_v44  ;;  %v127_v44 = vld [vmem:[%s8122_s3 + $0x2c0] sm:$0xff] }
  0x48   :  { %4660 = vmatmul.mubr.msk.f32.gmra.mrb[26].mxu0 %vm175_vm1, %v66_v45  ;;  %v128_v45 = vld [vmem:[%s8122_s3 + $0x2c8] sm:$0xff] }
  0x49   :  { %4662 = vmatprep.mubr.msk.f32.mxu0 %vm175_vm1, %v67_v46  ;;  %v129_v46 = vld [vmem:[%s8122_s3 + $0x2d0] sm:$0xff] }
  0x4c   :  { %4663 = vmatmul.mubr.msk.f32.gmra.mrb[28].mxu0 %vm175_vm1, %v68_v47  ;;  %v130_v47 = vld [vmem:[%s8122_s3 + $0x2d8] sm:$0xff] }
  0x4d   :  { %4665 = vmatprep.mubr.msk.f32.mxu0 %vm175_vm1, %v69_v48  ;;  %v131_v48 = vld [vmem:[%s8122_s3 + $0x2e0] sm:$0xff] }
  0x50   :  { %4666 = vmatmul.mubr.msk.f32.gmra.mrb[30].mxu0 %vm175_vm1, %v70_v49  ;;  %v132_v49 = vld [vmem:[%s8122_s3 + $0x2e8] sm:$0xff] }
  0x51   :  { %4668 = vmatprep.mubr.msk.f32.mxu0 %vm175_vm1, %v71_v50  ;;  %v133_v50 = vld [vmem:[%s8122_s3 + $0x2f0] sm:$0xff] }
  0x54   :  { %4669 = vmatmul.mubr.msk.f32.gmra.mrb[32].mxu0 %vm175_vm1, %v72_v51  ;;  %v134_v51 = vld [vmem:[%s8122_s3 + $0x2f8] sm:$0xff] }
  0x55   :  { %4671 = vmatprep.mubr.msk.f32.mxu0 %vm175_vm1, %v73_v52  ;;  %v135_v52 = vld [vmem:[%s8122_s3 + $0x300] sm:$0xff] }
  0x58   :  { %4672 = vmatmul.mubr.msk.f32.gmra.mrb[34].mxu0 %vm175_vm1, %v74_v53  ;;  %v5579_v53 = vmov 1966171168  }
  0x59   :  { %4674 = vmatprep.mubr.msk.f32.mxu0 %vm175_vm1, %v75_v54  ;;  %v1345_v54 = vunpack.c.l.s4 %v5579_v53  ;;  %v1565_v53 = vld [vmem:[%s8124_s2 + $0x28] sm:$0xff] }
  0x5c   :  { %4675 = vmatmul.mubr.msk.f32.gmra.mrb[36].mxu0 %vm175_vm1, %v76_v55  ;;  %v1347_v55 = vlaneseq }
  0x5d   :  { %4677 = vmatprep.mubr.msk.f32.mxu0 %vm175_vm1, %v77_v56  ;;  %v136_v56 = vld [vmem:[%s8122_s3 + $0x308] sm:$0xff] }
  0x60   :  { %4678 = vmatmul.mubr.msk.f32.gmra.mrb[38].mxu0 %vm175_vm1, %v78_v57  ;;  %v137_v57 = vld [vmem:[%s8122_s3 + $0x310] sm:$0xff] }
  0x61   :  { %4680 = vmatprep.mubr.msk.f32.mxu0 %vm175_vm1, %v79_v58  ;;  %v1346_v58 = vunpack.c.0.s8 %v1345_v54 }
  0x64   :  { %4681 = vmatmul.mubr.msk.f32.gmra.mrb[40].mxu0 %vm175_vm1, %v80_v59  ;;  %v6080_v59 = vshrl.u32 %v1347_v55, 7 }
  0x65   :  { %4683 = vmatprep.mubr.msk.f32.mxu0 %vm175_vm1, %v81_v60  ;;  %v138_v60 = vld [vmem:[%s8122_s3 + $0x318] sm:$0xff] }
  0x68   :  { %4684 = vmatmul.mubr.msk.f32.gmra.mrb[42].mxu0 %vm175_vm1, %v82_v61  ;;  %v139_v61 = vld [vmem:[%s8122_s3 + $0x320] sm:$0xff] }
  0x69   :  { %4686 = vmatprep.mubr.msk.f32.mxu0 %vm175_vm1, %v83_v62  ;;  %v6091_v62 = vsub.s32 %v1346_v58, %v6080_v59 }
  0x6c   :  { %4687 = vmatmul.mubr.msk.f32.gmra.mrb[44].mxu0 %vm175_vm1, %v84_v63  ;;  %v140_v63 = vld [vmem:[%s8122_s3 + $0x328] sm:$0xff] }
  0x6d   :  { %4689 = vmatprep.mubr.msk.f32.mxu0 %vm175_vm1, %v85_v0  ;;  %v141_v0 = vld [vmem:[%s8122_s3 + $0x330] sm:$0xff] }
  0x70   :  { %4690 = vmatmul.mubr.msk.f32.gmra.mrb[46].mxu0 %vm175_vm1, %v86_v1 }
  0x71   :  { %4692 = vmatprep.mubr.msk.f32.mxu0 %vm175_vm1, %v87_v2 }
  0x74   :  { %4693 = vmatmul.mubr.msk.f32.gmra.mrb[48].mxu0 %vm175_vm1, %v88_v5 }
  0x75   :  { %4695 = vmatprep.mubr.msk.f32.mxu0 %vm175_vm1, %v89_v6 }
  0x78   :  { %4696 = vmatmul.mubr.msk.f32.gmra.mrb[50].mxu0 %vm175_vm1, %v90_v7  ;;  %v142_v7 = vld [vmem:[%s8122_s3 + $0x338] sm:$0xff] }
  0x79   :  { %4698 = vmatprep.mubr.msk.f32.mxu0 %vm175_vm1, %v91_v8 }
  0x7c   :  { %4699 = vmatmul.mubr.msk.f32.gmra.mrb[52].mxu0 %vm175_vm1, %v92_v9 }
  0x7d   :  { %4701 = vmatprep.mubr.msk.f32.mxu0 %vm175_vm1, %v93_v10 }
  0x80   :  { %4702 = vmatmul.mubr.msk.f32.gmra.mrb[54].mxu0 %vm175_vm1, %v94_v11  ;;  %v143_v11 = vld [vmem:[%s8122_s3 + $0x340] sm:$0xff] }
  0x81   :  { %4704 = vmatprep.mubr.msk.f32.mxu0 %vm175_vm1, %v95_v12  ;;  %v6112_v12 = vsub.s32 0, %v6080_v59 }
  0x84   :  { %4705 = vmatmul.mubr.msk.f32.gmra.mrb[56].mxu0 %vm175_vm1, %v96_v13 }
  0x85   :  { %4707 = vmatprep.mubr.msk.f32.mxu0 %vm175_vm1, %v97_v14 }
  0x88   :  { %4708 = vmatmul.mubr.msk.f32.gmra.mrb[58].mxu0 %vm175_vm1, %v98_v15 }
  0x89   :  { %4710 = vmatprep.mubr.msk.f32.mxu0 %vm175_vm1, %v99_v16 }
  0x8c   :  { %4711 = vmatmul.mubr.msk.f32.gmra.mrb[60].mxu0 %vm175_vm1, %v100_v17  ;;  %v144_v17 = vld [vmem:[%s8122_s3 + $0x348] sm:$0xff] }
  0x8d   :  { %4713 = vmatprep.mubr.msk.f32.mxu0 %vm175_vm1, %v101_v18 }
  0x90   :  { %4714 = vmatmul.mubr.msk.f32.gmra.mrb[62].mxu0 %vm175_vm1, %v102_v19 }
  0x91   :  { %4716 = vmatprep.mubr.msk.f32.mxu0 %vm175_vm1, %v103_v20 }
  0x94   :  { %4717 = vmatmul.mubr.msk.f32.gmra.mrb[64].mxu0 %vm175_vm1, %v104_v21  ;;  %v145_v21 = vld [vmem:[%s8122_s3 + $0x350] sm:$0xff] }
  0x95   :  { %4719 = vmatprep.mubr.msk.f32.mxu0 %vm175_vm1, %v105_v22 }
  0x98   :  { %4720 = vmatmul.mubr.msk.f32.gmra.mrb[66].mxu0 %vm175_vm1, %v106_v23 }
  0x99   :  { %4722 = vmatprep.mubr.msk.f32.mxu0 %vm175_vm1, %v107_v24 }
  0x9c   :  { %4723 = vmatmul.mubr.msk.f32.gmra.mrb[68].mxu0 %vm175_vm1, %v108_v25 }
  0x9d   :  { %4725 = vmatprep.mubr.msk.f32.mxu0 %vm175_vm1, %v109_v26 }
  0xa0   :  { %4726 = vmatmul.mubr.msk.f32.gmra.mrb[70].mxu0 %vm175_vm1, %v110_v27 }
  0xa1   :  { %4728 = vmatprep.mubr.msk.f32.mxu0 %vm175_vm1, %v111_v28 }
  0xa4   :  { %4729 = vmatmul.mubr.msk.f32.gmra.mrb[72].mxu0 %vm175_vm1, %v112_v29  ;;  %v146_v29 = vld [vmem:[%s8122_s3 + $0x358] sm:$0xff] }
  0xa5   :  { %4731 = vmatprep.mubr.msk.f32.mxu0 %vm175_vm1, %v113_v30 }
  0xa8   :  { %4732 = vmatmul.mubr.msk.f32.gmra.mrb[74].mxu0 %vm175_vm1, %v114_v31  ;;  %v147_v31 = vld [vmem:[%s8122_s3 + $0x360] sm:$0xff] }
  0xa9   :  { %4734 = vmatprep.mubr.msk.f32.mxu0 %vm175_vm1, %v115_v32 }
  0xac   :  { %4735 = vmatmul.mubr.msk.f32.gmra.mrb[76].mxu0 %vm175_vm1, %v116_v33  ;;  %v1561_v33 = vld [vmem:[%s8124_s2 + $0x8] sm:$0xff] }
  0xad   :  { %4737 = vmatprep.mubr.msk.f32.mxu0 %vm175_vm1, %v117_v34 }
  0xb0   :  { %4738 = vmatmul.mubr.msk.f32.gmra.mrb[78].mxu0 %vm175_vm1, %v118_v35 }
  0xb1   :  { %4740 = vmatprep.mubr.msk.f32.mxu0 %vm175_vm1, %v119_v36  ;;  %v1560_v36 = vld [vmem:[%s8124_s2] sm:$0xff] }
  0xb4   :  { %4741 = vmatmul.mubr.msk.f32.gmra.mrb[80].mxu0 %vm175_vm1, %v120_v37 }
  0xb5   :  { %4743 = vmatprep.mubr.msk.f32.mxu0 %vm175_vm1, %v121_v38  ;;  %v148_v38 = vld [vmem:[%s8122_s3 + $0x368] sm:$0xff] }
  0xb8   :  { %4744 = vmatmul.mubr.msk.f32.gmra.mrb[82].mxu0 %vm175_vm1, %v122_v39 }
  0xb9   :  { %4746 = vmatprep.mubr.msk.f32.mxu0 %vm175_vm1, %v123_v40  ;;  %v149_v40 = vld [vmem:[%s8122_s3 + $0x370] sm:$0xff] }
  0xbc   :  { %4747 = vmatmul.mubr.msk.f32.gmra.mrb[84].mxu0 %vm175_vm1, %v124_v41 }
  0xbd   :  { %4749 = vmatprep.mubr.msk.f32.mxu0 %vm175_vm1, %v125_v42 }
  0xc0   :  { %4750 = vmatmul.mubr.msk.f32.gmra.mrb[86].mxu0 %vm175_vm1, %v126_v43  ;;  %v1563_v43 = vld [vmem:[%s8124_s2 + $0x18] sm:$0xff] }
  0xc1   :  { %4752 = vmatprep.mubr.msk.f32.mxu0 %vm175_vm1, %v127_v44 }
  0xc4   :  { %4753 = vmatmul.mubr.msk.f32.gmra.mrb[88].mxu0 %vm175_vm1, %v128_v45 }
  0xc5   :  { %4755 = vmatprep.mubr.msk.f32.mxu0 %vm175_vm1, %v129_v46  ;;  %v1562_v46 = vld [vmem:[%s8124_s2 + $0x10] sm:$0xff] }
  0xc8   :  { %4756 = vmatmul.mubr.msk.f32.gmra.mrb[90].mxu0 %vm175_vm1, %v130_v47 }
  0xc9   :  { %4758 = vmatprep.mubr.msk.f32.mxu0 %vm175_vm1, %v131_v48  ;;  %v150_v48 = vld [vmem:[%s8122_s3 + $0x378] sm:$0xff] }
  0xcc   :  { %4759 = vmatmul.mubr.msk.f32.gmra.mrb[92].mxu0 %vm175_vm1, %v132_v49 }
  0xcd   :  { %4761 = vmatprep.mubr.msk.f32.mxu0 %vm175_vm1, %v133_v50  ;;  %v151_v50 = vld [vmem:[%s8122_s3 + $0x380] sm:$0xff] }
  0xd0   :  { %4762 = vmatmul.mubr.msk.f32.gmra.mrb[94].mxu0 %vm175_vm1, %v134_v51 }
  0xd1   :  { %4764 = vmatprep.mubr.msk.f32.mxu0 %vm175_vm1, %v135_v52 }
  0xd4   :  { %4765 = vmatmul.mubr.msk.f32.gmra.mrb[96].mxu0 %vm175_vm1, %v136_v56 }
  0xd5   :  { %4767 = vmatprep.mubr.msk.f32.mxu0 %vm175_vm1, %v137_v57  ;;  %v1564_v57 = vld [vmem:[%s8124_s2 + $0x20] sm:$0xff] }
  0xd8   :  { %4768 = vmatmul.mubr.msk.f32.gmra.mrb[98].mxu0 %vm175_vm1, %v138_v60  ;;  %v152_v60 = vld [vmem:[%s8122_s3 + $0x388] sm:$0xff] }
  0xd9   :  { %4770 = vmatprep.mubr.msk.f32.mxu0 %vm175_vm1, %v139_v61 }
  0xdb   :  { %v1338_v1 = vpop.f32.mrb[0].mxu1 }
  0xdc   :  { %4771 = vmatmul.mubr.msk.f32.gmra.mrb[100].mxu0 %vm175_vm1, %v140_v63  ;;  %v1343_v2 = vcombine.high %v1338_v1, %v1338_v1  ;;  %v1350_v5 = vrot.slane %v1338_v1, %v6091_v62  ;;  %v4818_v6 = vpop.f32.mrb[1].mxu1  ;;  %v153_v63 = vld [vmem:[%s8122_s3 + $0x390] sm:$0xff] }
  0xdd   :  { %4773 = vmatprep.mubr.msk.f32.mxu0 %vm175_vm1, %v141_v0 }
  0xde   :  { %v1357_v8 = vrot.slane %v1343_v2, %v6091_v62  ;;  %v1358_v9 = vcombine.high %v1350_v5, %v1350_v5  ;;  %v1366_v10 = vrot.slane %v1350_v5, %v6091_v62  ;;  %v1567_v2 = vld [vmem:[%s8124_s2 + $0x38] sm:$0xff] }
  0xe0   :  { %4774 = vmatmul.mubr.msk.f32.gmra.mrb[102].mxu0 %vm175_vm1, %v142_v7  ;;  %v1359_v13 = vcombine.high %v1357_v8, %v1357_v8  ;;  %v1373_v14 = vrot.slane %v1357_v8, %v6091_v62  ;;  %v6117_v15 = vrot.slane %v1358_v9, %v6091_v62  ;;  %v1388_v16 = vcombine.high %v1366_v10, %v1366_v10  ;;  %v1566_v7 = vld [vmem:[%s8124_s2 + $0x30] sm:$0xff]  ;;  %v6217_v8 = vld [vmem:[%s8125_s8] ss:$0 sm:$0xff] }
  0xe1   :  { %4776 = vmatprep.mubr.msk.f32.mxu0 %vm175_vm1, %v143_v11  ;;  %v6130_v22 = vrot.slane %v1366_v10, %v6112_v12  ;;  %v154_v10 = vld [vmem:[%s8122_s3 + $0x398] sm:$0xff] }
  0xe2   :  { %v1387_v18 = vrot.slane %v1359_v13, %v6091_v62  ;;  %v1389_v19 = vcombine.high %v1373_v14, %v1373_v14  ;;  %v1390_v20 = vcombine.high %v6117_v15, %v6117_v15  ;;  %v6133_v23 = vrot.slane %v1388_v16, %v6112_v12 }
  0xe3   :  { %v6136_v24 = vrot.slane %v1373_v14, %v6112_v12  ;;  %v155_v14 = vld [vmem:[%s8122_s3 + $0x3a0] sm:$0xff] }
  0xe4   :  { %v1391_v25 = vcombine.high %v1387_v18, %v1387_v18  ;;  %v6139_v26 = vrot.slane %v1390_v20, %v6112_v12  ;;  %v6142_v27 = vrot.slane %v1387_v18, %v6112_v12  ;;  %v6145_v28 = vrot.slane %v1389_v19, %v6112_v12  ;;  %4777 = vmatmul.mubr.msk.f32.gmra.mrb[104].mxu0 %vm175_vm1, %v144_v17  ;;  %v1569_v19 = vld [vmem:[%s8124_s2 + $0x48] sm:$0xff] }
  0xe5   :  { %4779 = vmatprep.mubr.msk.f32.mxu0 %vm175_vm1, %v145_v21 }
  0xe6   :  { %v6153_v30 = vrot.slane %v1391_v25, %v6112_v12 }
  0xe7   :  { %v4622_v32 = vpop.f32.mrb[0].mxu0 }
  0xe8   :  { %v1433_v34 = vadd.f32 %v4622_v32, %v6130_v22  ;;  %v626_v35 = vpop.f32.mrb[1].mxu0  ;;  %4780 = vmatmul.mubr.msk.f32.gmra.mrb[106].mxu0 %vm175_vm1, %v146_v29  ;;  %v1568_v29 = vld [vmem:[%s8124_s2 + $0x40] sm:$0xff] }
  0xe9   :  { %v1432_v37 = vadd.f32 %v6130_v22, %v626_v35  ;;  %4782 = vmatprep.mubr.msk.f32.mxu0 %vm175_vm1, %v147_v31 }
  0xea   :  { %v1689_v39 = vadd.f32 %v1561_v33, %v1433_v34  ;;  %v156_v33 = vld [vmem:[%s8122_s3 + $0x3a8] sm:$0xff] }
  0xeb   :  { %v1688_v41 = vadd.f32 %v1560_v36, %v1432_v37  ;;  %v4625_v42 = vpop.f32.mrb[2].mxu0  ;;  %v157_v37 = vld [vmem:[%s8122_s3 + $0x3b0] sm:$0xff] }
  0xec   :  { %5314 = vtanh.f32 %v1689_v39  ;;  %v1435_v44 = vadd.f32 %v4625_v42, %v6130_v22  ;;  %v636_v45 = vpop.f32.mrb[3].mxu0  ;;  %4783 = vmatmul.mubr.msk.f32.gmra.mrb[108].mxu0 %vm175_vm1, %v148_v38 }
  0xed   :  { %5316 = vtanh.f32 %v1688_v41  ;;  %v1434_v47 = vadd.f32 %v6130_v22, %v636_v45  ;;  %4785 = vmatprep.mubr.msk.f32.mxu0 %vm175_vm1, %v149_v40  ;;  %v1571_v40 = vld [vmem:[%s8124_s2 + $0x58] sm:$0xff]  ;;  %v1570_v45 = vld [vmem:[%s8124_s2 + $0x50] sm:$0xff] }
  0xee   :  { %v1691_v49 = vadd.f32 %v1563_v43, %v1435_v44 }
  0xef   :  { %v1690_v51 = vadd.f32 %v1562_v46, %v1434_v47  ;;  %v4628_v52 = vpop.f32.mrb[4].mxu0  ;;  %v158_v47 = vld [vmem:[%s8122_s3 + $0x3b8] sm:$0xff] }
  0xf0   :  { %5318 = vtanh.f32 %v1691_v49  ;;  %v1437_v54 = vadd.f32 %v4628_v52, %v6130_v22  ;;  %v646_v56 = vpop.f32.mrb[5].mxu0  ;;  %4786 = vmatmul.mubr.msk.f32.gmra.mrb[110].mxu0 %vm175_vm1, %v150_v48 }
  0xf1   :  { %v1436_v58 = vadd.f32 %v6130_v22, %v646_v56  ;;  %4788 = vmatprep.mubr.msk.f32.mxu0 %vm175_vm1, %v151_v50  ;;  %5320 = vtanh.f32 %v1690_v51  ;;  %v159_v51 = vld [vmem:[%s8122_s3 + $0x3c0] sm:$0xff] }
  0xf2   :  { %v1693_v61 = vadd.f32 %v1565_v53, %v1437_v54 }
  0xf3   :  { %v1692_v0 = vadd.f32 %v1564_v57, %v1436_v58  ;;  %v4631_v1 = vpop.f32.mrb[6].mxu0 }
  0xf4   :  { %5322 = vtanh.f32 %v1693_v61  ;;  %v1439_v5 = vadd.f32 %v4631_v1, %v6130_v22  ;;  %v656_v6 = vpop.f32.mrb[7].mxu0  ;;  %4789 = vmatmul.mubr.msk.f32.gmra.mrb[112].mxu0 %vm175_vm1, %v152_v60  ;;  %v1573_v61 = vld [vmem:[%s8124_s2 + $0x68] sm:$0xff] }
  0xf5   :  { %5324 = vtanh.f32 %v1692_v0  ;;  %v1438_v9 = vadd.f32 %v6130_v22, %v656_v6  ;;  %4791 = vmatprep.mubr.msk.f32.mxu0 %vm175_vm1, %v153_v63 }
  0xf6   :  { %v5315_v11 = vpop.eup %5314  ;;  %v1695_v13 = vadd.f32 %v1567_v2, %v1439_v5  ;;  %v160_v2 = vld [vmem:[%s8122_s3 + $0x3c8] sm:$0xff] }
  0xf7   :  { %v5317_v16 = vpop.eup %5316  ;;  %v1694_v17 = vadd.f32 %v1566_v7, %v1438_v9  ;;  %v4634_v18 = vpop.f32.mrb[8].mxu0  ;;  %v1952_v20 = vmul.f32 %v5315_v11, %v6217_v8  ;;  %v161_v7 = vld [vmem:[%s8122_s3 + $0x3d0] sm:$0xff] }
  0xf8   :  { %5326 = vtanh.f32 %v1695_v13  ;;  %v1441_v21 = vadd.f32 %v4634_v18, %v6130_v22  ;;  %v666_v25 = vpop.f32.mrb[9].mxu0  ;;  %4792 = vmatmul.mubr.msk.f32.gmra.mrb[114].mxu0 %vm175_vm1, %v154_v10  ;;  %v1951_v34 = vmul.f32 %v5317_v16, %v6217_v8  ;;  %v1572_v16 = vld [vmem:[%s8124_s2 + $0x60] sm:$0xff] }
  0xf9   :  { %v1440_v31 = vadd.f32 %v6130_v22, %v666_v25  ;;  %v2083_v32 = vsel %vm2079_vm3, %v1952_v20, 0.0  ;;  %4794 = vmatprep.mubr.msk.f32.mxu0 %vm175_vm1, %v155_v14  ;;  %5328 = vtanh.f32 %v1694_v17  ;;  %v162_v20 = vld [vmem:[%s8122_s3 + $0x3d8] sm:$0xff] }
  0xfa   :  { %v5319_v35 = vpop.eup %5318  ;;  %v1697_v36 = vadd.f32 %v1569_v19, %v1441_v21  ;;  %2084 = vadd.xlane.f32.xlu0 %v2083_v32  ;;  %v2080_v46 = vsel %vm2079_vm3, %v1951_v34, 0.0 }
  0xfb   :  { %v1696_v38 = vadd.f32 %v1568_v29, %v1440_v31  ;;  %v4637_v39 = vpop.f32.mrb[10].mxu0  ;;  %v5321_v43 = vpop.eup %5320  ;;  %v1954_v48 = vmul.f32 %v5319_v35, %v6217_v8  ;;  %v6297_v29 = vrot.slane %v6117_v15, %v6112_v12  ;;  %v1575_v15 = vld [vmem:[%s8124_s2 + $0x78] sm:$0xff] }
  0xfc   :  { %5330 = vtanh.f32 %v1697_v36  ;;  %v1443_v41 = vadd.f32 %v4637_v39, %v6130_v22  ;;  %v676_v42 = vpop.f32.mrb[11].mxu0  ;;  %4795 = vmatmul.mubr.msk.f32.gmra.mrb[116].mxu0 %vm175_vm1, %v156_v33  ;;  %v1953_v60 = vmul.f32 %v5321_v43, %v6217_v8  ;;  %v165_v43 = vld [vmem:[%s8122_s3 + $0x3f0] sm:$0xff] }
  0xfd   :  { %5332 = vtanh.f32 %v1696_v38  ;;  %v1442_v44 = vadd.f32 %v6130_v22, %v676_v42  ;;  %4797 = vmatprep.mubr.msk.f32.mxu0 %vm175_vm1, %v157_v37  ;;  %v2089_v1 = vsel %vm2079_vm3, %v1954_v48, 0.0 }
  0xfe   :  { %v5323_v49 = vpop.eup %5322  ;;  %v1699_v50 = vadd.f32 %v1571_v40, %v1443_v41  ;;  %2081 = vadd.xlane.f32.xlu0 %v2080_v46  ;;  %v2086_v19 = vsel %vm2079_vm3, %v1953_v60, 0.0  ;;  %v164_v40 = vld [vmem:[%s8122_s3 + $0x3e8] sm:$0xff]  ;;  %v1574_v46 = vld [vmem:[%s8124_s2 + $0x70] sm:$0xff] }
  0xff   :  { %v5325_v52 = vpop.eup %5324  ;;  %v4640_v53 = vpop.f32.mrb[12].mxu0  ;;  %v1956_v54 = vmul.f32 %v5323_v49, %v6217_v8  ;;  %v1698_v56 = vadd.f32 %v1570_v45, %v1442_v44 }
 0x100   :  { %5334 = vtanh.f32 %v1699_v50  ;;  %v1445_v57 = vadd.f32 %v4640_v53, %v6130_v22  ;;  %v686_v58 = vpop.f32.mrb[13].mxu0  ;;  %4798 = vmatmul.mubr.msk.f32.gmra.mrb[118].mxu0 %vm175_vm1, %v158_v47  ;;  %v1955_v5 = vmul.f32 %v5325_v52, %v6217_v8  ;;  %v166_v52 = vld [vmem:[%s8122_s3 + $0x3f8] sm:$0xff] }
 0x101   :  { %v1444_v63 = vadd.f32 %v6130_v22, %v686_v58  ;;  %v2095_v0 = vsel %vm2079_vm3, %v1956_v54, 0.0  ;;  %4800 = vmatprep.mubr.msk.f32.mxu0 %vm175_vm1, %v159_v51  ;;  %5336 = vtanh.f32 %v1698_v56  ;;  %v1581_v58 = vld [vmem:[%s8124_s2 + $0xa8] sm:$0xff] }
 0x102   :  { %v5327_v6 = vpop.eup %5326  ;;  %2096 = vadd.xlane.f32.xlu1 %v2095_v0  ;;  %2090 = vadd.xlane.f32.xlu0 %v2089_v1  ;;  %v1701_v10 = vadd.f32 %v1573_v61, %v1445_v57  ;;  %v2092_v18 = vsel %vm2079_vm3, %v1955_v5, 0.0  ;;  %v1577_v0 = vld [vmem:[%s8124_s2 + $0x88] sm:$0xff] }
 0x103   :  { %v4643_v9 = vpop.f32.mrb[14].mxu0  ;;  %v5329_v14 = vpop.eup %5328  ;;  %v1958_v21 = vmul.f32 %v5327_v6, %v6217_v8  ;;  %v1700_v34 = vadd.f32 %v1572_v16, %v1444_v63  ;;  %v1580_v63 = vld [vmem:[%s8124_s2 + $0xa0] sm:$0xff] }
 0x104   :  { %v1447_v11 = vadd.f32 %v4643_v9, %v6130_v22  ;;  %v696_v13 = vpop.f32.mrb[15].mxu0  ;;  %4801 = vmatmul.mubr.msk.f32.gmra.mrb[120].mxu0 %vm175_vm1, %v160_v2  ;;  %5338 = vtanh.f32 %v1701_v10  ;;  %v1957_v12 = vmul.f32 %v5329_v14, %v6217_v8 }
 0x105   :  { %v1446_v17 = vadd.f32 %v6130_v22, %v696_v13  ;;  %4803 = vmatprep.mubr.msk.f32.mxu0 %vm175_vm1, %v161_v7  ;;  %v163_v22 = vld [vmem:[%s8122_s3 + $0x3e0] sm:$0xff]  ;;  %v2101_v39 = vsel %vm2079_vm3, %v1958_v21, 0.0  ;;  %5340 = vtanh.f32 %v1700_v34 }
 0x106   :  { %v5331_v25 = vpop.eup %5330  ;;  %2093 = vadd.xlane.f32.xlu1 %v2092_v18  ;;  %2087 = vadd.xlane.f32.xlu0 %v2086_v19  ;;  %v1703_v45 = vadd.f32 %v1575_v15, %v1447_v11  ;;  %v2098_v51 = vsel %vm2079_vm3, %v1957_v12, 0.0  ;;  %v1576_v13 = vld [vmem:[%s8124_s2 + $0x80] sm:$0xff] }
 0x107   :  { %v5333_v31 = vpop.eup %5332  ;;  %v4646_v32 = vpop.f32.mrb[16].mxu0  ;;  %v1960_v33 = vmul.f32 %v5331_v25, %v6217_v8  ;;  %v1702_v56 = vadd.f32 %v1574_v46, %v1446_v17  ;;  %v1584_v34 = vld [vmem:[%s8124_s2 + $0xc0] sm:$0xff] }
 0x108   :  { %v1449_v35 = vadd.f32 %v4646_v32, %v6297_v29  ;;  %v706_v36 = vpop.f32.mrb[17].mxu0  ;;  %4804 = vmatmul.mubr.msk.f32.gmra.mrb[122].mxu0 %vm175_vm1, %v162_v20  ;;  %v1959_v41 = vmul.f32 %v5333_v31, %v6217_v8  ;;  %5342 = vtanh.f32 %v1703_v45  ;;  %v1579_v31 = vld [vmem:[%s8124_s2 + $0x98] sm:$0xff] }
 0x109   :  { %v1448_v37 = vadd.f32 %v6297_v29, %v706_v36  ;;  %v2107_v38 = vsel %vm2079_vm3, %v1960_v33, 0.0  ;;  %4806 = vmatprep.mubr.msk.f32.mxu0 %vm175_vm1, %v163_v22  ;;  %5344 = vtanh.f32 %v1702_v56  ;;  %v1585_v22 = vld [vmem:[%s8124_s2 + $0xc8] sm:$0xff] }
 0x10a   :  { %v5335_v42 = vpop.eup %5334  ;;  %2108 = vadd.xlane.f32.xlu1 %v2107_v38  ;;  %2102 = vadd.xlane.f32.xlu0 %v2101_v39  ;;  %v2104_v50 = vsel %vm2079_vm3, %v1959_v41, 0.0  ;;  %v1705_v11 = vadd.f32 %v1577_v0, %v1449_v35  ;;  %v1587_v41 = vld [vmem:[%s8124_s2 + $0xd8] sm:$0xff] }
 0x10b   :  { %v4649_v44 = vpop.f32.mrb[18].mxu0  ;;  %v1962_v53 = vmul.f32 %v5335_v42, %v6217_v8  ;;  %v5337_v54 = vpop.eup %5336  ;;  %v1704_v21 = vadd.f32 %v1576_v13, %v1448_v37  ;;  %v1578_v42 = vld [vmem:[%s8124_s2 + $0x90] sm:$0xff] }
 0x10c   :  { %v1451_v47 = vadd.f32 %v4649_v44, %v6297_v29  ;;  %v716_v48 = vpop.f32.mrb[19].mxu0  ;;  %4807 = vmatmul.mubr.msk.f32.gmra.mrb[124].mxu0 %vm175_vm1, %v164_v40  ;;  %v1961_v5 = vmul.f32 %v5337_v54, %v6217_v8 }
 0x10d   :  { %v6326_v49 = vadd.f32 %v6297_v29, %v716_v48  ;;  %4809 = vmatprep.mubr.msk.f32.mxu0 %vm175_vm1, %v165_v43  ;;  %v2113_v2 = vsel %vm2079_vm3, %v1962_v53, 0.0 }
 0x10e   :  { %2105 = vadd.xlane.f32.xlu1 %v2104_v50  ;;  %2099 = vadd.xlane.f32.xlu0 %v2098_v51  ;;  %v5339_v6 = vpop.eup %5338  ;;  %v2110_v18 = vsel %vm2079_vm3, %v1961_v5, 0.0  ;;  %v1707_v38 = vadd.f32 %v1579_v31, %v1451_v47  ;;  %v1586_v47 = vld [vmem:[%s8124_s2 + $0xd0] sm:$0xff] }
 0x10f   :  { %v4652_v57 = vpop.f32.mrb[20].mxu0  ;;  %v1964_v19 = vmul.f32 %v5339_v6, %v6217_v8  ;;  %v5341_v20 = vpop.eup %5340  ;;  %v1706_v54 = vadd.f32 %v1578_v42, %v6326_v49 }
 0x110   :  { %v1453_v60 = vadd.f32 %v4652_v57, %v6297_v29  ;;  %v726_v61 = vpop.f32.mrb[21].mxu0  ;;  %4810 = vmatmul.mubr.msk.f32.gmra.mrb[126].mxu0 %vm175_vm1, %v166_v52  ;;  %v1963_v12 = vmul.f32 %v5341_v20, %v6217_v8  ;;  %v1588_v20 = vld [vmem:[%s8124_s2 + $0xe0] sm:$0xff]  ;;  %vm2819_vm1 = vcmask 917312  }
 0x111   :  { %v1452_v1 = vadd.f32 %v6297_v29, %v726_v61  ;;  %v2119_v36 = vsel %vm2079_vm3, %v1964_v19, 0.0 }
 0x112   :  { %v1709_v7 = vadd.f32 %v1581_v58, %v1453_v60  ;;  %2114 = vadd.xlane.f32.xlu1 %v2113_v2  ;;  %v5343_v15 = vpop.eup %5342  ;;  %v2116_v48 = vsel %vm2079_vm3, %v1963_v12, 0.0  ;;  %v1583_v58 = vld [vmem:[%s8124_s2 + $0xb8] sm:$0xff] }
 0x113   :  { %v1708_v9 = vadd.f32 %v1580_v63, %v1452_v1  ;;  %v4655_v10 = vpop.f32.mrb[22].mxu0  ;;  %v5345_v45 = vpop.eup %5344  ;;  %v1966_v50 = vmul.f32 %v5343_v15, %v6217_v8  ;;  %v1589_v1 = vld [vmem:[%s8124_s2 + $0xe8] sm:$0xff] }
 0x114   :  { %5346 = vtanh.f32 %v1709_v7  ;;  %v1455_v14 = vadd.f32 %v4655_v10, %v6297_v29  ;;  %v736_v16 = vpop.f32.mrb[23].mxu0  ;;  %v1965_v0 = vmul.f32 %v5345_v45, %v6217_v8 }
 0x115   :  { %5348 = vtanh.f32 %v1708_v9  ;;  %v6354_v17 = vadd.f32 %v6297_v29, %v736_v16  ;;  %v2125_v2 = vsel %vm2079_vm3, %v1966_v50, 0.0 }
 0x116   :  { %2111 = vadd.xlane.f32.xlu1 %v2110_v18  ;;  %5350 = vtanh.f32 %v1705_v11  ;;  %v1711_v9 = vadd.f32 %v1583_v58, %v1455_v14  ;;  %v1582_v11 = vld [vmem:[%s8124_s2 + $0xb0] sm:$0xff] }
 0x117   :  { %v4658_v25 = vpop.f32.mrb[24].mxu0  ;;  %5352 = vtanh.f32 %v1704_v21 }
 0x118   :  { %v1457_v32 = vadd.f32 %v4658_v25, %v6297_v29  ;;  %v746_v33 = vpop.f32.mrb[25].mxu0  ;;  %v2122_v25 = vsel %vm2079_vm3, %v1965_v0, 0.0  ;;  %v1592_v0 = vld [vmem:[%s8124_s2 + $0x100] sm:$0xff] }
 0x119   :  { %v1456_v35 = vadd.f32 %v6297_v29, %v746_v33  ;;  %v1710_v33 = vadd.f32 %v1582_v11, %v6354_v17 }
 0x11a   :  { %v1713_v37 = vadd.f32 %v1585_v22, %v1457_v32  ;;  %2120 = vadd.xlane.f32.xlu1 %v2119_v36 }
 0x11b   :  { %v1712_v39 = vadd.f32 %v1584_v34, %v1456_v35  ;;  %v4661_v40 = vpop.f32.mrb[26].mxu0 }
 0x11c   :  { %5354 = vtanh.f32 %v1713_v37  ;;  %v1459_v43 = vadd.f32 %v4661_v40, %v6297_v29  ;;  %v756_v44 = vpop.f32.mrb[27].mxu0 }
 0x11d   :  { %5356 = vtanh.f32 %v1712_v39  ;;  %v1458_v46 = vadd.f32 %v6297_v29, %v756_v44  ;;  %v1593_v39 = vld [vmem:[%s8124_s2 + $0x108] sm:$0xff] }
 0x11e   :  { %v5347_v51 = vpop.eup %5346  ;;  %v1715_v52 = vadd.f32 %v1587_v41, %v1459_v43  ;;  %2117 = vadd.xlane.f32.xlu1 %v2116_v48  ;;  %5358 = vtanh.f32 %v1707_v38 }
 0x11f   :  { %v5349_v53 = vpop.eup %5348  ;;  %v4664_v56 = vpop.f32.mrb[28].mxu0  ;;  %v1972_v57 = vmul.f32 %v5347_v51, %v6217_v8  ;;  %v1714_v60 = vadd.f32 %v1586_v47, %v1458_v46  ;;  %v1590_v46 = vld [vmem:[%s8124_s2 + $0xf0] sm:$0xff] }
 0x120   :  { %5360 = vtanh.f32 %v1715_v52  ;;  %v1461_v61 = vadd.f32 %v4664_v56, %v6297_v29  ;;  %v766_v63 = vpop.f32.mrb[29].mxu0  ;;  %v1971_v6 = vmul.f32 %v5349_v53, %v6217_v8  ;;  %v5351_v7 = vpop.eup %5350  ;;  %v1595_v53 = vld [vmem:[%s8124_s2 + $0x118] sm:$0xff] }
 0x121   :  { %v1460_v49 = vadd.f32 %v6297_v29, %v766_v63  ;;  %v2143_v5 = vsel %vm2079_vm3, %v1972_v57, 0.0  ;;  %5362 = vtanh.f32 %v1706_v54  ;;  %v5353_v19 = vpop.eup %5352  ;;  %v1968_v22 = vmul.f32 %v5351_v7, %v6217_v8 }
 0x122   :  { %2126 = vadd.xlane.f32.xlu1 %v2125_v2  ;;  %2144 = vadd.xlane.f32.xlu0 %v2143_v5  ;;  %5364 = vtanh.f32 %v1714_v60  ;;  %v1717_v13 = vadd.f32 %v1589_v1, %v1461_v61  ;;  %v2140_v14 = vsel %vm2079_vm3, %v1971_v6, 0.0  ;;  %v1967_v37 = vmul.f32 %v5353_v19, %v6217_v8 }
 0x123   :  { %v4667_v10 = vpop.f32.mrb[30].mxu0  ;;  %5366 = vtanh.f32 %v1711_v9  ;;  %v1716_v36 = vadd.f32 %v1588_v20, %v1460_v49  ;;  %v2131_v41 = vsel %vm2079_vm3, %v1968_v22, 0.0  ;;  %v1596_v9 = vld [vmem:[%s8124_s2 + $0x120] sm:$0xff]  ;;  %v1594_v20 = vld [vmem:[%s8124_s2 + $0x110] sm:$0xff] }
 0x124   :  { %v1463_v16 = vadd.f32 %v4667_v10, %v6297_v29  ;;  %v776_v18 = vpop.f32.mrb[31].mxu0  ;;  %5368 = vtanh.f32 %v1717_v13  ;;  %v2128_v51 = vsel %vm2079_vm3, %v1967_v37, 0.0  ;;  %v1597_v37 = vld [vmem:[%s8124_s2 + $0x128] sm:$0xff] }
 0x125   :  { %v1462_v21 = vadd.f32 %v6297_v29, %v776_v18  ;;  %v1591_v29 = vld [vmem:[%s8124_s2 + $0xf8] sm:$0xff]  ;;  %5370 = vtanh.f32 %v1710_v33 }
 0x126   :  { %v5355_v31 = vpop.eup %5354  ;;  %2123 = vadd.xlane.f32.xlu1 %v2122_v25  ;;  %2141 = vadd.xlane.f32.xlu0 %v2140_v14  ;;  %v1719_v44 = vadd.f32 %v1591_v29, %v1463_v16  ;;  %5372 = vtanh.f32 %v1716_v36 }
 0x127   :  { %v5357_v32 = vpop.eup %5356  ;;  %v4670_v34 = vpop.f32.mrb[32].mxu0  ;;  %v1976_v35 = vmul.f32 %v5355_v31, %v6217_v8  ;;  %v1718_v61 = vadd.f32 %v1590_v46, %v1462_v21 }
 0x128   :  { %v1465_v12 = vadd.f32 %v4670_v34, %v6133_v23  ;;  %v786_v15 = vpop.f32.mrb[33].mxu0  ;;  %v5359_v38 = vpop.eup %5358  ;;  %v1975_v42 = vmul.f32 %v5357_v32, %v6217_v8  ;;  %5374 = vtanh.f32 %v1719_v44  ;;  %v1599_v32 = vld [vmem:[%s8124_s2 + $0x138] sm:$0xff] }
 0x129   :  { %v1464_v17 = vadd.f32 %v6133_v23, %v786_v15  ;;  %v2155_v40 = vsel %vm2079_vm3, %v1976_v35, 0.0  ;;  %v1970_v58 = vmul.f32 %v5359_v38, %v6217_v8 }
 0x12a   :  { %v5361_v43 = vpop.eup %5360  ;;  %2156 = vadd.xlane.f32.xlu0 %v2155_v40  ;;  %2132 = vadd.xlane.f32.xlu1 %v2131_v41  ;;  %v1721_v47 = vadd.f32 %v1593_v39, %v1465_v12  ;;  %v2152_v56 = vsel %vm2079_vm3, %v1975_v42, 0.0  ;;  %v1601_v42 = vld [vmem:[%s8124_s2 + $0x148] sm:$0xff] }
 0x12b   :  { %v4673_v45 = vpop.f32.mrb[34].mxu0  ;;  %v5363_v52 = vpop.eup %5362  ;;  %v1978_v57 = vmul.f32 %v5361_v43, %v6217_v8  ;;  %v2137_v11 = vsel %vm2079_vm3, %v1970_v58, 0.0  ;;  %v1720_v18 = vadd.f32 %v1592_v0, %v1464_v17  ;;  %v1600_v58 = vld [vmem:[%s8124_s2 + $0x140] sm:$0xff] }
 0x12c   :  { %v1467_v48 = vadd.f32 %v4673_v45, %v6133_v23  ;;  %v796_v50 = vpop.f32.mrb[35].mxu0  ;;  %v5365_v60 = vpop.eup %5364  ;;  %5376 = vtanh.f32 %v1721_v47  ;;  %v1969_v5 = vmul.f32 %v5363_v52, %v6217_v8 }
 0x12d   :  { %v1466_v54 = vadd.f32 %v6133_v23, %v796_v50  ;;  %v5367_v6 = vpop.eup %5366  ;;  %v2161_v10 = vsel %vm2079_vm3, %v1978_v57, 0.0  ;;  %v1977_v13 = vmul.f32 %v5365_v60, %v6217_v8  ;;  %5378 = vtanh.f32 %v1718_v61 }
 0x12e   :  { %2153 = vadd.xlane.f32.xlu0 %v2152_v56  ;;  %2129 = vadd.xlane.f32.xlu1 %v2128_v51  ;;  %v1723_v1 = vadd.f32 %v1595_v53, %v1467_v48  ;;  %v5369_v16 = vpop.eup %5368  ;;  %v2134_v22 = vsel %vm2079_vm3, %v1969_v5, 0.0  ;;  %v1974_v36 = vmul.f32 %v5367_v6, %v6217_v8  ;;  %v1598_v51 = vld [vmem:[%s8124_s2 + $0x130] sm:$0xff] }
 0x12f   :  { %v4676_v63 = vpop.f32.mrb[36].mxu0  ;;  %v5371_v31 = vpop.eup %5370  ;;  %v2158_v34 = vsel %vm2079_vm3, %v1977_v13, 0.0  ;;  %v1980_v35 = vmul.f32 %v5369_v16, %v6217_v8  ;;  %v1722_v12 = vadd.f32 %v1594_v20, %v1466_v54 }
 0x130   :  { %v1469_v49 = vadd.f32 %v4676_v63, %v6133_v23  ;;  %v806_v2 = vpop.f32.mrb[37].mxu0  ;;  %5380 = vtanh.f32 %v1723_v1  ;;  %v5373_v29 = vpop.eup %5372  ;;  %v1973_v40 = vmul.f32 %v5371_v31, %v6217_v8  ;;  %v2149_v45 = vsel %vm2079_vm3, %v1974_v36, 0.0 }
 0x131   :  { %v1468_v7 = vadd.f32 %v6133_v23, %v806_v2  ;;  %5382 = vtanh.f32 %v1720_v18  ;;  %v2167_v44 = vsel %vm2079_vm3, %v1980_v35, 0.0  ;;  %v1979_v46 = vmul.f32 %v5373_v29, %v6217_v8 }
 0x132   :  { %2162 = vadd.xlane.f32.xlu0 %v2161_v10  ;;  %2138 = vadd.xlane.f32.xlu1 %v2137_v11  ;;  %v5375_v41 = vpop.eup %5374  ;;  %v1725_v48 = vadd.f32 %v1597_v37, %v1469_v49  ;;  %v2146_v56 = vsel %vm2079_vm3, %v1973_v40, 0.0  ;;  %v1603_v11 = vld [vmem:[%s8124_s2 + $0x158] sm:$0xff] }
 0x133   :  { %v4679_v19 = vpop.f32.mrb[38].mxu0  ;;  %v1724_v21 = vadd.f32 %v1596_v9, %v1468_v7  ;;  %v2164_v61 = vsel %vm2079_vm3, %v1979_v46, 0.0  ;;  %v1982_v63 = vmul.f32 %v5375_v41, %v6217_v8 }
 0x134   :  { %v1471_v25 = vadd.f32 %v4679_v19, %v6133_v23  ;;  %v816_v14 = vpop.f32.mrb[39].mxu0 }
 0x135   :  { %v1470_v33 = vadd.f32 %v6133_v23, %v816_v14  ;;  %5384 = vtanh.f32 %v1724_v21  ;;  %v2173_v16 = vsel %vm2079_vm3, %v1982_v63, 0.0  ;;  %v1602_v14 = vld [vmem:[%s8124_s2 + $0x150] sm:$0xff] }
 0x136   :  { %2159 = vadd.xlane.f32.xlu0 %v2158_v34  ;;  %2135 = vadd.xlane.f32.xlu1 %v2134_v22  ;;  %v1727_v38 = vadd.f32 %v1599_v32, %v1471_v25  ;;  %v5377_v47 = vpop.eup %5376  ;;  %5386 = vtanh.f32 %v1722_v12 }
 0x137   :  { %v4682_v15 = vpop.f32.mrb[40].mxu0  ;;  %v5379_v57 = vpop.eup %5378  ;;  %v1984_v0 = vmul.f32 %v5377_v47, %v6217_v8  ;;  %v1726_v49 = vadd.f32 %v1598_v51, %v1470_v33  ;;  %v1611_v51 = vld [vmem:[%s8124_s2 + $0x198] sm:$0xff] }
 0x138   :  { %v1473_v39 = vadd.f32 %v4682_v15, %v6133_v23  ;;  %v826_v17 = vpop.f32.mrb[41].mxu0  ;;  %5388 = vtanh.f32 %v1727_v38  ;;  %v1981_v9 = vmul.f32 %v5379_v57, %v6217_v8  ;;  %v1609_v38 = vld [vmem:[%s8124_s2 + $0x188] sm:$0xff] }
 0x139   :  { %v1472_v43 = vadd.f32 %v6133_v23, %v826_v17  ;;  %5390 = vtanh.f32 %v1725_v48  ;;  %v2179_v18 = vsel %vm2079_vm3, %v1984_v0, 0.0 }
 0x13a   :  { %2168 = vadd.xlane.f32.xlu0 %v2167_v44  ;;  %2150 = vadd.xlane.f32.xlu1 %v2149_v45  ;;  %v1729_v52 = vadd.f32 %v1601_v42, %v1473_v39  ;;  %v5381_v1 = vpop.eup %5380  ;;  %v2170_v35 = vsel %vm2079_vm3, %v1981_v9, 0.0 }
 0x13b   :  { %v4685_v50 = vpop.f32.mrb[42].mxu0  ;;  %v1728_v5 = vadd.f32 %v1600_v58, %v1472_v43  ;;  %v5383_v10 = vpop.eup %5382  ;;  %v1986_v19 = vmul.f32 %v5381_v1, %v6217_v8 }
 0x13c   :  { %v1475_v53 = vadd.f32 %v4685_v50, %v6133_v23  ;;  %v836_v54 = vpop.f32.mrb[43].mxu0  ;;  %5392 = vtanh.f32 %v1729_v52  ;;  %v1983_v32 = vmul.f32 %v5383_v10, %v6217_v8  ;;  %v1604_v52 = vld [vmem:[%s8124_s2 + $0x160] sm:$0xff] }
 0x13d   :  { %v1474_v60 = vadd.f32 %v6133_v23, %v836_v54  ;;  %5394 = vtanh.f32 %v1726_v49  ;;  %v2185_v36 = vsel %vm2079_vm3, %v1986_v19, 0.0 }
 0x13e   :  { %2165 = vadd.xlane.f32.xlu0 %v2164_v61  ;;  %2147 = vadd.xlane.f32.xlu1 %v2146_v56  ;;  %5396 = vtanh.f32 %v1728_v5  ;;  %v1731_v25 = vadd.f32 %v1603_v11, %v1475_v53  ;;  %v2176_v40 = vsel %vm2079_vm3, %v1983_v32, 0.0  ;;  %v1610_v56 = vld [vmem:[%s8124_s2 + $0x190] sm:$0xff] }
 0x13f   :  { %v4688_v2 = vpop.f32.mrb[44].mxu0  ;;  %v5385_v20 = vpop.eup %5384  ;;  %v1730_v15 = vadd.f32 %v1602_v14, %v1474_v60  ;;  %v1615_v14 = vld [vmem:[%s8124_s2 + $0x1b8] sm:$0xff] }
 0x140   :  { %v1477_v6 = vadd.f32 %v4688_v2, %v6133_v23  ;;  %v846_v7 = vpop.f32.mrb[45].mxu0  ;;  %v5387_v33 = vpop.eup %5386  ;;  %v1987_v29 = vmul.f32 %v5385_v20, %v6217_v8  ;;  %5398 = vtanh.f32 %v1731_v25 }
 0x141   :  { %v1476_v13 = vadd.f32 %v6133_v23, %v846_v7  ;;  %v1985_v44 = vmul.f32 %v5387_v33, %v6217_v8  ;;  %5400 = vtanh.f32 %v1730_v15  ;;  %v1607_v7 = vld [vmem:[%s8124_s2 + $0x178] sm:$0xff] }
 0x142   :  { %2174 = vadd.xlane.f32.xlu0 %v2173_v16  ;;  %2180 = vadd.xlane.f32.xlu1 %v2179_v18  ;;  %v5389_v12 = vpop.eup %5388  ;;  %v2188_v43 = vsel %vm2079_vm3, %v1987_v29, 0.0 }
 0x143   :  { %v4691_v21 = vpop.f32.mrb[46].mxu0  ;;  %v5391_v41 = vpop.eup %5390  ;;  %v1990_v45 = vmul.f32 %v5389_v12, %v6217_v8  ;;  %v2182_v61 = vsel %vm2079_vm3, %v1985_v44, 0.0  ;;  %v1732_v2 = vadd.f32 %v1604_v52, %v1476_v13 }
 0x144   :  { %v6496_v22 = vadd.f32 %v4691_v21, %v6133_v23  ;;  %v856_v31 = vpop.f32.mrb[47].mxu0  ;;  %v1988_v57 = vmul.f32 %v5391_v41, %v6217_v8 }
 0x145   :  { %v6500_v34 = vadd.f32 %v6133_v23, %v856_v31  ;;  %v1605_v23 = vld [vmem:[%s8124_s2 + $0x168] sm:$0xff]  ;;  %v2197_v63 = vsel %vm2079_vm3, %v1990_v45, 0.0  ;;  %v1606_v31 = vld [vmem:[%s8124_s2 + $0x170] sm:$0xff] }
 0x146   :  { %2171 = vadd.xlane.f32.xlu0 %v2170_v35  ;;  %2186 = vadd.xlane.f32.xlu1 %v2185_v36  ;;  %v5393_v46 = vpop.eup %5392  ;;  %v1733_v48 = vadd.f32 %v1605_v23, %v1477_v6  ;;  %v2191_v11 = vsel %vm2079_vm3, %v1988_v57, 0.0  ;;  %v1735_v21 = vadd.f32 %v1607_v7, %v6496_v22  ;;  %v1614_v35 = vld [vmem:[%s8124_s2 + $0x1b0] sm:$0xff] }
 0x147   :  { %v4694_v37 = vpop.f32.mrb[48].mxu0  ;;  %v5395_v58 = vpop.eup %5394  ;;  %v1992_v0 = vmul.f32 %v5393_v46, %v6217_v8  ;;  %v1734_v23 = vadd.f32 %v1606_v31, %v6500_v34 }
 0x148   :  { %v1481_v39 = vadd.f32 %v4694_v37, %v6139_v26  ;;  %v866_v17 = vpop.f32.mrb[49].mxu0  ;;  %v5397_v1 = vpop.eup %5396  ;;  %v1989_v16 = vmul.f32 %v5395_v58, %v6217_v8 }
 0x149   :  { %v6514_v42 = vadd.f32 %v6139_v26, %v866_v17  ;;  %v2203_v13 = vsel %vm2079_vm3, %v1992_v0, 0.0  ;;  %v1991_v19 = vmul.f32 %v5397_v1, %v6217_v8 }
 0x14a   :  { %v1737_v47 = vadd.f32 %v1609_v38, %v1481_v39  ;;  %2177 = vadd.xlane.f32.xlu0 %v2176_v40  ;;  %2189 = vadd.xlane.f32.xlu1 %v2188_v43  ;;  %v5399_v20 = vpop.eup %5398  ;;  %v2194_v22 = vsel %vm2079_vm3, %v1989_v16, 0.0  ;;  %v1617_v40 = vld [vmem:[%s8124_s2 + $0x1c8] sm:$0xff]  ;;  %v1608_v43 = vld [vmem:[%s8124_s2 + $0x180] sm:$0xff] }
 0x14b   :  { %v4697_v50 = vpop.f32.mrb[50].mxu0  ;;  %v5401_v36 = vpop.eup %5400  ;;  %v2200_v12 = vsel %vm2079_vm3, %v1991_v19, 0.0  ;;  %v1994_v15 = vmul.f32 %v5399_v20, %v6217_v8  ;;  %v1612_v16 = vld [vmem:[%s8124_s2 + $0x1a0] sm:$0xff] }
 0x14c   :  { %5402 = vtanh.f32 %v1737_v47  ;;  %v1483_v53 = vadd.f32 %v4697_v50, %v6139_v26  ;;  %v876_v54 = vpop.f32.mrb[51].mxu0  ;;  %v1993_v46 = vmul.f32 %v5401_v36, %v6217_v8 }
 0x14d   :  { %v1482_v60 = vadd.f32 %v6139_v26, %v876_v54  ;;  %5404 = vtanh.f32 %v1733_v48  ;;  %v1616_v48 = vld [vmem:[%s8124_s2 + $0x1c0] sm:$0xff]  ;;  %v2209_v50 = vsel %vm2079_vm3, %v1994_v15, 0.0  ;;  %v1621_v15 = vld [vmem:[%s8124_s2 + $0x1e8] sm:$0xff] }
 0x14e   :  { %v1739_v49 = vadd.f32 %v1611_v51, %v1483_v53  ;;  %2183 = vadd.xlane.f32.xlu0 %v2182_v61  ;;  %2198 = vadd.xlane.f32.xlu1 %v2197_v63  ;;  %v2206_v1 = vsel %vm2079_vm3, %v1993_v46, 0.0  ;;  %v1620_v46 = vld [vmem:[%s8124_s2 + $0x1e0] sm:$0xff] }
 0x14f   :  { %v1738_v5 = vadd.f32 %v1610_v56, %v1482_v60  ;;  %v4700_v6 = vpop.f32.mrb[52].mxu0  ;;  %v1736_v56 = vadd.f32 %v1608_v43, %v6514_v42  ;;  %v1613_v60 = vld [vmem:[%s8124_s2 + $0x1a8] sm:$0xff] }
 0x150   :  { %5406 = vtanh.f32 %v1739_v49  ;;  %v6538_v9 = vadd.f32 %v4700_v6, %v6139_v26  ;;  %v886_v10 = vpop.f32.mrb[53].mxu0 }
 0x151   :  { %5408 = vtanh.f32 %v1738_v5  ;;  %v6543_v18 = vadd.f32 %v6139_v26, %v886_v10 }
 0x152   :  { %2192 = vadd.xlane.f32.xlu0 %v2191_v11  ;;  %2204 = vadd.xlane.f32.xlu1 %v2203_v13  ;;  %5410 = vtanh.f32 %v1732_v2  ;;  %v1619_v2 = vld [vmem:[%s8124_s2 + $0x1d8] sm:$0xff]  ;;  %v1741_v10 = vadd.f32 %v1613_v60, %v6538_v9 }
 0x153   :  { %v4703_v25 = vpop.f32.mrb[54].mxu0  ;;  %5412 = vtanh.f32 %v1735_v21  ;;  %v1740_v36 = vadd.f32 %v1612_v16, %v6543_v18 }
 0x154   :  { %v1487_v32 = vadd.f32 %v4703_v25, %v6139_v26  ;;  %v896_v33 = vpop.f32.mrb[55].mxu0 }
 0x155   :  { %v1486_v29 = vadd.f32 %v6139_v26, %v896_v33 }
 0x156   :  { %v5403_v37 = vpop.eup %5402  ;;  %v1743_v38 = vadd.f32 %v1615_v14, %v1487_v32  ;;  %2195 = vadd.xlane.f32.xlu0 %v2194_v22  ;;  %2201 = vadd.xlane.f32.xlu1 %v2200_v12  ;;  %v1618_v14 = vld [vmem:[%s8124_s2 + $0x1d0] sm:$0xff] }
 0x157   :  { %v1742_v39 = vadd.f32 %v1614_v35, %v1486_v29  ;;  %v4706_v17 = vpop.f32.mrb[56].mxu0  ;;  %v2000_v41 = vmul.f32 %v5403_v37, %v6217_v8  ;;  %v5405_v47 = vpop.eup %5404 }
 0x158   :  { %5414 = vtanh.f32 %v1743_v38  ;;  %v1489_v44 = vadd.f32 %v4706_v17, %v6139_v26  ;;  %v906_v45 = vpop.f32.mrb[57].mxu0  ;;  %v1996_v6 = vmul.f32 %v5405_v47, %v6217_v8  ;;  %v1623_v17 = vld [vmem:[%s8124_s2 + $0x1f8] sm:$0xff] }
 0x159   :  { %5416 = vtanh.f32 %v1742_v39  ;;  %v1488_v34 = vadd.f32 %v6139_v26, %v906_v45  ;;  %v2227_v51 = vsel %vm2079_vm3, %v2000_v41, 0.0 }
 0x15a   :  { %v5407_v52 = vpop.eup %5406  ;;  %v1745_v53 = vadd.f32 %v1617_v40, %v1489_v44  ;;  %2210 = vadd.xlane.f32.xlu1 %v2209_v50  ;;  %2228 = vadd.xlane.f32.xlu0 %v2227_v51  ;;  %5418 = vtanh.f32 %v1734_v23  ;;  %v2215_v9 = vsel %vm2079_vm3, %v1996_v6, 0.0  ;;  %v1624_v50 = vld [vmem:[%s8124_s2 + $0x200] sm:$0xff]  ;;  %v1626_v6 = vld [vmem:[%s8124_s2 + $0x210] sm:$0xff] }
 0x15b   :  { %v5409_v54 = vpop.eup %5408  ;;  %v4709_v57 = vpop.f32.mrb[58].mxu0  ;;  %v2002_v58 = vmul.f32 %v5407_v52, %v6217_v8  ;;  %v1744_v61 = vadd.f32 %v1616_v48, %v1488_v34 }
 0x15c   :  { %5420 = vtanh.f32 %v1745_v53  ;;  %v1491_v63 = vadd.f32 %v4709_v57, %v6139_v26  ;;  %v916_v0 = vpop.f32.mrb[59].mxu0  ;;  %v5411_v49 = vpop.eup %5410  ;;  %v2001_v7 = vmul.f32 %v5409_v54, %v6217_v8 }
 0x15d   :  { %v1490_v42 = vadd.f32 %v6139_v26, %v916_v0  ;;  %v2233_v5 = vsel %vm2079_vm3, %v2002_v58, 0.0  ;;  %5422 = vtanh.f32 %v1736_v56  ;;  %v1995_v21 = vmul.f32 %v5411_v49, %v6217_v8  ;;  %v5413_v25 = vpop.eup %5412 }
 0x15e   :  { %2207 = vadd.xlane.f32.xlu1 %v2206_v1  ;;  %2234 = vadd.xlane.f32.xlu0 %v2233_v5  ;;  %5424 = vtanh.f32 %v1744_v61  ;;  %v1747_v13 = vadd.f32 %v1619_v2, %v1491_v63  ;;  %v2230_v32 = vsel %vm2079_vm3, %v2001_v7, 0.0  ;;  %v1998_v41 = vmul.f32 %v5413_v25, %v6217_v8  ;;  %v1622_v61 = vld [vmem:[%s8124_s2 + $0x1f0] sm:$0xff] }
 0x15f   :  { %v4712_v11 = vpop.f32.mrb[60].mxu0  ;;  %5426 = vtanh.f32 %v1741_v10  ;;  %v1746_v12 = vadd.f32 %v1618_v14, %v1490_v42  ;;  %v2212_v23 = vsel %vm2079_vm3, %v1995_v21, 0.0 }
 0x160   :  { %v1493_v19 = vadd.f32 %v4712_v11, %v6139_v26  ;;  %v926_v20 = vpop.f32.mrb[61].mxu0  ;;  %5428 = vtanh.f32 %v1747_v13  ;;  %v2221_v54 = vsel %vm2079_vm3, %v1998_v41, 0.0 }
 0x161   :  { %v1492_v31 = vadd.f32 %v6139_v26, %v926_v20  ;;  %5430 = vtanh.f32 %v1740_v36  ;;  %v1625_v20 = vld [vmem:[%s8124_s2 + $0x208] sm:$0xff] }
 0x162   :  { %v5415_v33 = vpop.eup %5414  ;;  %2216 = vadd.xlane.f32.xlu1 %v2215_v9  ;;  %2231 = vadd.xlane.f32.xlu0 %v2230_v32  ;;  %v1749_v45 = vadd.f32 %v1621_v15, %v1493_v19  ;;  %5432 = vtanh.f32 %v1746_v12  ;;  %v1629_v32 = vld [vmem:[%s8124_s2 + $0x228] sm:$0xff] }
 0x163   :  { %v5417_v35 = vpop.eup %5416  ;;  %v4715_v29 = vpop.f32.mrb[62].mxu0  ;;  %v2006_v22 = vmul.f32 %v5415_v33, %v6217_v8  ;;  %v1748_v60 = vadd.f32 %v1620_v46, %v1492_v31 }
 0x164   :  { %v1495_v37 = vadd.f32 %v4715_v29, %v6139_v26  ;;  %v936_v38 = vpop.f32.mrb[63].mxu0  ;;  %v5419_v39 = vpop.eup %5418  ;;  %v2005_v43 = vmul.f32 %v5417_v35, %v6217_v8  ;;  %v6628_v8 = vld [vmem:[%s8125_s8] ss:$0 sm:$0xff]  ;;  %5434 = vtanh.f32 %v1749_v45 }
 0x165   :  { %v1494_v18 = vadd.f32 %v6139_v26, %v936_v38  ;;  %v2245_v40 = vsel %vm2079_vm3, %v2006_v22, 0.0  ;;  %v1997_v51 = vmul.f32 %v6628_v8, %v5419_v39 }
 0x166   :  { %v5421_v44 = vpop.eup %5420  ;;  %2213 = vadd.xlane.f32.xlu1 %v2212_v23  ;;  %2246 = vadd.xlane.f32.xlu0 %v2245_v40  ;;  %v1751_v34 = vadd.f32 %v1623_v17, %v1495_v37  ;;  %v2242_v56 = vsel %vm2079_vm3, %v2005_v43, 0.0  ;;  %v1627_v37 = vld [vmem:[%s8124_s2 + $0x218] sm:$0xff] }
 0x167   :  { %v4718_v47 = vpop.f32.mrb[64].mxu0  ;;  %v5423_v52 = vpop.eup %5422  ;;  %v2008_v57 = vmul.f32 %v6628_v8, %v5421_v44  ;;  %v2218_v7 = vsel %vm2079_vm3, %v1997_v51, 0.0  ;;  %v1750_v13 = vadd.f32 %v1622_v61, %v1494_v18  ;;  %v1631_v40 = vld [vmem:[%s8124_s2 + $0x238] sm:$0xff] }
 0x168   :  { %v1497_v26 = vadd.f32 %v4718_v47, %v6136_v24  ;;  %v946_v48 = vpop.f32.mrb[65].mxu0  ;;  %v5425_v58 = vpop.eup %5424  ;;  %5436 = vtanh.f32 %v1751_v34  ;;  %v1999_v2 = vmul.f32 %v6628_v8, %v5423_v52 }
 0x169   :  { %v1496_v53 = vadd.f32 %v6136_v24, %v946_v48  ;;  %v5427_v42 = vpop.eup %5426  ;;  %v2251_v10 = vsel %vm2079_vm3, %v2008_v57, 0.0  ;;  %v2007_v11 = vmul.f32 %v6628_v8, %v5425_v58  ;;  %5438 = vtanh.f32 %v1748_v60  ;;  %v1628_v48 = vld [vmem:[%s8124_s2 + $0x220] sm:$0xff] }
 0x16a   :  { %2222 = vadd.xlane.f32.xlu1 %v2221_v54  ;;  %2243 = vadd.xlane.f32.xlu0 %v2242_v56  ;;  %v5429_v16 = vpop.eup %5428  ;;  %v2224_v31 = vsel %vm2079_vm3, %v1999_v2, 0.0  ;;  %v2004_v29 = vmul.f32 %v6628_v8, %v5427_v42  ;;  %v1753_v12 = vadd.f32 %v1625_v20, %v1497_v26  ;;  %v1630_v56 = vld [vmem:[%s8124_s2 + $0x230] sm:$0xff] }
 0x16b   :  { %v1752_v63 = vadd.f32 %v1624_v50, %v1496_v53  ;;  %v4721_v0 = vpop.f32.mrb[66].mxu0  ;;  %v5431_v9 = vpop.eup %5430  ;;  %v2248_v35 = vsel %vm2079_vm3, %v2007_v11, 0.0  ;;  %v2010_v36 = vmul.f32 %v6628_v8, %v5429_v16  ;;  %v1632_v16 = vld [vmem:[%s8124_s2 + $0x240] sm:$0xff] }
 0x16c   :  { %v1499_v1 = vadd.f32 %v4721_v0, %v6136_v24  ;;  %v956_v49 = vpop.f32.mrb[67].mxu0  ;;  %v5433_v22 = vpop.eup %5432  ;;  %v2003_v17 = vmul.f32 %v6628_v8, %v5431_v9  ;;  %v2239_v44 = vsel %vm2079_vm3, %v2004_v29, 0.0  ;;  %v6687_v0 = vand.u32 127, %v1347_v55  ;;  %v1634_v29 = vld [vmem:[%s8124_s2 + $0x250] sm:$0xff] }
 0x16d   :  { %v1498_v5 = vadd.f32 %v6136_v24, %v956_v49  ;;  %5440 = vtanh.f32 %v1752_v63  ;;  %v2257_v43 = vsel %vm2079_vm3, %v2010_v36, 0.0  ;;  %v2009_v45 = vmul.f32 %v6628_v8, %v5433_v22  ;;  %v1633_v63 = vld [vmem:[%s8124_s2 + $0x248] sm:$0xff] }
 0x16e   :  { %2219 = vadd.xlane.f32.xlu1 %v2218_v7  ;;  %2252 = vadd.xlane.f32.xlu0 %v2251_v10  ;;  %5442 = vtanh.f32 %v1750_v13  ;;  %v5435_v18 = vpop.eup %5434  ;;  %v1755_v47 = vadd.f32 %v1627_v37, %v1499_v1  ;;  %v2236_v53 = vsel %vm2079_vm3, %v2003_v17, 0.0 }
 0x16f   :  { %v4724_v19 = vpop.f32.mrb[68].mxu0  ;;  %v1754_v21 = vadd.f32 %v1626_v6, %v1498_v5  ;;  %v2254_v58 = vsel %vm2079_vm3, %v2009_v45, 0.0  ;;  %v2012_v60 = vmul.f32 %v6628_v8, %v5435_v18 }
 0x170   :  { %v1501_v25 = vadd.f32 %v4724_v19, %v6136_v24  ;;  %v966_v14 = vpop.f32.mrb[69].mxu0 }
 0x171   :  { %v1500_v33 = vadd.f32 %v6136_v24, %v966_v14  ;;  %5444 = vtanh.f32 %v1754_v21  ;;  %v2263_v13 = vsel %vm2079_vm3, %v2012_v60, 0.0  ;;  %v1635_v21 = vld [vmem:[%s8124_s2 + $0x258] sm:$0xff]  ;;  %v2730_v14 = vadd.s32 4294967288, %v6687_v0 }
 0x172   :  { %2249 = vadd.xlane.f32.xlu0 %v2248_v35  ;;  %2225 = vadd.xlane.f32.xlu1 %v2224_v31  ;;  %v1757_v38 = vadd.f32 %v1629_v32, %v1501_v25  ;;  %v5437_v46 = vpop.eup %5436  ;;  %5446 = vtanh.f32 %v1753_v12  ;;  %v6704_v25 = vstv %s8126_s9  ;;  %v2758_v31 = vadd.s32 4294967256, %v6687_v0 }
 0x173   :  { %v4727_v15 = vpop.f32.mrb[70].mxu0  ;;  %v5439_v26 = vpop.eup %5438  ;;  %v2014_v61 = vmul.f32 %v6628_v8, %v5437_v46  ;;  %v1756_v1 = vadd.f32 %v1628_v48, %v1500_v33  ;;  %v2744_v35 = vadd.s32 4294967272, %v6687_v0  ;;  %v6723_v18 = vsub.s32 %v2730_v14, %v6080_v59  ;;  %v1639_v46 = vld [vmem:[%s8124_s2 + $0x278] sm:$0xff] }
 0x174   :  { %v1503_v23 = vadd.f32 %v4727_v15, %v6136_v24  ;;  %v976_v39 = vpop.f32.mrb[71].mxu0  ;;  %5448 = vtanh.f32 %v1757_v38  ;;  %v2011_v2 = vmul.f32 %v6628_v8, %v5439_v26  ;;  %v2786_v26 = vadd.s32 4294967224, %v6687_v0 }
 0x175   :  { %v1502_v41 = vadd.f32 %v6136_v24, %v976_v39  ;;  %5450 = vtanh.f32 %v1755_v47  ;;  %v2269_v19 = vsel %vm2079_vm3, %v2014_v61, 0.0  ;;  %v6737_v47 = vsub.s32 %v2744_v35, %v6080_v59 }
 0x176   :  { %2258 = vadd.xlane.f32.xlu0 %v2257_v43  ;;  %2240 = vadd.xlane.f32.xlu1 %v2239_v44  ;;  %v1759_v50 = vadd.f32 %v1631_v40, %v1503_v23  ;;  %v2260_v32 = vsel %vm2079_vm3, %v2011_v2, 0.0  ;;  %v6727_v40 = vsub.s32 %v6687_v0, %v6080_v59  ;;  %v2751_v43 = vadd.s32 4294967264, %v6687_v0 }
 0x177   :  { %v4730_v34 = vpop.f32.mrb[72].mxu0  ;;  %v5441_v54 = vpop.eup %5440  ;;  %v1758_v5 = vadd.f32 %v1630_v56, %v1502_v41  ;;  %v6730_v41 = vsub.s32 %v2758_v31, %v6080_v59  ;;  %v2765_v35 = vadd.s32 4294967248, %v6687_v0 }
 0x178   :  { %v1505_v51 = vadd.f32 %v4730_v34, %v6136_v24  ;;  %v986_v52 = vpop.f32.mrb[73].mxu0  ;;  %v5443_v42 = vpop.eup %5442  ;;  %5452 = vtanh.f32 %v1759_v50  ;;  %v2015_v10 = vmul.f32 %v6628_v8, %v5441_v54  ;;  %v2737_v34 = vadd.s32 4294967280, %v6687_v0 }
 0x179   :  { %v1504_v57 = vadd.f32 %v6136_v24, %v986_v52  ;;  %5454 = vtanh.f32 %v1756_v1  ;;  %v2013_v33 = vmul.f32 %v6628_v8, %v5443_v42  ;;  %v2772_v1 = vadd.s32 4294967240, %v6687_v0 }
 0x17a   :  { %2255 = vadd.xlane.f32.xlu0 %v2254_v58  ;;  %2237 = vadd.xlane.f32.xlu1 %v2236_v53  ;;  %v1761_v11 = vadd.f32 %v1633_v63, %v1505_v51  ;;  %5456 = vtanh.f32 %v1758_v5  ;;  %v2272_v15 = vsel %vm2079_vm3, %v2015_v10, 0.0  ;;  %v1638_v51 = vld [vmem:[%s8124_s2 + $0x270] sm:$0xff]  ;;  %v6751_v63 = vsub.s32 %v2751_v43, %v6080_v59 }
 0x17b   :  { %v4733_v49 = vpop.f32.mrb[74].mxu0  ;;  %v5445_v20 = vpop.eup %5444  ;;  %v1760_v36 = vadd.f32 %v1632_v16, %v1504_v57  ;;  %v2266_v52 = vsel %vm2079_vm3, %v2013_v33, 0.0  ;;  %v1640_v16 = vld [vmem:[%s8124_s2 + $0x280] sm:$0xff] }
 0x17c   :  { %v1507_v6 = vadd.f32 %v4733_v49, %v6136_v24  ;;  %v996_v7 = vpop.f32.mrb[75].mxu0  ;;  %v5447_v37 = vpop.eup %5446  ;;  %5458 = vtanh.f32 %v1761_v11  ;;  %v2017_v39 = vmul.f32 %v6628_v8, %v5445_v20  ;;  %v2779_v49 = vadd.s32 4294967232, %v6687_v0  ;;  %v1636_v20 = vld [vmem:[%s8124_s2 + $0x260] sm:$0xff] }
 0x17d   :  { %v1506_v55 = vadd.f32 %v6136_v24, %v996_v7  ;;  %5460 = vtanh.f32 %v1760_v36  ;;  %v2016_v53 = vmul.f32 %v6628_v8, %v5447_v37  ;;  %v1637_v7 = vld [vmem:[%s8124_s2 + $0x268] sm:$0xff]  ;;  %v2800_v36 = vadd.s32 4294967208, %v6687_v0 }
 0x17e   :  { %2264 = vadd.xlane.f32.xlu0 %v2263_v13  ;;  %2270 = vadd.xlane.f32.xlu1 %v2269_v19  ;;  %v1763_v38 = vadd.f32 %v1635_v21, %v1507_v6  ;;  %v5449_v17 = vpop.eup %5448  ;;  %v2278_v57 = vsel %vm2079_vm3, %v2017_v39, 0.0  ;;  %v6759_v6 = vsub.s32 %v2786_v26, %v6080_v59  ;;  %v6780_v33 = vsub.s32 %v2779_v49, %v6080_v59 }
 0x17f   :  { %v4736_v9 = vpop.f32.mrb[76].mxu0  ;;  %v1762_v44 = vadd.f32 %v1634_v29, %v1506_v55  ;;  %v5451_v54 = vpop.eup %5450  ;;  %v2020_v58 = vmul.f32 %v6628_v8, %v5449_v17  ;;  %v2275_v55 = vsel %vm2079_vm3, %v2016_v53, 0.0  ;;  %v2793_v39 = vadd.s32 4294967216, %v6687_v0 }
 0x180   :  { %v6715_v22 = vadd.f32 %v4736_v9, %v6136_v24  ;;  %v1006_v12 = vpop.f32.mrb[77].mxu0  ;;  %5462 = vtanh.f32 %v1763_v38  ;;  %v2018_v13 = vmul.f32 %v6628_v8, %v5451_v54  ;;  %v2814_v17 = vadd.s32 4294967192, %v6687_v0 }
 0x181   :  { %v6719_v23 = vadd.f32 %v6136_v24, %v1006_v12  ;;  %5464 = vtanh.f32 %v1762_v44  ;;  %v2287_v14 = vsel %vm2079_vm3, %v2020_v58, 0.0  ;;  %v6806_v53 = vsub.s32 %v2765_v35, %v6080_v59  ;;  %v1645_v58 = vld [vmem:[%s8124_s2 + $0x2a8] sm:$0xff] }
 0x182   :  { %2261 = vadd.xlane.f32.xlu0 %v2260_v32  ;;  %2273 = vadd.xlane.f32.xlu1 %v2272_v15  ;;  %v5453_v60 = vpop.eup %5452  ;;  %v6777_v32 = vsub.s32 %v2772_v1, %v6080_v59  ;;  %v1765_v12 = vadd.f32 %v1637_v7, %v6715_v22  ;;  %v6816_v1 = vsub.s32 %v2793_v39, %v6080_v59 }
 0x183   :  { %v4739_v45 = vpop.f32.mrb[78].mxu0  ;;  %v5455_v19 = vpop.eup %5454  ;;  %v2022_v31 = vmul.f32 %v6628_v8, %v5453_v60  ;;  %v1764_v43 = vadd.f32 %v1636_v20, %v6719_v23  ;;  %v1641_v23 = vld [vmem:[%s8124_s2 + $0x288] sm:$0xff] }
 0x184   :  { %v1511_v48 = vadd.f32 %v4739_v45, %v6136_v24  ;;  %v1016_v50 = vpop.f32.mrb[79].mxu0  ;;  %v5457_v9 = vpop.eup %5456 }
 0x185   :  { %v1510_v56 = vadd.f32 %v6136_v24, %v1016_v50  ;;  %v6756_v24 = vsub.s32 %v2737_v34, %v6080_v59  ;;  %v2019_v34 = vmul.f32 %v6628_v8, %v5455_v19  ;;  %v2293_v26 = vsel %vm2079_vm3, %v2022_v31, 0.0 }
 0x186   :  { %v1767_v61 = vadd.f32 %v1639_v46, %v1511_v48  ;;  %2267 = vadd.xlane.f32.xlu0 %v2266_v52  ;;  %2279 = vadd.xlane.f32.xlu1 %v2278_v57  ;;  %v5459_v29 = vpop.eup %5458  ;;  %v2281_v46 = vsel %vm2079_vm3, %v2018_v13, 0.0  ;;  %v2021_v48 = vmul.f32 %v6628_v8, %v5457_v9 }
 0x187   :  { %v1766_v2 = vadd.f32 %v1638_v51, %v1510_v56  ;;  %v4742_v42 = vpop.f32.mrb[80].mxu0  ;;  %v2085_v5 = vpop.xlane.xlu0 %2084  ;;  %v2024_v52 = vmul.f32 %v6628_v8, %v5459_v29  ;;  %v2284_v7 = vsel %vm2079_vm3, %v2019_v34, 0.0 }
 0x188   :  { %5466 = vtanh.f32 %v1767_v61  ;;  %v1513_v10 = vadd.f32 %v4742_v42, %v6142_v27  ;;  %v1026_v11 = vpop.f32.mrb[81].mxu0  ;;  %v5461_v50 = vpop.eup %5460  ;;  %v6802_v51 = vadd.f32 %v6704_v25, %v2085_v5  ;;  %v6813_v61 = vsub.s32 %v2800_v36, %v6080_v59  ;;  %v1644_v5 = vld [vmem:[%s8124_s2 + $0x2a0] sm:$0xff] }
 0x189   :  { %5468 = vtanh.f32 %v1766_v2  ;;  %v1512_v21 = vadd.f32 %v6142_v27, %v1026_v11  ;;  %v6824_v11 = vsub.s32 %v2814_v17, %v6080_v59  ;;  %v2290_v19 = vsel %vm2079_vm3, %v2021_v48, 0.0  ;;  %v1643_v17 = vld [vmem:[%s8124_s2 + $0x298] sm:$0xff] }
 0x18a   :  { %2276 = vadd.xlane.f32.xlu0 %v2275_v55  ;;  %2288 = vadd.xlane.f32.xlu1 %v2287_v14  ;;  %v5463_v54 = vpop.eup %5462  ;;  %v1769_v55 = vadd.f32 %v1641_v23, %v1513_v10  ;;  %v2023_v20 = vmul.f32 %v6628_v8, %v5461_v50  ;;  %v2734_v14 = vrot.slane %v6802_v51, %v6723_v18  ;;  %v2299_v9 = vsel %vm2079_vm3, %v2024_v52, 0.0  ;;  %v1646_v23 = vld [vmem:[%s8124_s2 + $0x2b0] sm:$0xff] }
 0x18b   :  { %v1768_v15 = vadd.f32 %v1640_v16, %v1512_v21  ;;  %v4745_v37 = vpop.f32.mrb[82].mxu0  ;;  %v2082_v38 = vpop.xlane.xlu0 %2081  ;;  %v6833_v35 = vmul.f32 %v6628_v8, %v5463_v54 }
 0x18c   :  { %v6789_v44 = vadd.f32 %v4745_v37, %v6142_v27  ;;  %v1036_v45 = vpop.f32.mrb[83].mxu0  ;;  %v2466_v56 = vadd.f32 %v6704_v25, %v2082_v38  ;;  %v5465_v16 = vpop.eup %5464  ;;  %v1647_v37 = vld [vmem:[%s8124_s2 + $0x2b8] sm:$0xff] }
 0x18d   :  { %5470 = vtanh.f32 %v1768_v15  ;;  %v6794_v22 = vadd.f32 %v6142_v27, %v1036_v45 }
 0x18e   :  { %2282 = vadd.xlane.f32.xlu0 %v2281_v46  ;;  %2294 = vadd.xlane.f32.xlu1 %v2293_v26  ;;  %5472 = vtanh.f32 %v1765_v12  ;;  %v2729_v36 = vrot.slane %v2466_v56, %v6727_v40  ;;  %v2296_v56 = vsel %vm2079_vm3, %v2023_v20, 0.0 }
 0x18f   :  { %v4748_v57 = vpop.f32.mrb[84].mxu0  ;;  %v2097_v60 = vpop.xlane.xlu1 %2096  ;;  %5474 = vtanh.f32 %v1764_v43 }
 0x190   :  { %v1517_v49 = vadd.f32 %v4748_v57, %v6142_v27  ;;  %v2091_v2 = vpop.xlane.xlu0 %2090  ;;  %v1046_v42 = vpop.f32.mrb[85].mxu0  ;;  %v2471_v52 = vadd.f32 %v6704_v25, %v2097_v60  ;;  %v2025_v57 = vmul.f32 %v6628_v8, %v5465_v16 }
 0x191   :  { %v1516_v13 = vadd.f32 %v6142_v27, %v1046_v42  ;;  %v2469_v29 = vadd.f32 %v6704_v25, %v2091_v2  ;;  %v2736_v2 = vsel %vm2735_vm4, %v2734_v14, %v2729_v36  ;;  %v1642_v42 = vld [vmem:[%s8124_s2 + $0x290] sm:$0xff] }
 0x192   :  { %v5467_v21 = vpop.eup %5466  ;;  %v1773_v31 = vadd.f32 %v1645_v58, %v1517_v49  ;;  %2285 = vadd.xlane.f32.xlu0 %v2284_v7  ;;  %2291 = vadd.xlane.f32.xlu1 %v2290_v19  ;;  %v1771_v49 = vadd.f32 %v1643_v17, %v6789_v44  ;;  %v1649_v44 = vld [vmem:[%s8124_s2 + $0x2c8] sm:$0xff] }
 0x193   :  { %v5469_v10 = vpop.eup %5468  ;;  %v1772_v12 = vadd.f32 %v1644_v5, %v1516_v13  ;;  %v4751_v15 = vpop.f32.mrb[86].mxu0  ;;  %v2030_v39 = vmul.f32 %v6628_v8, %v5467_v21  ;;  %v2748_v5 = vrot.slane %v2469_v29, %v6737_v47 }
 0x194   :  { %v2094_v38 = vpop.xlane.xlu1 %2093  ;;  %5476 = vtanh.f32 %v1773_v31  ;;  %v1519_v43 = vadd.f32 %v4751_v15, %v6142_v27  ;;  %v2088_v46 = vpop.xlane.xlu0 %2087  ;;  %v2029_v26 = vmul.f32 %v6628_v8, %v5469_v10  ;;  %v1770_v15 = vadd.f32 %v1642_v42, %v6794_v22 }
 0x195   :  { %v2470_v45 = vadd.f32 %v6704_v25, %v2094_v38  ;;  %v1056_v34 = vpop.f32.mrb[87].mxu0  ;;  %5478 = vtanh.f32 %v1772_v12  ;;  %v2468_v48 = vadd.f32 %v6704_v25, %v2088_v46  ;;  %v2317_v51 = vsel %vm2079_vm3, %v2030_v39, 0.0 }
 0x196   :  { %v1518_v50 = vadd.f32 %v6142_v27, %v1056_v34  ;;  %v1775_v54 = vadd.f32 %v1647_v37, %v1519_v43  ;;  %2318 = vadd.xlane.f32.xlu0 %v2317_v51  ;;  %2300 = vadd.xlane.f32.xlu1 %v2299_v9  ;;  %v2314_v36 = vsel %vm2079_vm3, %v2029_v26, 0.0  ;;  %v2762_v37 = vrot.slane %v2471_v52, %v6730_v41  ;;  %v1651_v51 = vld [vmem:[%s8124_s2 + $0x2d8] sm:$0xff] }
 0x197   :  { %v5471_v58 = vpop.eup %5470  ;;  %v2741_v60 = vrot.slane %v2468_v48, %v6756_v24  ;;  %v4754_v7 = vpop.f32.mrb[88].mxu0  ;;  %v2755_v19 = vrot.slane %v2470_v45, %v6751_v63  ;;  %v2305_v34 = vsel %vm2079_vm3, %v6833_v35, 0.0 }
 0x198   :  { %v2109_v13 = vpop.xlane.xlu1 %2108  ;;  %5480 = vtanh.f32 %v1775_v54  ;;  %v1774_v16 = vadd.f32 %v1646_v23, %v1518_v50  ;;  %v1521_v20 = vadd.f32 %v4754_v7, %v6142_v27  ;;  %v2103_v21 = vpop.xlane.xlu0 %2102  ;;  %v2031_v29 = vmul.f32 %v6628_v8, %v5471_v58  ;;  %v1648_v23 = vld [vmem:[%s8124_s2 + $0x2c0] sm:$0xff]  ;;  %v1650_v7 = vld [vmem:[%s8124_s2 + $0x2d0] sm:$0xff] }
 0x199   :  { %v1066_v14 = vpop.f32.mrb[89].mxu0  ;;  %v5473_v31 = vpop.eup %5472  ;;  %v2743_v9 = vsel %vm2742_vm5, %v2741_v60, %v2736_v2  ;;  %5482 = vtanh.f32 %v1769_v55  ;;  %v2473_v17 = vadd.f32 %v6704_v25, %v2103_v21  ;;  %v2475_v58 = vadd.f32 %v6704_v25, %v2109_v13 }
 0x19a   :  { %v1520_v10 = vadd.f32 %v6142_v27, %v1066_v14  ;;  %v6872_v12 = vpop.eup %5474  ;;  %v2750_v38 = vsel %vm2749_vm6, %v2748_v5, %v2743_v9  ;;  %2315 = vadd.xlane.f32.xlu0 %v2314_v36  ;;  %2297 = vadd.xlane.f32.xlu1 %v2296_v56  ;;  %v1777_v39 = vadd.f32 %v1649_v44, %v1521_v20  ;;  %5484 = vtanh.f32 %v1774_v16  ;;  %v1653_v14 = vld [vmem:[%s8124_s2 + $0x2e8] sm:$0xff] }
 0x19b   :  { %v4757_v43 = vpop.f32.mrb[90].mxu0  ;;  %v2757_v46 = vsel %vm2756_vm7, %v2755_v19, %v2750_v38  ;;  %5486 = vtanh.f32 %v1771_v49  ;;  %v2320_v54 = vsel %vm2079_vm3, %v2031_v29, 0.0  ;;  %v2302_v49 = vsel %vm2079_vm3, %v2025_v57, 0.0 }
 0x19c   :  { %v2106_v45 = vpop.xlane.xlu1 %2105  ;;  %v1523_v55 = vadd.f32 %v4757_v43, %v6142_v27  ;;  %v2764_v26 = vsel %vm8135_vm8, %v2762_v37, %v2757_v46  ;;  %v2100_v48 = vpop.xlane.xlu0 %2099  ;;  %5488 = vtanh.f32 %v1770_v15  ;;  %v2028_v2 = vmul.f32 %v6628_v8, %v5473_v31 }
 0x19d   :  { %v2474_v22 = vadd.f32 %v6704_v25, %v2106_v45  ;;  %v1076_v50 = vpop.f32.mrb[91].mxu0  ;;  %v2472_v35 = vadd.f32 %v6704_v25, %v2100_v48  ;;  %5490 = vtanh.f32 %v1777_v39  ;;  %v2776_v5 = vrot.slane %v2473_v17, %v6777_v32 }
 0x19e   :  { %v1522_v52 = vadd.f32 %v6142_v27, %v1076_v50  ;;  %v5477_v56 = vpop.eup %5476  ;;  %2306 = vadd.xlane.f32.xlu1 %v2305_v34  ;;  %2321 = vadd.xlane.f32.xlu0 %v2320_v54  ;;  %v1776_v20 = vadd.f32 %v1648_v23, %v1520_v10  ;;  %v1779_v44 = vadd.f32 %v1651_v51, %v1523_v55  ;;  %v2311_v17 = vsel %vm2079_vm3, %v2028_v2, 0.0 }
 0x19f   :  { %v5479_v42 = vpop.eup %5478  ;;  %v2769_v60 = vrot.slane %v2472_v35, %v6806_v53  ;;  %v4760_v19 = vpop.f32.mrb[92].mxu0  ;;  %v2036_v13 = vmul.f32 %v6628_v8, %v5477_v56  ;;  %v2783_v57 = vrot.slane %v2474_v22, %v6780_v33  ;;  %v2790_v10 = vrot.slane %v2475_v58, %v6759_v6  ;;  %v1652_v35 = vld [vmem:[%s8124_s2 + $0x2e0] sm:$0xff] }
 0x1a0   :  { %v2115_v16 = vpop.xlane.xlu1 %2114  ;;  %v1525_v21 = vadd.f32 %v4760_v19, %v6142_v27  ;;  %v1086_v31 = vpop.f32.mrb[93].mxu0  ;;  %v2035_v15 = vmul.f32 %v6628_v8, %v5479_v42  ;;  %v1778_v39 = vadd.f32 %v1650_v7, %v1522_v52  ;;  %v2027_v22 = vmul.f32 %v6628_v8, %v6872_v12  ;;  %v1654_v12 = vld [vmem:[%s8124_s2 + $0x2f0] sm:$0xff] }
 0x1a1   :  { %v2771_v9 = vsel %vm2770_vm9, %v2769_v60, %v2764_v26  ;;  %v1524_v36 = vadd.f32 %v6142_v27, %v1086_v31  ;;  %v2335_v29 = vsel %vm2079_vm3, %v2036_v13, 0.0  ;;  %v2477_v45 = vadd.f32 %v6704_v25, %v2115_v16 }
 0x1a2   :  { %v5481_v37 = vpop.eup %5480  ;;  %v2778_v38 = vsel %vm2777_vm10, %v2776_v5, %v2771_v9  ;;  %2303 = vadd.xlane.f32.xlu1 %v2302_v49  ;;  %2336 = vadd.xlane.f32.xlu0 %v2335_v29  ;;  %v1781_v43 = vadd.f32 %v1653_v14, %v1525_v21  ;;  %5492 = vtanh.f32 %v1776_v20  ;;  %v2332_v54 = vsel %vm2079_vm3, %v2035_v15, 0.0  ;;  %v1655_v5 = vld [vmem:[%s8124_s2 + $0x2f8] sm:$0xff]  ;;  %v1657_v14 = vld [vmem:[%s8124_s2 + $0x308] sm:$0xff] }
 0x1a3   :  { %v4763_v46 = vpop.f32.mrb[94].mxu0  ;;  %v2785_v55 = vsel %vm2784_vm11, %v2783_v57, %v2778_v38  ;;  %v5483_v26 = vpop.eup %5482  ;;  %5494 = vtanh.f32 %v1779_v44  ;;  %v2038_v56 = vmul.f32 %v6628_v8, %v5481_v37  ;;  %v2807_v2 = vadd.s32 4294967200, %v6687_v0  ;;  %v1656_v38 = vld [vmem:[%s8124_s2 + $0x300] sm:$0xff] }
 0x1a4   :  { %v2112_v34 = vpop.xlane.xlu1 %2111  ;;  %v1527_v48 = vadd.f32 %v4763_v46, %v6142_v27  ;;  %v2792_v23 = vsel %vm2791_vm12, %v2790_v10, %v2785_v55  ;;  %v1096_v51 = vpop.f32.mrb[95].mxu0  ;;  %5496 = vtanh.f32 %v1778_v39  ;;  %v2308_v19 = vsel %vm2079_vm3, %v2027_v22, 0.0 }
 0x1a5   :  { %v2476_v50 = vadd.f32 %v6704_v25, %v2112_v34  ;;  %v1526_v52 = vadd.f32 %v6142_v27, %v1096_v51  ;;  %v5485_v58 = vpop.eup %5484  ;;  %5498 = vtanh.f32 %v1781_v43  ;;  %v2804_v27 = vrot.slane %v2477_v45, %v6813_v61 }
 0x1a6   :  { %2312 = vadd.xlane.f32.xlu1 %v2311_v17  ;;  %2333 = vadd.xlane.f32.xlu0 %v2332_v54  ;;  %v5487_v42 = vpop.eup %5486  ;;  %v2032_v16 = vmul.f32 %v6628_v8, %v5483_v26  ;;  %v1780_v20 = vadd.f32 %v1652_v35, %v1524_v36  ;;  %v2341_v15 = vsel %vm2079_vm3, %v2038_v56, 0.0  ;;  %v2037_v10 = vmul.f32 %v6628_v8, %v5485_v58  ;;  %v1659_v35 = vld [vmem:[%s8124_s2 + $0x318] sm:$0xff] }
 0x1a7   :  { %v2797_v49 = vrot.slane %v2476_v50, %v6816_v1  ;;  %v4766_v60 = vpop.f32.mrb[96].mxu0  ;;  %v5489_v13 = vpop.eup %5488  ;;  %v1782_v57 = vadd.f32 %v1654_v12, %v1526_v52  ;;  %v1783_v36 = vadd.f32 %v1655_v5, %v1527_v48  ;;  %v6951_v39 = vsub.s32 %v2807_v2, %v6080_v59 }
 0x1a8   :  { %v2121_v7 = vpop.xlane.xlu1 %2120  ;;  %v1529_v21 = vadd.f32 %v4766_v60, %v6145_v28  ;;  %v1106_v31 = vpop.f32.mrb[97].mxu0  ;;  %v2828_v17 = vadd.s32 4294967176, %v6687_v0  ;;  %v2323_v55 = vsel %vm2079_vm3, %v2032_v16, 0.0  ;;  %v2034_v22 = vmul.f32 %v6628_v8, %v5487_v42 }
 0x1a9   :  { %v2799_v44 = vsel %vm2798_vm13, %v2797_v49, %v2792_v23  ;;  %v5491_v9 = vpop.eup %5490  ;;  %v1528_v29 = vadd.f32 %v6145_v28, %v1106_v31  ;;  %v2479_v45 = vadd.f32 %v6704_v25, %v2121_v7  ;;  %5500 = vtanh.f32 %v1782_v57 }
 0x1aa   :  { %v2806_v37 = vsel %vm2805_vm14, %v2804_v27, %v2799_v44  ;;  %2309 = vadd.xlane.f32.xlu1 %v2308_v19  ;;  %2342 = vadd.xlane.f32.xlu0 %v2341_v15  ;;  %v1785_v43 = vadd.f32 %v1657_v14, %v1529_v21  ;;  %v2040_v23 = vmul.f32 %v6628_v8, %v5491_v9  ;;  %5502 = vtanh.f32 %v1780_v20  ;;  %v1658_v20 = vld [vmem:[%s8124_s2 + $0x310] sm:$0xff]  ;;  %v1661_v44 = vld [vmem:[%s8124_s2 + $0x328] sm:$0xff] }
 0x1ab   :  { %v4769_v46 = vpop.f32.mrb[98].mxu0  ;;  %v1784_v51 = vadd.f32 %v1656_v38, %v1528_v29  ;;  %v2338_v12 = vsel %vm2079_vm3, %v2037_v10, 0.0  ;;  %5504 = vtanh.f32 %v1783_v36  ;;  %v2821_v58 = vadd.s32 4294967184, %v6687_v0 }
 0x1ac   :  { %v2118_v34 = vpop.xlane.xlu1 %2117  ;;  %v1531_v26 = vadd.f32 %v4769_v46, %v6145_v28  ;;  %v1116_v50 = vpop.f32.mrb[99].mxu0  ;;  %5506 = vtanh.f32 %v1785_v43  ;;  %v2818_v2 = vrot.slane %v2479_v45, %v6824_v11  ;;  %v2329_v5 = vsel %vm2079_vm3, %v2034_v22, 0.0 }
 0x1ad   :  { %v2478_v48 = vadd.f32 %v6704_v25, %v2118_v34  ;;  %v1530_v52 = vadd.f32 %v6145_v28, %v1116_v50  ;;  %v5493_v54 = vpop.eup %5492  ;;  %v2033_v60 = vmul.f32 %v6628_v8, %v5489_v13  ;;  %v2347_v14 = vsel %vm2079_vm3, %v2040_v23, 0.0 }
 0x1ae   :  { %2324 = vadd.xlane.f32.xlu1 %v2323_v55  ;;  %2339 = vadd.xlane.f32.xlu0 %v2338_v12  ;;  %v5495_v49 = vpop.eup %5494  ;;  %v1787_v19 = vadd.f32 %v1659_v35, %v1531_v26  ;;  %5508 = vtanh.f32 %v1784_v51  ;;  %v2039_v29 = vmul.f32 %v6628_v8, %v5493_v54  ;;  %v6985_v15 = vsub.s32 %v2828_v17, %v6080_v59  ;;  %v1663_v17 = vld [vmem:[%s8124_s2 + $0x338] sm:$0xff] }
 0x1af   :  { %v2811_v56 = vrot.slane %v2478_v48, %v6951_v39  ;;  %v4772_v42 = vpop.f32.mrb[100].mxu0  ;;  %v5497_v7 = vpop.eup %5496  ;;  %v6991_v10 = vsub.s32 %v2821_v58, %v6080_v59  ;;  %v1786_v36 = vadd.f32 %v1658_v20, %v1530_v52  ;;  %v2042_v34 = vmul.f32 %v6628_v8, %v5495_v49 }
 0x1b0   :  { %v2127_v27 = vpop.xlane.xlu1 %2126  ;;  %v1533_v0 = vadd.f32 %v4772_v42, %v6145_v28  ;;  %v6978_v57 = vpop.xlane.xlu0 %2144  ;;  %5510 = vtanh.f32 %v1787_v19  ;;  %v2326_v51 = vsel %vm2079_vm3, %v2033_v60, 0.0  ;;  %v2344_v35 = vsel %vm2079_vm3, %v2039_v29, 0.0  ;;  %v1662_v19 = vld [vmem:[%s8124_s2 + $0x330] sm:$0xff] }
 0x1b1   :  { %v2813_v16 = vsel %vm2812_vm15, %v2811_v56, %v2806_v37  ;;  %v1126_v21 = vpop.f32.mrb[101].mxu0  ;;  %v5499_v13 = vpop.eup %5498  ;;  %v1660_v37 = vld [vmem:[%s8124_s2 + $0x320] sm:$0xff]  ;;  %v2481_v43 = vadd.f32 %v6704_v25, %v2127_v27  ;;  %v2041_v56 = vmul.f32 %v6628_v8, %v5497_v7  ;;  %v2353_v27 = vsel %vm2079_vm3, %v2042_v34, 0.0 }
 0x1b2   :  { %v1532_v31 = vadd.f32 %v6145_v28, %v1126_v21  ;;  %v2820_v9 = vsel %vm2819_vm1, %v2818_v2, %v2813_v16  ;;  %2330 = vadd.xlane.f32.xlu1 %v2329_v5  ;;  %2348 = vadd.xlane.f32.xlu0 %v2347_v14  ;;  %v1789_v38 = vadd.f32 %v1661_v44, %v1533_v0 }
 0x1b3   :  { %v4775_v45 = vpop.f32.mrb[102].mxu0  ;;  %v2044_v48 = vmul.f32 %v6628_v8, %v5499_v13  ;;  %v5501_v52 = vpop.eup %5500  ;;  %v2832_v49 = vrot.slane %v2481_v43, %v6985_v15  ;;  %v2350_v29 = vsel %vm2079_vm3, %v2041_v56, 0.0 }
 0x1b4   :  { %v2124_v46 = vpop.xlane.xlu1 %2123  ;;  %v1535_v55 = vadd.f32 %v4775_v45, %v6145_v28  ;;  %v2142_v59 = vpop.xlane.xlu0 %2141  ;;  %v1788_v50 = vadd.f32 %v1660_v37, %v1532_v31  ;;  %5512 = vtanh.f32 %v1789_v38  ;;  %v2045_v13 = vmul.f32 %v6628_v8, %v5501_v52  ;;  %v1665_v31 = vld [vmem:[%s8124_s2 + $0x348] sm:$0xff] }
 0x1b5   :  { %v2480_v22 = vadd.f32 %v6704_v25, %v2124_v46  ;;  %v1136_v26 = vpop.f32.mrb[103].mxu0  ;;  %v5503_v58 = vpop.eup %5502  ;;  %5514 = vtanh.f32 %v1786_v36  ;;  %v2359_v0 = vsel %vm2079_vm3, %v2044_v48, 0.0  ;;  %v7026_v36 = vadd.f32 %v6704_v25, %v6978_v57 }
 0x1b6   :  { %v1534_v23 = vadd.f32 %v6145_v28, %v1136_v26  ;;  %v1791_v12 = vadd.f32 %v1663_v17, %v1535_v55  ;;  %2327 = vadd.xlane.f32.xlu1 %v2326_v51  ;;  %2345 = vadd.xlane.f32.xlu0 %v2344_v35  ;;  %v5505_v5 = vpop.eup %5504  ;;  %5516 = vtanh.f32 %v1788_v50  ;;  %v2043_v17 = vmul.f32 %v6628_v8, %v5503_v58 }
 0x1b7   :  { %v2825_v54 = vrot.slane %v2480_v22, %v6991_v10  ;;  %v4778_v2 = vpop.f32.mrb[104].mxu0  ;;  %v5507_v44 = vpop.eup %5506  ;;  %v2046_v46 = vmul.f32 %v6628_v8, %v5505_v5  ;;  %v7031_v34 = vadd.f32 %v6704_v25, %v2142_v59  ;;  %v2362_v35 = vsel %vm2079_vm3, %v2045_v13, 0.0  ;;  %v1668_v13 = vld [vmem:[%s8124_s2 + $0x360] sm:$0xff] }
 0x1b8   :  { %v2133_v42 = vpop.xlane.xlu1 %2132  ;;  %v1537_v16 = vadd.f32 %v4778_v2, %v6145_v28  ;;  %v2157_v20 = vpop.xlane.xlu0 %2156  ;;  %5518 = vtanh.f32 %v1791_v12  ;;  %v1790_v38 = vadd.f32 %v1662_v19, %v1534_v23  ;;  %v2048_v50 = vmul.f32 %v6628_v8, %v5507_v44  ;;  %v1664_v12 = vld [vmem:[%s8124_s2 + $0x340] sm:$0xff]  ;;  %v1669_v2 = vld [vmem:[%s8124_s2 + $0x368] sm:$0xff]  ;;  %v1667_v19 = vld [vmem:[%s8124_s2 + $0x358] sm:$0xff] }
 0x1b9   :  { %v2827_v60 = vsel %vm2826_vm2, %v2825_v54, %v2820_v9  ;;  %v1146_v7 = vpop.f32.mrb[105].mxu0  ;;  %v2483_v9 = vadd.f32 %v6704_v25, %v2133_v42  ;;  %v5509_v37 = vpop.eup %5508  ;;  %v7037_v23 = vadd.f32 %v6704_v25, %v2157_v20  ;;  %v7049_v8 = vld [vmem:[%s8125_s8] ss:$0 sm:$0xff]  ;;  %v2862_v58 = vrot.slane %v7026_v36, %v6730_v41  ;;  %v1666_v20 = vld [vmem:[%s8124_s2 + $0x350] sm:$0xff] }
 0x1ba   :  { %v7015_v21 = vsel %vm2833_vm0, %v2832_v49, %v2827_v60  ;;  %v1536_v14 = vadd.f32 %v6145_v28, %v1146_v7  ;;  %2360 = vadd.xlane.f32.xlu1 %v2359_v0  ;;  %2354 = vadd.xlane.f32.xlu0 %v2353_v27  ;;  %v1793_v57 = vadd.f32 %v1665_v31, %v1537_v16  ;;  %v5511_v52 = vpop.eup %5510  ;;  %5520 = vtanh.f32 %v1790_v38 }
 0x1bb   :  { %v4781_v43 = vpop.f32.mrb[106].mxu0  ;;  %v2842_v59 = vrot.slane %v2483_v9, %v6723_v18  ;;  %v2047_v56 = vmul.f32 %v7049_v8, %v5509_v37  ;;  %v2356_v27 = vsel %vm2079_vm3, %v2043_v17, 0.0  ;;  %v2365_v5 = vsel %vm2079_vm3, %v2046_v46, 0.0 }
 0x1bc   :  { %v2130_v45 = vpop.xlane.xlu1 %2129  ;;  %v1539_v55 = vadd.f32 %v4781_v43, %v6145_v28  ;;  %v2154_v22 = vpop.xlane.xlu0 %2153  ;;  %v2857_v60 = vrot.slane %v7031_v34, %v6751_v63  ;;  %v2371_v31 = vsel %vm2079_vm3, %v2048_v50, 0.0  ;;  %5522 = vtanh.f32 %v1793_v57 }
 0x1bd   :  { %v2482_v26 = vadd.f32 %v6704_v25, %v2130_v45  ;;  %v1156_v48 = vpop.f32.mrb[107].mxu0  ;;  %v2050_v38 = vmul.f32 %v7049_v8, %v5511_v52  ;;  %v2882_v45 = vrot.slane %v7037_v23, %v6759_v6  ;;  %v7078_v17 = vadd.f32 %v6704_v25, %v2154_v22  ;;  %v1679_v23 = vld [vmem:[%s8124_s2 + $0x3b8] sm:$0xff] }
 0x1be   :  { %v1538_v51 = vadd.f32 %v6145_v28, %v1156_v48  ;;  %2363 = vadd.xlane.f32.xlu1 %v2362_v35  ;;  %2351 = vadd.xlane.f32.xlu0 %v2350_v29  ;;  %v5513_v9 = vpop.eup %5512  ;;  %v1792_v29 = vadd.f32 %v1664_v12, %v1536_v14  ;;  %v1795_v50 = vadd.f32 %v1667_v19, %v1539_v55 }
 0x1bf   :  { %v2838_v54 = vrot.slane %v2482_v26, %v6727_v40  ;;  %v4784_v49 = vpop.f32.mrb[108].mxu0  ;;  %v5515_v43 = vpop.eup %5514  ;;  %v2368_v26 = vsel %vm2079_vm3, %v2047_v56, 0.0 }
 0x1c0   :  { %v2139_v42 = vpop.xlane.xlu1 %2138  ;;  %v1541_v7 = vadd.f32 %v4784_v49, %v6145_v28  ;;  %v2163_v0 = vpop.xlane.xlu0 %2162  ;;  %v1794_v57 = vadd.f32 %v1666_v20, %v1538_v51  ;;  %v2377_v51 = vsel %vm2079_vm3, %v2050_v38, 0.0  ;;  %v2049_v20 = vmul.f32 %v7049_v8, %v5515_v43 }
 0x1c1   :  { %v2843_v16 = vsel %vm2735_vm4, %v2842_v59, %v2838_v54  ;;  %v1166_v44 = vpop.f32.mrb[109].mxu0  ;;  %v5517_v48 = vpop.eup %5516  ;;  %v2485_v14 = vadd.f32 %v6704_v25, %v2139_v42  ;;  %v7086_v56 = vadd.f32 %v6704_v25, %v2163_v0  ;;  %v2877_v42 = vrot.slane %v7078_v17, %v6780_v33  ;;  %v1670_v0 = vld [vmem:[%s8124_s2 + $0x370] sm:$0xff] }
 0x1c2   :  { %v1540_v37 = vadd.f32 %v6145_v28, %v1166_v44  ;;  %v1797_v46 = vadd.f32 %v1669_v2, %v1541_v7  ;;  %2372 = vadd.xlane.f32.xlu1 %v2371_v31  ;;  %2357 = vadd.xlane.f32.xlu0 %v2356_v27  ;;  %v5519_v12 = vpop.eup %5518  ;;  %v2052_v27 = vmul.f32 %v7049_v8, %v5513_v9  ;;  %v1673_v44 = vld [vmem:[%s8124_s2 + $0x388] sm:$0xff] }
 0x1c3   :  { %v4787_v59 = vpop.f32.mrb[110].mxu0  ;;  %v2852_v7 = vrot.slane %v2485_v14, %v6737_v47  ;;  %v2051_v31 = vmul.f32 %v7049_v8, %v5517_v48  ;;  %v2054_v9 = vmul.f32 %v7049_v8, %v5519_v12  ;;  %v2374_v12 = vsel %vm2079_vm3, %v2049_v20, 0.0 }
 0x1c4   :  { %v1796_v35 = vadd.f32 %v1668_v13, %v1540_v37  ;;  %v2136_v52 = vpop.xlane.xlu1 %2135  ;;  %5524 = vtanh.f32 %v1797_v46  ;;  %v1543_v54 = vadd.f32 %v4787_v59, %v6145_v28  ;;  %v2160_v49 = vpop.xlane.xlu0 %2159  ;;  %v2383_v43 = vsel %vm2079_vm3, %v2052_v27, 0.0  ;;  %v1675_v27 = vld [vmem:[%s8124_s2 + $0x398] sm:$0xff] }
 0x1c5   :  { %v2484_v22 = vadd.f32 %v6704_v25, %v2136_v52  ;;  %v1176_v2 = vpop.f32.mrb[111].mxu0  ;;  %5526 = vtanh.f32 %v1792_v29  ;;  %v5521_v46 = vpop.eup %5520  ;;  %v7109_v14 = vadd.f32 %v6704_v25, %v2160_v49  ;;  %v2380_v34 = vsel %vm2079_vm3, %v2051_v31, 0.0 }
 0x1c6   :  { %v1542_v55 = vadd.f32 %v6145_v28, %v1176_v2  ;;  %5528 = vtanh.f32 %v1796_v35  ;;  %2378 = vadd.xlane.f32.xlu1 %v2377_v51  ;;  %2366 = vadd.xlane.f32.xlu0 %v2365_v5  ;;  %v5523_v49 = vpop.eup %5522  ;;  %v2053_v36 = vmul.f32 %v7049_v8, %v5521_v46 }
 0x1c7   :  { %v2847_v19 = vrot.slane %v2484_v22, %v6756_v24  ;;  %5530 = vtanh.f32 %v1795_v50  ;;  %v4790_v28 = vpop.f32.mrb[112].mxu0  ;;  %v2892_v50 = vrot.slane %v7086_v56, %v6813_v61 }
 0x1c8   :  { %v2151_v13 = vpop.xlane.xlu1 %2150  ;;  %5532 = vtanh.f32 %v1794_v57  ;;  %v1545_v29 = vadd.f32 %v4790_v28, %v6153_v30  ;;  %v2169_v37 = vpop.xlane.xlu0 %2168  ;;  %v1798_v57 = vadd.f32 %v1670_v0, %v1542_v55  ;;  %v1674_v0 = vld [vmem:[%s8124_s2 + $0x390] sm:$0xff] }
 0x1c9   :  { %v2848_v5 = vsel %vm2742_vm5, %v2847_v19, %v2843_v16  ;;  %v1186_v38 = vpop.f32.mrb[113].mxu0  ;;  %v1671_v16 = vld [vmem:[%s8124_s2 + $0x378] sm:$0xff]  ;;  %v2489_v22 = vadd.f32 %v6704_v25, %v2151_v13 }
 0x1ca   :  { %v2853_v48 = vsel %vm2749_vm6, %v2852_v7, %v2848_v5  ;;  %v1544_v35 = vadd.f32 %v6153_v30, %v1186_v38  ;;  %v1801_v59 = vadd.f32 %v1673_v44, %v1545_v29  ;;  %2384 = vadd.xlane.f32.xlu1 %v2383_v43  ;;  %2369 = vadd.xlane.f32.xlu0 %v2368_v26  ;;  %v1672_v43 = vld [vmem:[%s8124_s2 + $0x380] sm:$0xff] }
 0x1cb   :  { %v2858_v52 = vsel %vm2756_vm7, %v2857_v60, %v2853_v48  ;;  %v4793_v2 = vpop.f32.mrb[114].mxu0  ;;  %v2389_v60 = vsel %vm2079_vm3, %v2054_v9, 0.0  ;;  %v7137_v28 = vadd.f32 %v1671_v16, %v1543_v54  ;;  %v7142_v44 = vadd.f32 %v6704_v25, %v2169_v37  ;;  %v1677_v48 = vld [vmem:[%s8124_s2 + $0x3a8] sm:$0xff] }
 0x1cc   :  { %v2863_v26 = vsel %vm8135_vm8, %v2862_v58, %v2858_v52  ;;  %v2148_v55 = vpop.xlane.xlu1 %2147  ;;  %5534 = vtanh.f32 %v1801_v59  ;;  %v1547_v51 = vadd.f32 %v4793_v2, %v6153_v30  ;;  %v2166_v19 = vpop.xlane.xlu0 %2165  ;;  %v2887_v58 = vrot.slane %v7109_v14, %v6816_v1 }
 0x1cd   :  { %v2488_v20 = vadd.f32 %v6704_v25, %v2148_v55  ;;  %v1196_v7 = vpop.f32.mrb[115].mxu0  ;;  %5536 = vtanh.f32 %v1798_v57  ;;  %v2056_v29 = vmul.f32 %v7049_v8, %v5523_v49  ;;  %v2872_v54 = vrot.slane %v2489_v22, %v6777_v32 }
 0x1ce   :  { %v1546_v13 = vadd.f32 %v6153_v30, %v1196_v7  ;;  %v5525_v31 = vpop.eup %5524  ;;  %v1803_v9 = vadd.f32 %v1675_v27, %v1547_v51  ;;  %2381 = vadd.xlane.f32.xlu1 %v2380_v34  ;;  %2375 = vadd.xlane.f32.xlu0 %v2374_v12  ;;  %v2494_v37 = vadd.f32 %v6704_v25, %v2166_v19  ;;  %vm8136_vm8 = vcmask 1041409  }
 0x1cf   :  { %v2867_v5 = vrot.slane %v2488_v20, %v6806_v53  ;;  %v5527_v38 = vpop.eup %5526  ;;  %v4796_v14 = vpop.f32.mrb[116].mxu0  ;;  %v2060_v57 = vmul.f32 %v7049_v8, %v5525_v31  ;;  %v2386_v2 = vsel %vm2079_vm3, %v2053_v36, 0.0  ;;  %v2902_v55 = vrot.slane %v7142_v44, %v6824_v11 }
 0x1d0   :  { %v1802_v46 = vadd.f32 %v1674_v0, %v1546_v13  ;;  %v2181_v16 = vpop.xlane.xlu1 %2180  ;;  %v5529_v59 = vpop.eup %5528  ;;  %5538 = vtanh.f32 %v1803_v9  ;;  %v1549_v12 = vadd.f32 %v4796_v14, %v6153_v30  ;;  %v1800_v20 = vadd.f32 %v1672_v43, %v1544_v35 }
 0x1d1   :  { %v2868_v52 = vsel %vm2770_vm9, %v2867_v5, %v2863_v26  ;;  %v2175_v49 = vpop.xlane.xlu0 %2174  ;;  %v1206_v22 = vpop.f32.mrb[117].mxu0  ;;  %v1676_v26 = vld [vmem:[%s8124_s2 + $0x3a0] sm:$0xff]  ;;  %v2407_v36 = vsel %vm2079_vm3, %v2060_v57, 0.0  ;;  %v2897_v44 = vrot.slane %v2494_v37, %v6951_v39  ;;  %v2059_v35 = vmul.f32 %v7049_v8, %v5529_v59 }
 0x1d2   :  { %v5531_v27 = vpop.eup %5530  ;;  %v2873_v34 = vsel %vm2777_vm10, %v2872_v54, %v2868_v52  ;;  %5540 = vtanh.f32 %v1802_v46  ;;  %v1548_v51 = vadd.f32 %v6153_v30, %v1206_v22  ;;  %v1805_v0 = vadd.f32 %v1677_v48, %v1549_v12  ;;  %2390 = vadd.xlane.f32.xlu1 %v2389_v60  ;;  %2408 = vadd.xlane.f32.xlu0 %v2407_v36 }
 0x1d3   :  { %v7166_v19 = vpop.eup %5532  ;;  %v2878_v7 = vsel %vm2784_vm11, %v2877_v42, %v2873_v34  ;;  %v4799_v31 = vpop.f32.mrb[118].mxu0  ;;  %v2395_v17 = vsel %vm2079_vm3, %v2056_v29, 0.0  ;;  %v2497_v42 = vadd.f32 %v6704_v25, %v2175_v49  ;;  %v2499_v48 = vadd.f32 %v6704_v25, %v2181_v16 }
 0x1d4   :  { %v2883_v13 = vsel %vm2791_vm12, %v2882_v45, %v2878_v7  ;;  %v2187_v9 = vpop.xlane.xlu1 %2186  ;;  %v1804_v5 = vadd.f32 %v1676_v26, %v1548_v51  ;;  %v1551_v60 = vadd.f32 %v4799_v31, %v6153_v30  ;;  %v1216_v37 = vpop.f32.mrb[119].mxu0  ;;  %5542 = vtanh.f32 %v1805_v0 }
 0x1d5   :  { %v2172_v54 = vpop.xlane.xlu0 %2171  ;;  %v2888_v43 = vsel %vm2798_vm13, %v2887_v58, %v2883_v13  ;;  %v1550_v46 = vadd.f32 %v6153_v30, %v1216_v37  ;;  %v2404_v57 = vsel %vm2079_vm3, %v2059_v35, 0.0  ;;  %v2055_v59 = vmul.f32 %v7049_v8, %v5527_v38 }
 0x1d6   :  { %v2496_v45 = vadd.f32 %v6704_v25, %v2172_v54  ;;  %v2893_v29 = vsel %vm2805_vm14, %v2892_v50, %v2888_v43  ;;  %v5535_v14 = vpop.eup %5534  ;;  %2387 = vadd.xlane.f32.xlu1 %v2386_v2  ;;  %5544 = vtanh.f32 %v1800_v20  ;;  %2405 = vadd.xlane.f32.xlu0 %v2404_v57  ;;  %v2912_v16 = vrot.slane %v2497_v42, %v6985_v15  ;;  %v1678_v20 = vld [vmem:[%s8124_s2 + $0x3b0] sm:$0xff] }
 0x1d7   :  { %v2898_v58 = vsel %vm2812_vm15, %v2897_v44, %v2893_v29  ;;  %v4802_v56 = vpop.f32.mrb[120].mxu0  ;;  %v2064_v49 = vmul.f32 %v7049_v8, %v5535_v14  ;;  %v7199_v22 = vpop.eup %5536  ;;  %v1807_v34 = vadd.f32 %v1679_v23, %v1551_v60  ;;  %v2058_v38 = vmul.f32 %v7049_v8, %v5531_v27  ;;  %v1681_v23 = vld [vmem:[%s8124_s2 + $0x3c8] sm:$0xff] }
 0x1d8   :  { %v2903_v52 = vsel %vm2819_vm1, %v2902_v55, %v2898_v58  ;;  %v2907_v12 = vrot.slane %v2496_v45, %v6991_v10  ;;  %v2190_v50 = vpop.xlane.xlu1 %2189  ;;  %v1553_v2 = vadd.f32 %v4802_v56, %v6153_v30  ;;  %v1226_v26 = vpop.f32.mrb[121].mxu0  ;;  %5546 = vtanh.f32 %v1804_v5  ;;  %v1683_v58 = vld [vmem:[%s8124_s2 + $0x3d8] sm:$0xff] }
 0x1d9   :  { %v2178_v51 = vpop.xlane.xlu0 %2177  ;;  %v1552_v0 = vadd.f32 %v6153_v30, %v1226_v26  ;;  %v2921_v44 = vrot.slane %v2499_v48, %v6723_v18  ;;  %v2419_v31 = vsel %vm2079_vm3, %v2064_v49, 0.0  ;;  %v2392_v27 = vsel %vm2079_vm3, %v2055_v59, 0.0 }
 0x1da   :  { %v2908_v55 = vsel %vm2826_vm2, %v2907_v12, %v2903_v52  ;;  %v2498_v7 = vadd.f32 %v6704_v25, %v2178_v51  ;;  %v5539_v36 = vpop.eup %5538  ;;  %2396 = vadd.xlane.f32.xlu1 %v2395_v17  ;;  %v2501_v5 = vadd.f32 %v6704_v25, %v2187_v9  ;;  %2420 = vadd.xlane.f32.xlu0 %v2419_v31  ;;  %5548 = vtanh.f32 %v1807_v34 }
 0x1db   :  { %v2913_v13 = vsel %vm2833_vm0, %v2912_v16, %v2908_v55  ;;  %v4805_v54 = vpop.f32.mrb[122].mxu0  ;;  %v2066_v37 = vmul.f32 %v7049_v8, %v5539_v36  ;;  %v1806_v17 = vadd.f32 %v1678_v20, %v1550_v46  ;;  %v2057_v9 = vmul.f32 %v7049_v8, %v7166_v19 }
 0x1dc   :  { %v5541_v35 = vpop.eup %5540  ;;  %v7216_v42 = vsel %vm8136_vm8, %v2913_v13, %v7015_v21  ;;  %v2917_v60 = vrot.slane %v2498_v7, %v6727_v40  ;;  %v2199_v43 = vpop.xlane.xlu1 %2198  ;;  %v1555_v45 = vadd.f32 %v4805_v54, %v6153_v30  ;;  %v2502_v48 = vadd.f32 %v6704_v25, %v2190_v50  ;;  %v1680_v50 = vld [vmem:[%s8124_s2 + $0x3c0] sm:$0xff] }
 0x1dd   :  { %v2184_v29 = vpop.xlane.xlu0 %2183  ;;  %v1236_v21 = vpop.f32.mrb[123].mxu0  ;;  %5550 = vtanh.f32 %v7137_v28  ;;  %v2425_v59 = vsel %vm2079_vm3, %v2066_v37, 0.0  ;;  %v2065_v52 = vmul.f32 %v7049_v8, %v5541_v35  ;;  %v2931_v12 = vrot.slane %v2501_v5, %v6737_v47 }
 0x1de   :  { %v2922_v14 = vsel %vm2735_vm4, %v2921_v44, %v2917_v60  ;;  %v2500_v46 = vadd.f32 %v6704_v25, %v2184_v29  ;;  %v1554_v57 = vadd.f32 %v6153_v30, %v1236_v21  ;;  %2393 = vadd.xlane.f32.xlu1 %v2392_v27  ;;  %v5543_v19 = vpop.eup %5542  ;;  %v1809_v56 = vadd.f32 %v1681_v23, %v1553_v2 }
 0x1df   :  { %2426 = vadd.xlane.f32.xlu0 %v2425_v59  ;;  %v4808_v16 = vpop.f32.mrb[124].mxu0  ;;  %v2401_v28 = vsel %vm2079_vm3, %v2058_v38, 0.0  ;;  %5552 = vtanh.f32 %v1806_v17  ;;  %v1811_v51 = vadd.f32 %v1683_v58, %v1555_v45  ;;  %v2398_v2 = vsel %vm2079_vm3, %v2057_v9, 0.0  ;;  %v1684_v38 = vld [vmem:[%s8124_s2 + $0x3e0] sm:$0xff] }
 0x1e0   :  { %v2926_v49 = vrot.slane %v2500_v46, %v6756_v24  ;;  %v2205_v34 = vpop.xlane.xlu1 %2204  ;;  %v7244_v26 = vadd.f32 %v4808_v16, %v6153_v30  ;;  %v1246_v20 = vpop.f32.mrb[125].mxu0  ;;  %v2936_v36 = vrot.slane %v2502_v48, %v6751_v63  ;;  %v1808_v27 = vadd.f32 %v1680_v50, %v1552_v0  ;;  %v1687_v46 = vld [vmem:[%s8124_s2 + $0x3f8] sm:$0xff] }
 0x1e1   :  { %v2193_v55 = vpop.xlane.xlu0 %2192  ;;  %v5545_v7 = vpop.eup %5544  ;;  %v1556_v31 = vadd.f32 %v6153_v30, %v1246_v20  ;;  %v2422_v5 = vsel %vm2079_vm3, %v2065_v52, 0.0  ;;  %v2068_v60 = vmul.f32 %v7049_v8, %v5543_v19  ;;  %5554 = vtanh.f32 %v1809_v56 }
 0x1e2   :  { %v2927_v44 = vsel %vm2742_vm5, %v2926_v49, %v2922_v14  ;;  %v2503_v13 = vadd.f32 %v6704_v25, %v2193_v55  ;;  %2402 = vadd.xlane.f32.xlu1 %v2401_v28  ;;  %v5547_v54 = vpop.eup %5546  ;;  %v2505_v37 = vadd.f32 %v6704_v25, %v2199_v43  ;;  %5556 = vtanh.f32 %v1811_v51  ;;  %v1682_v43 = vld [vmem:[%s8124_s2 + $0x3d0] sm:$0xff] }
 0x1e3   :  { %v2932_v35 = vsel %vm2749_vm6, %v2931_v12, %v2927_v44  ;;  %2423 = vadd.xlane.f32.xlu0 %v2422_v5  ;;  %v4811_v45 = vpop.f32.mrb[126].mxu0  ;;  %v1812_v0 = vadd.f32 %v1684_v38, %v1556_v31  ;;  %v2061_v48 = vmul.f32 %v7049_v8, %v7199_v22  ;;  %vm8140_vm8 = vcmask 392512  }
 0x1e4   :  { %v2937_v17 = vsel %vm2756_vm7, %v2936_v36, %v2932_v35  ;;  %v2941_v23 = vrot.slane %v2503_v13, %v6730_v41  ;;  %v2202_v29 = vpop.xlane.xlu1 %2201  ;;  %v1559_v21 = vadd.f32 %v4811_v45, %v6153_v30  ;;  %v1256_v14 = vpop.f32.mrb[127].mxu0  ;;  %v2507_v56 = vadd.f32 %v6704_v25, %v2205_v34  ;;  %v1685_v34 = vld [vmem:[%s8124_s2 + $0x3e8] sm:$0xff] }
 0x1e5   :  { %v2196_v9 = vpop.xlane.xlu0 %2195  ;;  %v2506_v52 = vadd.f32 %v6704_v25, %v2202_v29  ;;  %v1558_v19 = vadd.f32 %v6153_v30, %v1256_v14  ;;  %v5549_v12 = vpop.eup %5548  ;;  %v2431_v22 = vsel %vm2079_vm3, %v2068_v60, 0.0  ;;  %v2067_v50 = vmul.f32 %v7049_v8, %v5547_v54 }
 0x1e6   :  { %v2942_v58 = vsel %vm8140_vm8, %v2941_v23, %v2937_v17  ;;  %v2504_v59 = vadd.f32 %v6704_v25, %v2196_v9  ;;  %2399 = vadd.xlane.f32.xlu1 %v2398_v2  ;;  %5558 = vtanh.f32 %v1808_v27  ;;  %v2951_v51 = vrot.slane %v2505_v37, %v6777_v32  ;;  %v1686_v9 = vld [vmem:[%s8124_s2 + $0x3f0] sm:$0xff] }
 0x1e7   :  { %2432 = vadd.xlane.f32.xlu0 %v2431_v22  ;;  %v5551_v28 = vpop.eup %5550  ;;  %v1810_v55 = vadd.f32 %v1682_v43, %v1554_v57  ;;  %5560 = vtanh.f32 %v1812_v0  ;;  %v1815_v20 = vadd.f32 %v1687_v46, %v1559_v21  ;;  %v2956_v36 = vrot.slane %v2506_v52, %v6780_v33 }
 0x1e8   :  { %v2946_v49 = vrot.slane %v2504_v59, %v6806_v53  ;;  %v2211_v16 = vpop.xlane.xlu1 %2210  ;;  %v2410_v44 = vsel %vm2079_vm3, %v2061_v48, 0.0  ;;  %v2063_v13 = vmul.f32 %v7049_v8, %v5545_v7  ;;  %v2961_v38 = vrot.slane %v2507_v56, %v6759_v6 }
 0x1e9   :  { %v7278_v30 = vpop.xlane.xlu0 %2228  ;;  %v5553_v31 = vpop.eup %5552  ;;  %v2428_v27 = vsel %vm2079_vm3, %v2067_v50, 0.0  ;;  %v2070_v35 = vmul.f32 %v7049_v8, %v5549_v12  ;;  %v2509_v60 = vadd.f32 %v6704_v25, %v2211_v16  ;;  %v1813_v37 = vadd.f32 %v1685_v34, %v7244_v26 }
 0x1ea   :  { %v2947_v2 = vsel %vm2770_vm9, %v2946_v49, %v2942_v58  ;;  %2411 = vadd.xlane.f32.xlu1 %v2410_v44  ;;  %5562 = vtanh.f32 %v1815_v20  ;;  %v2416_v29 = vsel %vm2079_vm3, %v2063_v13, 0.0  ;;  %v2062_v0 = vmul.f32 %v7049_v8, %v5551_v28 }
 0x1eb   :  { %v2952_v57 = vsel %vm2777_vm10, %v2951_v51, %v2947_v2  ;;  %2429 = vadd.xlane.f32.xlu0 %v2428_v27  ;;  %v5555_v45 = vpop.eup %5554  ;;  %5564 = vtanh.f32 %v1810_v55  ;;  %v2437_v14 = vsel %vm2079_vm3, %v2070_v35, 0.0  ;;  %v2069_v48 = vmul.f32 %v7049_v8, %v5553_v31 }
 0x1ec   :  { %v2957_v5 = vsel %vm2784_vm11, %v2956_v36, %v2952_v57  ;;  %v2208_v54 = vpop.xlane.xlu1 %2207  ;;  %v5557_v21 = vpop.eup %5556  ;;  %v2971_v43 = vrot.slane %v2509_v60, %v6813_v61  ;;  %5566 = vtanh.f32 %v1813_v37  ;;  %v1814_v12 = vadd.f32 %v1686_v9, %v1558_v19 }
 0x1ed   :  { %v2962_v7 = vsel %vm2791_vm12, %v2961_v38, %v2957_v5  ;;  %v2508_v17 = vadd.f32 %v6704_v25, %v2208_v54  ;;  %v7296_v23 = vpop.xlane.xlu0 %2234  ;;  %v2413_v56 = vsel %vm2079_vm3, %v2062_v0, 0.0  ;;  %v2074_v50 = vmul.f32 %v7049_v8, %v5557_v21 }
 0x1ee   :  { %2417 = vadd.xlane.f32.xlu1 %v2416_v29  ;;  %v2434_v16 = vsel %vm2079_vm3, %v2069_v48, 0.0  ;;  %v2072_v28 = vmul.f32 %v7049_v8, %v5555_v45  ;;  %5568 = vtanh.f32 %v1814_v12  ;;  %vm3390_vm8 = vcmask 1042434  }
 0x1ef   :  { %v2966_v26 = vrot.slane %v2508_v17, %v6816_v1  ;;  %2438 = vadd.xlane.f32.xlu0 %v2437_v14  ;;  %v2449_v19 = vsel %vm2079_vm3, %v2074_v50, 0.0 }
 0x1f0   :  { %v2217_v58 = vpop.xlane.xlu1 %2216  ;;  %v5559_v52 = vpop.eup %5558  ;;  %v2443_v13 = vsel %vm2079_vm3, %v2072_v28, 0.0 }
 0x1f1   :  { %v2967_v46 = vsel %vm2798_vm13, %v2966_v26, %v2962_v7  ;;  %v2232_v59 = vpop.xlane.xlu0 %2231  ;;  %v5561_v49 = vpop.eup %5560  ;;  %v2511_v51 = vadd.f32 %v6704_v25, %v2217_v58  ;;  %v2071_v31 = vmul.f32 %v7049_v8, %v5559_v52  ;;  %v2515_v26 = vadd.f32 %v6704_v25, %v7278_v30 }
 0x1f2   :  { %v2972_v22 = vsel %vm2805_vm14, %v2971_v43, %v2967_v46  ;;  %2414 = vadd.xlane.f32.xlu1 %v2413_v56  ;;  %v2075_v2 = vmul.f32 %v7049_v8, %v5561_v49  ;;  %v2516_v52 = vadd.f32 %v6704_v25, %v2232_v59  ;;  %v2517_v30 = vadd.f32 %v6704_v25, %v7296_v23 }
 0x1f3   :  { %2435 = vadd.xlane.f32.xlu0 %v2434_v16  ;;  %v2981_v57 = vrot.slane %v2511_v51, %v6824_v11  ;;  %v2440_v17 = vsel %vm2079_vm3, %v2071_v31, 0.0  ;;  %v3000_v16 = vrot.slane %v2515_v26, %v6723_v18 }
 0x1f4   :  { %v2214_v55 = vpop.xlane.xlu1 %2213  ;;  %v5563_v36 = vpop.eup %5562  ;;  %v2452_v60 = vsel %vm2079_vm3, %v2075_v2, 0.0  ;;  %v3005_v23 = vrot.slane %v2516_v52, %v6756_v24  ;;  %v3010_v2 = vrot.slane %v2517_v30, %v6737_v47 }
 0x1f5   :  { %v2510_v20 = vadd.f32 %v6704_v25, %v2214_v55  ;;  %v7315_v34 = vpop.xlane.xlu0 %2246  ;;  %v5565_v38 = vpop.eup %5564  ;;  %v2078_v37 = vmul.f32 %v7049_v8, %v5563_v36 }
 0x1f6   :  { %2450 = vadd.xlane.f32.xlu1 %v2449_v19  ;;  %v5567_v7 = vpop.eup %5566  ;;  %v2073_v45 = vmul.f32 %v7049_v8, %v5565_v38 }
 0x1f7   :  { %v2976_v44 = vrot.slane %v2510_v20, %v6951_v39  ;;  %2444 = vadd.xlane.f32.xlu0 %v2443_v13  ;;  %v2461_v14 = vsel %vm2079_vm3, %v2078_v37, 0.0  ;;  %v2076_v58 = vmul.f32 %v7049_v8, %v5567_v7 }
 0x1f8   :  { %v2223_v27 = vpop.xlane.xlu1 %2222  ;;  %v2446_v43 = vsel %vm2079_vm3, %v2073_v45, 0.0  ;;  %v5569_v46 = vpop.eup %5568 }
 0x1f9   :  { %v2977_v35 = vsel %vm2812_vm15, %v2976_v44, %v2972_v22  ;;  %v2244_v5 = vpop.xlane.xlu0 %2243  ;;  %v2513_v29 = vadd.f32 %v6704_v25, %v2223_v27  ;;  %v2455_v55 = vsel %vm2079_vm3, %v2076_v58, 0.0  ;;  %v2077_v20 = vmul.f32 %v7049_v8, %v5569_v46 }
 0x1fa   :  { %v2982_v54 = vsel %vm2819_vm1, %v2981_v57, %v2977_v35  ;;  %2453 = vadd.xlane.f32.xlu1 %v2452_v60  ;;  %v2520_v8 = vadd.f32 %v6704_v25, %v2244_v5  ;;  %v2521_v60 = vadd.f32 %v6704_v25, %v7315_v34 }
 0x1fb   :  { %2441 = vadd.xlane.f32.xlu0 %v2440_v17  ;;  %v2991_v12 = vrot.slane %v2513_v29, %v6985_v15 }
 0x1fc   :  { %v2220_v0 = vpop.xlane.xlu1 %2219  ;;  %v3025_v29 = vrot.slane %v2520_v8, %v6806_v53  ;;  %v3030_v26 = vrot.slane %v2521_v60, %v6777_v32 }
 0x1fd   :  { %v2512_v21 = vadd.f32 %v6704_v25, %v2220_v0  ;;  %v2253_v9 = vpop.xlane.xlu0 %2252 }
 0x1fe   :  { %2462 = vadd.xlane.f32.xlu1 %v2461_v14  ;;  %v2523_v7 = vadd.f32 %v6704_v25, %v2253_v9 }
 0x1ff   :  { %v2986_v48 = vrot.slane %v2512_v21, %v6991_v10  ;;  %2447 = vadd.xlane.f32.xlu0 %v2446_v43 }
 0x200   :  { %v2226_v56 = vpop.xlane.xlu1 %2225  ;;  %v3040_v43 = vrot.slane %v2523_v7, %v6759_v6 }
 0x201   :  { %v2987_v22 = vsel %vm2826_vm2, %v2986_v48, %v2982_v54  ;;  %v2250_v50 = vpop.xlane.xlu0 %2249  ;;  %v2514_v49 = vadd.f32 %v6704_v25, %v2226_v56 }
 0x202   :  { %v2992_v28 = vsel %vm2833_vm0, %v2991_v12, %v2987_v22  ;;  %v2522_v54 = vadd.f32 %v6704_v25, %v2250_v50 }
 0x203   :  { %v7347_v59 = vsel %vm3390_vm8, %v2992_v28, %v7216_v42  ;;  %v2996_v51 = vrot.slane %v2514_v49, %v6727_v40  ;;  %2456 = vadd.xlane.f32.xlu0 %v2455_v55  ;;  %v2458_v42 = vsel %vm2079_vm3, %v2077_v20, 0.0  ;;  %vm8141_vm3 = vcmask 392512  }
 0x204   :  { %v2241_v19 = vpop.xlane.xlu1 %2240  ;;  %v3035_v48 = vrot.slane %v2522_v54, %v6780_v33 }
 0x205   :  { %v3001_v36 = vsel %vm2735_vm4, %v3000_v16, %v2996_v51  ;;  %v2259_v44 = vpop.xlane.xlu0 %2258  ;;  %v2519_v38 = vadd.f32 %v6704_v25, %v2241_v19 }
 0x206   :  { %v3006_v13 = vsel %vm2742_vm5, %v3005_v23, %v3001_v36  ;;  %v2525_v34 = vadd.f32 %v6704_v25, %v2259_v44 }
 0x207   :  { %v3011_v31 = vsel %vm2749_vm6, %v3010_v2, %v3006_v13  ;;  %2459 = vadd.xlane.f32.xlu0 %v2458_v42  ;;  %v3020_v17 = vrot.slane %v2519_v38, %v6730_v41 }
 0x208   :  { %v2238_v57 = vpop.xlane.xlu1 %2237  ;;  %v3050_v22 = vrot.slane %v2525_v34, %v6813_v61 }
 0x209   :  { %v2256_v27 = vpop.xlane.xlu0 %2255  ;;  %v2518_v35 = vadd.f32 %v6704_v25, %v2238_v57 }
 0x20a   :  { %v2524_v0 = vadd.f32 %v6704_v25, %v2256_v27 }
 0x20b   :  { %v3015_v37 = vrot.slane %v2518_v35, %v6751_v63 }
 0x20c   :  { %v2271_v45 = vpop.xlane.xlu1 %2270  ;;  %v3045_v52 = vrot.slane %v2524_v0, %v6816_v1 }
 0x20d   :  { %v3016_v5 = vsel %vm2756_vm7, %v3015_v37, %v3011_v31  ;;  %v2265_v21 = vpop.xlane.xlu0 %2264  ;;  %v2529_v23 = vadd.f32 %v6704_v25, %v2271_v45 }
 0x20e   :  { %v3021_v14 = vsel %vm8141_vm3, %v3020_v17, %v3016_v5  ;;  %v2527_v12 = vadd.f32 %v6704_v25, %v2265_v21  ;;  %vm8137_vm3 = vcmask 1043459  }
 0x20f   :  { %v3026_v9 = vsel %vm2770_vm9, %v3025_v29, %v3021_v14  ;;  %v3070_v38 = vrot.slane %v2529_v23, %v6985_v15 }
 0x210   :  { %v3031_v58 = vsel %vm2777_vm10, %v3030_v26, %v3026_v9  ;;  %v2274_v46 = vpop.xlane.xlu1 %2273  ;;  %v3060_v20 = vrot.slane %v2527_v12, %v6824_v11 }
 0x211   :  { %v2262_v56 = vpop.xlane.xlu0 %2261  ;;  %v3036_v30 = vsel %vm2784_vm11, %v3035_v48, %v3031_v58  ;;  %v2530_v13 = vadd.f32 %v6704_v25, %v2274_v46 }
 0x212   :  { %v2526_v50 = vadd.f32 %v6704_v25, %v2262_v56  ;;  %v3041_v49 = vsel %vm2791_vm12, %v3040_v43, %v3036_v30 }
 0x213   :  { %v3046_v16 = vsel %vm2798_vm13, %v3045_v52, %v3041_v49  ;;  %v3075_v54 = vrot.slane %v2530_v13, %v6727_v40 }
 0x214   :  { %v3051_v28 = vsel %vm2805_vm14, %v3050_v22, %v3046_v16  ;;  %v3055_v51 = vrot.slane %v2526_v50, %v6951_v39  ;;  %v2280_v55 = vpop.xlane.xlu1 %2279 }
 0x215   :  { %v2268_v19 = vpop.xlane.xlu0 %2267  ;;  %v2532_v57 = vadd.f32 %v6704_v25, %v2280_v55 }
 0x216   :  { %v3056_v2 = vsel %vm2812_vm15, %v3055_v51, %v3051_v28  ;;  %v2528_v36 = vadd.f32 %v6704_v25, %v2268_v19 }
 0x217   :  { %v3061_v44 = vsel %vm2819_vm1, %v3060_v20, %v3056_v2  ;;  %v3084_v45 = vrot.slane %v2532_v57, %v6756_v24 }
 0x218   :  { %v3065_v42 = vrot.slane %v2528_v36, %v6991_v10  ;;  %v2289_v31 = vpop.xlane.xlu1 %2288 }
 0x219   :  { %v2277_v8 = vpop.xlane.xlu0 %2276  ;;  %v2535_v14 = vadd.f32 %v6704_v25, %v2289_v31 }
 0x21a   :  { %v3066_v27 = vsel %vm2826_vm2, %v3065_v42, %v3061_v44  ;;  %v2531_v35 = vadd.f32 %v6704_v25, %v2277_v8 }
 0x21b   :  { %v3071_v60 = vsel %vm2833_vm0, %v3070_v38, %v3066_v27  ;;  %v3099_v12 = vrot.slane %v2535_v14, %v6730_v41 }
 0x21c   :  { %v7401_v37 = vsel %vm8137_vm3, %v3071_v60, %v7347_v59  ;;  %v3079_v7 = vrot.slane %v2531_v35, %v6723_v18  ;;  %v2295_v17 = vpop.xlane.xlu1 %2294  ;;  %vm8142_vm3 = vcmask 392512  }
 0x21d   :  { %v2283_v29 = vpop.xlane.xlu0 %2282  ;;  %v2537_v58 = vadd.f32 %v6704_v25, %v2295_v17 }
 0x21e   :  { %v3080_v0 = vsel %vm2735_vm4, %v3079_v7, %v3075_v54  ;;  %v2533_v5 = vadd.f32 %v6704_v25, %v2283_v29 }
 0x21f   :  { %v3085_v21 = vsel %vm2742_vm5, %v3084_v45, %v3080_v0  ;;  %v3109_v50 = vrot.slane %v2537_v58, %v6777_v32 }
 0x220   :  { %v3089_v26 = vrot.slane %v2533_v5, %v6737_v47  ;;  %v2292_v34 = vpop.xlane.xlu1 %2291 }
 0x221   :  { %v2286_v48 = vpop.xlane.xlu0 %2285  ;;  %v2536_v43 = vadd.f32 %v6704_v25, %v2292_v34 }
 0x222   :  { %v3090_v59 = vsel %vm2749_vm6, %v3089_v26, %v3085_v21  ;;  %v2534_v9 = vadd.f32 %v6704_v25, %v2286_v48 }
 0x223   :  { %v3104_v22 = vrot.slane %v2536_v43, %v6806_v53 }
 0x224   :  { %v3094_v46 = vrot.slane %v2534_v9, %v6751_v63  ;;  %v2301_v52 = vpop.xlane.xlu1 %2300 }
 0x225   :  { %v2319_v56 = vpop.xlane.xlu0 %2318  ;;  %v2539_v28 = vadd.f32 %v6704_v25, %v2301_v52 }
 0x226   :  { %v3095_v30 = vsel %vm2756_vm7, %v3094_v46, %v3090_v59  ;;  %v2545_v26 = vadd.f32 %v6704_v25, %v2319_v56 }
 0x227   :  { %v3100_v49 = vsel %vm8142_vm3, %v3099_v12, %v3095_v30  ;;  %v3119_v2 = vrot.slane %v2539_v28, %v6759_v6  ;;  %vm8138_vm3 = vcmask 1044484  }
 0x228   :  { %v3105_v16 = vsel %vm2770_vm9, %v3104_v22, %v3100_v49  ;;  %v2298_v51 = vpop.xlane.xlu1 %2297  ;;  %v3149_v52 = vrot.slane %v2545_v26, %v6985_v15 }
 0x229   :  { %v2316_v55 = vpop.xlane.xlu0 %2315  ;;  %v3110_v20 = vsel %vm2777_vm10, %v3109_v50, %v3105_v16  ;;  %v2538_v23 = vadd.f32 %v6704_v25, %v2298_v51 }
 0x22a   :  { %v2544_v0 = vadd.f32 %v6704_v25, %v2316_v55 }
 0x22b   :  { %v3114_v19 = vrot.slane %v2538_v23, %v6780_v33 }
 0x22c   :  { %v2307_v36 = vpop.xlane.xlu1 %2306  ;;  %v3144_v9 = vrot.slane %v2544_v0, %v6991_v10 }
 0x22d   :  { %v3115_v44 = vsel %vm2784_vm11, %v3114_v19, %v3110_v20  ;;  %v2322_v13 = vpop.xlane.xlu0 %2321  ;;  %v2541_v31 = vadd.f32 %v6704_v25, %v2307_v36 }
 0x22e   :  { %v3120_v42 = vsel %vm2791_vm12, %v3119_v2, %v3115_v44  ;;  %v2546_v34 = vadd.f32 %v6704_v25, %v2322_v13 }
 0x22f   :  { %v3129_v35 = vrot.slane %v2541_v31, %v6813_v61 }
 0x230   :  { %v2304_v38 = vpop.xlane.xlu1 %2303  ;;  %v3154_v56 = vrot.slane %v2546_v34, %v6727_v40 }
 0x231   :  { %v2540_v57 = vadd.f32 %v6704_v25, %v2304_v38  ;;  %v2337_v8 = vpop.xlane.xlu0 %2336 }
 0x232   :  { %v2551_v36 = vadd.f32 %v6704_v25, %v2337_v8 }
 0x233   :  { %v3124_v27 = vrot.slane %v2540_v57, %v6816_v1 }
 0x234   :  { %v2313_v60 = vpop.xlane.xlu1 %2312 }
 0x235   :  { %v3125_v54 = vsel %vm2798_vm13, %v3124_v27, %v3120_v42  ;;  %v2334_v7 = vpop.xlane.xlu0 %2333  ;;  %v2543_v45 = vadd.f32 %v6704_v25, %v2313_v60  ;;  %v3178_v60 = vrot.slane %v2551_v36, %v6730_v41 }
 0x236   :  { %v3130_v17 = vsel %vm2805_vm14, %v3129_v35, %v3125_v54  ;;  %v2550_v23 = vadd.f32 %v6704_v25, %v2334_v7 }
 0x237   :  { %v3139_v48 = vrot.slane %v2543_v45, %v6824_v11 }
 0x238   :  { %v2310_v29 = vpop.xlane.xlu1 %2309 }
 0x239   :  { %v2542_v5 = vadd.f32 %v6704_v25, %v2310_v29  ;;  %v2343_v21 = vpop.xlane.xlu0 %2342 }
 0x23a   :  { %v2553_v42 = vadd.f32 %v6704_v25, %v2343_v21 }
 0x23b   :  { %v3134_v14 = vrot.slane %v2542_v5, %v6951_v39 }
 0x23c   :  { %v2325_v59 = vpop.xlane.xlu1 %2324  ;;  %v3188_v45 = vrot.slane %v2553_v42, %v6777_v32 }
 0x23d   :  { %v3135_v43 = vsel %vm2812_vm15, %v3134_v14, %v3130_v17  ;;  %v2547_v58 = vadd.f32 %v6704_v25, %v2325_v59  ;;  %v2340_v46 = vpop.xlane.xlu0 %2339 }
 0x23e   :  { %v3140_v12 = vsel %vm2819_vm1, %v3139_v48, %v3135_v43  ;;  %v2552_v44 = vadd.f32 %v6704_v25, %v2340_v46 }
 0x23f   :  { %v3145_v30 = vsel %vm2826_vm2, %v3144_v9, %v3140_v12  ;;  %v3158_v22 = vrot.slane %v2547_v58, %v6723_v18 }
 0x240   :  { %v2331_v50 = vpop.xlane.xlu1 %2330  ;;  %v3150_v49 = vsel %vm2833_vm0, %v3149_v52, %v3145_v30  ;;  %v3183_v7 = vrot.slane %v2552_v44, %v6806_v53 }
 0x241   :  { %v3159_v16 = vsel %vm2735_vm4, %v3158_v22, %v3154_v56  ;;  %v2349_v28 = vpop.xlane.xlu0 %2348  ;;  %v3395_v51 = vsel %vm8138_vm3, %v3150_v49, %v7401_v37  ;;  %v2549_v55 = vadd.f32 %v6704_v25, %v2331_v50  ;;  %v3173_v37 = vrot.slane %v2550_v23, %v6751_v63 }
 0x242   :  { %v2555_v8 = vadd.f32 %v6704_v25, %v2349_v28  ;;  %vm8143_vm3 = vcmask 392512  }
 0x243   :  { %v3168_v31 = vrot.slane %v2549_v55, %v6737_v47 }
 0x244   :  { %v2328_v20 = vpop.xlane.xlu1 %2327  ;;  %v3198_v14 = vrot.slane %v2555_v8, %v6759_v6 }
 0x245   :  { %v2548_v19 = vadd.f32 %v6704_v25, %v2328_v20  ;;  %v2346_v2 = vpop.xlane.xlu0 %2345 }
 0x246   :  { %v2554_v27 = vadd.f32 %v6704_v25, %v2346_v2 }
 0x247   :  { %v3163_v13 = vrot.slane %v2548_v19, %v6756_v24 }
 0x248   :  { %v2361_v38 = vpop.xlane.xlu1 %2360  ;;  %v3193_v21 = vrot.slane %v2554_v27, %v6780_v33 }
 0x249   :  { %v3164_v57 = vsel %vm2742_vm5, %v3163_v13, %v3159_v16  ;;  %v2355_v35 = vpop.xlane.xlu0 %2354  ;;  %v2559_v52 = vadd.f32 %v6704_v25, %v2361_v38 }
 0x24a   :  { %v3169_v54 = vsel %vm2749_vm6, %v3168_v31, %v3164_v57  ;;  %v2557_v26 = vadd.f32 %v6704_v25, %v2355_v35 }
 0x24b   :  { %v3174_v17 = vsel %vm2756_vm7, %v3173_v37, %v3169_v54  ;;  %v3218_v55 = vrot.slane %v2559_v52, %v6824_v11 }
 0x24c   :  { %v3179_v29 = vsel %vm8143_vm3, %v3178_v60, %v3174_v17  ;;  %v2364_v0 = vpop.xlane.xlu1 %2363  ;;  %v3208_v12 = vrot.slane %v2557_v26, %v6813_v61  ;;  %vm8139_vm3 = vcmask 1045509  }
 0x24d   :  { %v3184_v5 = vsel %vm2770_vm9, %v3183_v7, %v3179_v29  ;;  %v2352_v34 = vpop.xlane.xlu0 %2351  ;;  %v2560_v30 = vadd.f32 %v6704_v25, %v2364_v0 }
 0x24e   :  { %v3189_v48 = vsel %vm2777_vm10, %v3188_v45, %v3184_v5  ;;  %v2556_v59 = vadd.f32 %v6704_v25, %v2352_v34 }
 0x24f   :  { %v3194_v9 = vsel %vm2784_vm11, %v3193_v21, %v3189_v48  ;;  %v3223_v23 = vrot.slane %v2560_v30, %v6991_v10 }
 0x250   :  { %v3199_v43 = vsel %vm2791_vm12, %v3198_v14, %v3194_v9  ;;  %v3203_v58 = vrot.slane %v2556_v59, %v6816_v1  ;;  %v2373_v46 = vpop.xlane.xlu1 %2372 }
 0x251   :  { %v2358_v56 = vpop.xlane.xlu0 %2357 }
 0x252   :  { %v3204_v22 = vsel %vm2798_vm13, %v3203_v58, %v3199_v43  ;;  %v2558_v50 = vadd.f32 %v6704_v25, %v2358_v56 }
 0x253   :  { %v3209_v49 = vsel %vm2805_vm14, %v3208_v12, %v3204_v22 }
 0x254   :  { %v3213_v16 = vrot.slane %v2558_v50, %v6951_v39  ;;  %v2379_v28 = vpop.xlane.xlu1 %2378 }
 0x255   :  { %v2367_v20 = vpop.xlane.xlu0 %2366  ;;  %v2565_v9 = vadd.f32 %v6704_v25, %v2379_v28 }
 0x256   :  { %v3214_v19 = vsel %vm2812_vm15, %v3213_v16, %v3209_v49  ;;  %v2561_v2 = vadd.f32 %v6704_v25, %v2367_v20 }
 0x257   :  { %v3219_v36 = vsel %vm2819_vm1, %v3218_v55, %v3214_v19 }
 0x258   :  { %v3224_v44 = vsel %vm2826_vm2, %v3223_v23, %v3219_v36  ;;  %v3228_v13 = vrot.slane %v2561_v2, %v6985_v15  ;;  %v2385_v42 = vpop.xlane.xlu1 %2384 }
 0x259   :  { %v2370_v31 = vpop.xlane.xlu0 %2369  ;;  %v2567_v16 = vadd.f32 %v6704_v25, %v2385_v42 }
 0x25a   :  { %v3229_v38 = vsel %vm2833_vm0, %v3228_v13, %v3224_v44  ;;  %v2562_v0 = vadd.f32 %v6704_v25, %v2370_v31 }
 0x25b   :  { %v7496_v37 = vsel %vm8139_vm3, %v3229_v38, %v3395_v51  ;;  %v2563_v51 = vadd.f32 %v6704_v25, %v2373_v46  ;;  %v3247_v46 = vrot.slane %v2565_v9, %v6737_v47  ;;  %vm8144_vm3 = vcmask 392512  }
 0x25c   :  { %v2382_v57 = vpop.xlane.xlu1 %2381  ;;  %v3233_v34 = vrot.slane %v2562_v0, %v6727_v40 }
 0x25d   :  { %v2376_v27 = vpop.xlane.xlu0 %2375  ;;  %v3237_v59 = vrot.slane %v2563_v51, %v6723_v18  ;;  %v2566_v52 = vadd.f32 %v6704_v25, %v2382_v57  ;;  %v3257_v57 = vrot.slane %v2567_v16, %v6730_v41 }
 0x25e   :  { %v2564_v5 = vadd.f32 %v6704_v25, %v2376_v27 }
 0x25f   :  { %v3238_v58 = vsel %vm2735_vm4, %v3237_v59, %v3233_v34  ;;  %v3252_v28 = vrot.slane %v2566_v52, %v6751_v63 }
 0x260   :  { %v2391_v35 = vpop.xlane.xlu1 %2390  ;;  %v3242_v14 = vrot.slane %v2564_v5, %v6756_v24 }
 0x261   :  { %v7498_v60 = vpop.xlane.xlu0 %2408  ;;  %v2569_v27 = vadd.f32 %v6704_v25, %v2391_v35 }
 0x262   :  { %v3243_v12 = vsel %vm2742_vm5, %v3242_v14, %v3238_v58 }
 0x263   :  { %v3248_v22 = vsel %vm2749_vm6, %v3247_v46, %v3243_v12  ;;  %v3267_v14 = vrot.slane %v2569_v27, %v6777_v32 }
 0x264   :  { %v2388_v8 = vpop.xlane.xlu1 %2387  ;;  %v3253_v36 = vsel %vm2756_vm7, %v3252_v28, %v3248_v22 }
 0x265   :  { %v7500_v54 = vpop.xlane.xlu0 %2405  ;;  %v2568_v50 = vadd.f32 %v6704_v25, %v2388_v8 }
 0x266   :  { %v2574_v28 = vadd.f32 %v6704_v25, %v7500_v54 }
 0x267   :  { %v3262_v13 = vrot.slane %v2568_v50, %v6806_v53 }
 0x268   :  { %v2397_v7 = vpop.xlane.xlu1 %2396 }
 0x269   :  { %v2421_v17 = vpop.xlane.xlu0 %2420  ;;  %v2571_v59 = vadd.f32 %v6704_v25, %v2397_v7 }
 0x26a   :  { %v2579_v49 = vadd.f32 %v6704_v25, %v2421_v17 }
 0x26b   :  { %v3277_v7 = vrot.slane %v2571_v59, %v6759_v6 }
 0x26c   :  { %v2394_v45 = vpop.xlane.xlu1 %2393  ;;  %v3316_v31 = vrot.slane %v2579_v49, %v6723_v18  ;;  %v3258_v18 = vsel %vm8144_vm3, %v3257_v57, %v3253_v36 }
 0x26d   :  { %v2427_v29 = vpop.xlane.xlu0 %2426  ;;  %v2570_v42 = vadd.f32 %v6704_v25, %v2394_v45  ;;  %v3263_v35 = vsel %vm2770_vm9, %v3262_v13, %v3258_v18 }
 0x26e   :  { %v2581_v23 = vadd.f32 %v6704_v25, %v2427_v29  ;;  %v3268_v58 = vsel %vm2777_vm10, %v3267_v14, %v3263_v35 }
 0x270   :  { %v2403_v21 = vpop.xlane.xlu1 %2402  ;;  %v3326_v29 = vrot.slane %v2581_v23, %v6737_v47 }
 0x271   :  { %v2424_v26 = vpop.xlane.xlu0 %2423  ;;  %v2573_v50 = vadd.f32 %v6704_v25, %v2403_v21 }
 0x272   :  { %v2580_v55 = vadd.f32 %v6704_v25, %v2424_v26 }
 0x274   :  { %v2400_v48 = vpop.xlane.xlu1 %2399  ;;  %v3321_v8 = vrot.slane %v2580_v55, %v6756_v24  ;;  %v3272_v24 = vrot.slane %v2570_v42, %v6780_v33 }
 0x275   :  { %v2433_v43 = vpop.xlane.xlu0 %2432  ;;  %v2572_v34 = vadd.f32 %v6704_v25, %v2400_v48 }
 0x276   :  { %v2583_v0 = vadd.f32 %v6704_v25, %v2433_v43  ;;  %v3273_v46 = vsel %vm2784_vm11, %v3272_v24, %v3268_v58 }
 0x277   :  { %v3282_v48 = vrot.slane %v2572_v34, %v6816_v1 }
 0x278   :  { %v7512_v56 = vpop.xlane.xlu1 %2411 }
 0x279   :  { %v2430_v30 = vpop.xlane.xlu0 %2429 }
 0x27a   :  { %v2582_v44 = vadd.f32 %v6704_v25, %v2430_v30 }
 0x27c   :  { %v2418_v20 = vpop.xlane.xlu1 %2417  ;;  %v3331_v45 = vrot.slane %v2582_v44, %v6751_v63  ;;  %v3336_v63 = vrot.slane %v2583_v0, %v6730_v41  ;;  %v3278_v41 = vsel %vm2791_vm12, %v3277_v7, %v3273_v46  ;;  %v3479_v7 = vld [vmem:[%s8128_s1 + $0x20] sm:$0xff] }
 0x27d   :  { %v2439_v19 = vpop.xlane.xlu0 %2438  ;;  %v2578_v2 = vadd.f32 %v6704_v25, %v2418_v20  ;;  %v3283_v55 = vsel %vm2798_vm13, %v3282_v48, %v3278_v41  ;;  %v3477_v48 = vld [vmem:[%s8128_s1 + $0x10] sm:$0xff] }
 0x27e   :  { %v2585_v30 = vadd.f32 %v6704_v25, %v2439_v19  ;;  %v3287_v19 = vrot.slane %v2573_v50, %v6813_v61  ;;  %v3480_v50 = vld [vmem:[%s8128_s1 + $0x28] sm:$0xff]  ;;  %v3481_v41 = vld [vmem:[%s8128_s1 + $0x30] sm:$0xff] }
 0x27f   :  { %v3312_v38 = vrot.slane %v2578_v2, %v6727_v40 }
 0x280   :  { %v2415_v17 = vpop.xlane.xlu1 %2414  ;;  %v3346_v20 = vrot.slane %v2585_v30, %v6777_v32  ;;  %v3288_v54 = vsel %vm2805_vm14, %v3287_v19, %v3283_v55  ;;  %v3483_v19 = vld [vmem:[%s8128_s1 + $0x40] sm:$0xff] }
 0x281   :  { %v3317_v5 = vsel %vm2735_vm4, %v3316_v31, %v3312_v38  ;;  %v2436_v51 = vpop.xlane.xlu0 %2435  ;;  %vm8145_vm4 = vmmov %vm8144_vm3  ;;  %v2575_v31 = vadd.f32 %v6704_v25, %v7498_v60  ;;  %v3292_v38 = vrot.slane %v2574_v28, %v6951_v39  ;;  %v2577_v27 = vadd.f32 %v6704_v25, %v2415_v17 }
 0x282   :  { %v3322_v40 = vsel %vm2742_vm5, %v3321_v8, %v3317_v5  ;;  %v2584_v26 = vadd.f32 %v6704_v25, %v2436_v51  ;;  %vm3398_vm5 = vcmask 1046534  }
 0x283   :  { %v3327_v47 = vsel %vm2749_vm6, %v3326_v29, %v3322_v40  ;;  %v3293_v60 = vsel %vm2812_vm15, %v3292_v38, %v3288_v54  ;;  %v3297_v18 = vrot.slane %v2575_v31, %v6824_v11  ;;  %vm3400_vm6 = vcmask 1047559   ;;  %v3487_v31 = vld [vmem:[%s8128_s1 + $0x60] sm:$0xff]  ;;  %v3488_v54 = vld [vmem:[%s8128_s1 + $0x68] sm:$0xff]  ;;  %v3490_v38 = vld [vmem:[%s8128_s1 + $0x78] sm:$0xff] }
 0x284   :  { %v3332_v9 = vsel %vm2756_vm7, %v3331_v45, %v3327_v47  ;;  %v3341_v52 = vrot.slane %v2584_v26, %v6806_v53  ;;  %v2451_v12 = vpop.xlane.xlu1 %2450  ;;  %v3307_v26 = vrot.slane %v2577_v27, %v6985_v15 }
 0x285   :  { %v2445_v43 = vpop.xlane.xlu0 %2444  ;;  %v3337_v22 = vsel %vm8145_vm4, %v3336_v63, %v3332_v9  ;;  %v2589_v36 = vadd.f32 %v6704_v25, %v2451_v12  ;;  %v2594_v9 = vld [vmem:[%s8127_s4] sm:$0xff] }
 0x286   :  { %v3342_v16 = vsel %vm2770_vm9, %v3341_v52, %v3337_v22  ;;  %v2587_v23 = vadd.f32 %v6704_v25, %v2445_v43  ;;  %vm2595_vm7 = vcmp.gt.f32.partialorder %v2594_v9, 0.5  ;;  %v3502_v9 = vld [vmem:[%s8128_s1 + $0xd8] sm:$0xff]  ;;  %vm8147_vm9 = vcmask 1041409  }
 0x287   :  { %v3347_v44 = vsel %vm2777_vm10, %v3346_v20, %v3342_v16  ;;  %v3366_v0 = vrot.slane %v2589_v36, %v6813_v61  ;;  %v3482_v16 = vld [vmem:[%s8128_s1 + $0x38] sm:$0xff]  ;;  %vm8148_vm10 = vcmask 1043459  }
 0x288   :  { %v2454_v2 = vpop.xlane.xlu1 %2453  ;;  %v3356_v57 = vrot.slane %v2587_v23, %v6759_v6 }
 0x289   :  { %v2442_v49 = vpop.xlane.xlu0 %2441  ;;  %v2590_v8 = vadd.f32 %v6704_v25, %v2454_v2  ;;  %v3485_v2 = vld [vmem:[%s8128_s1 + $0x50] sm:$0xff] }
 0x28a   :  { %v2586_v53 = vadd.f32 %v6704_v25, %v2442_v49  ;;  %v5125_v49 = vpack.c.bf16 %v3480_v50, %v3479_v7  ;;  %v3511_v7 = vld [vmem:[%s8128_s1 + $0x120] sm:$0xff]  ;;  %v3512_v50 = vld [vmem:[%s8128_s1 + $0x128] sm:$0xff] }
 0x28b   :  { %v3371_v61 = vrot.slane %v2590_v8, %v6951_v39  ;;  %v3414_v8 = vld [vmem:[%s8129_s5] sm:$0xff] }
 0x28c   :  { %v3351_v21 = vrot.slane %v2586_v53, %v6780_v33  ;;  %v2576_v33 = vadd.f32 %v6704_v25, %v7512_v56  ;;  %v2463_v56 = vpop.xlane.xlu1 %2462  ;;  %v5128_v53 = vpack.c.bf16 %v3482_v16, %v3481_v41  ;;  %v3513_v41 = vld [vmem:[%s8128_s1 + $0x130] sm:$0xff]  ;;  %v3514_v16 = vld [vmem:[%s8128_s1 + $0x138] sm:$0xff] }
 0x28d   :  { %v2448_v13 = vpop.xlane.xlu0 %2447  ;;  %v2593_v35 = vadd.f32 %v6704_v25, %v2463_v56  ;;  %v3493_v56 = vld [vmem:[%s8128_s1 + $0x90] sm:$0xff] }
 0x28e   :  { %v3352_v42 = vsel %vm2784_vm11, %v3351_v21, %v3347_v44  ;;  %v2588_v32 = vadd.f32 %v6704_v25, %v2448_v13  ;;  %v3302_v17 = vrot.slane %v2576_v33, %v6991_v10  ;;  %v3484_v21 = vld [vmem:[%s8128_s1 + $0x48] sm:$0xff]  ;;  %v3486_v44 = vld [vmem:[%s8128_s1 + $0x58] sm:$0xff]  ;;  %vm8149_vm11 = vcmask 1044484  }
 0x28f   :  { %v3357_v5 = vsel %vm2791_vm12, %v3356_v57, %v3352_v42  ;;  %v3386_v39 = vrot.slane %v2593_v35, %v6985_v15  ;;  %v3476_v15 = vld [vmem:[%s8128_s1 + $0x8] sm:$0xff]  ;;  %v5131_v36 = vpack.c.bf16 %v3484_v21, %v3483_v19  ;;  %v5134_v13 = vpack.c.bf16 %v3486_v44, %v3485_v2  ;;  %v3498_v35 = vld [vmem:[%s8128_s1 + $0xb8] sm:$0xff]  ;;  %v3519_v2 = vld [vmem:[%s8128_s1 + $0x160] sm:$0xff] }
 0x290   :  { %v3361_v29 = vrot.slane %v2588_v32, %v6816_v1  ;;  %v3298_v1 = vsel %vm2819_vm1, %v3297_v18, %v3293_v60  ;;  %v5137_v42 = vpack.c.bf16 %v3488_v54, %v3487_v31  ;;  %v3489_v32 = vld [vmem:[%s8128_s1 + $0x70] sm:$0xff]  ;;  %v3491_v60 = vld [vmem:[%s8128_s1 + $0x80] sm:$0xff]  ;;  %v3518_v19 = vld [vmem:[%s8128_s1 + $0x158] sm:$0xff]  ;;  %vm8150_vm12 = vcmask 1045509  }
 0x291   :  { %v2457_v51 = vpop.xlane.xlu0 %2456  ;;  %v3303_v59 = vsel %vm2826_vm2, %v3302_v17, %v3298_v1  ;;  %v5140_v33 = vpack.c.bf16 %v3490_v38, %v3489_v32  ;;  %v3496_v1 = vld [vmem:[%s8128_s1 + $0xa8] sm:$0xff]  ;;  %v3522_v31 = vld [vmem:[%s8128_s1 + $0x178] sm:$0xff] }
 0x292   :  { %v3362_v45 = vsel %vm2798_vm13, %v3361_v29, %v3357_v5  ;;  %v2591_v6 = vadd.f32 %v6704_v25, %v2457_v51  ;;  %v3308_v63 = vsel %vm2833_vm0, %v3307_v26, %v3303_v59  ;;  %v3501_v59 = vld [vmem:[%s8128_s1 + $0xd0] sm:$0xff]  ;;  %v3524_v32 = vld [vmem:[%s8128_s1 + $0x188] sm:$0xff] }
 0x293   :  { %v3367_v40 = vsel %vm2805_vm14, %v3366_v0, %v3362_v45  ;;  %v3399_v52 = vsel %vm3398_vm5, %v3308_v63, %v7496_v37  ;;  %v3478_v37 = vld [vmem:[%s8128_s1 + $0x18] sm:$0xff]  ;;  %v3492_v0 = vld [vmem:[%s8128_s1 + $0x88] sm:$0xff]  ;;  %v5158_v63 = vpack.c.bf16 %v3502_v9, %v3501_v59  ;;  %v3539_v59 = vld [vmem:[%s8128_s1 + $0x200] sm:$0xff] }
 0x294   :  { %v3376_v24 = vrot.slane %v2591_v6, %v6824_v11  ;;  %v3372_v47 = vsel %vm2812_vm15, %v3371_v61, %v3367_v40  ;;  %v5122_v22 = vpack.c.bf16 %v3478_v37, %v3477_v48  ;;  %v5143_v18 = vpack.c.bf16 %v3492_v0, %v3491_v60  ;;  %v3494_v6 = vld [vmem:[%s8128_s1 + $0x98] sm:$0xff]  ;;  %v3495_v40 = vld [vmem:[%s8128_s1 + $0xa0] sm:$0xff]  ;;  %v3497_v61 = vld [vmem:[%s8128_s1 + $0xb0] sm:$0xff] }
 0x295   :  { %v2460_v34 = vpop.xlane.xlu0 %2459  ;;  %v5146_v17 = vpack.c.bf16 %v3494_v6, %v3493_v56  ;;  %v5149_v26 = vpack.c.bf16 %v3496_v1, %v3495_v40  ;;  %v3510_v37 = vld [vmem:[%s8128_s1 + $0x118] sm:$0xff]  ;;  %v3527_v60 = vld [vmem:[%s8128_s1 + $0x1a0] sm:$0xff]  ;;  %v3528_v0 = vld [vmem:[%s8128_s1 + $0x1a8] sm:$0xff] }
 0x296   :  { %v2592_v14 = vadd.f32 %v6704_v25, %v2460_v34  ;;  %v3377_v11 = vsel %vm2819_vm1, %v3376_v24, %v3372_v47  ;;  %v5152_v24 = vpack.c.bf16 %v3498_v35, %v3497_v61  ;;  %v3499_v34 = vld [vmem:[%s8128_s1 + $0xc0] sm:$0xff]  ;;  %v3500_v47 = vld [vmem:[%s8128_s1 + $0xc8] sm:$0xff]  ;;  %v3533_v40 = vld [vmem:[%s8128_s1 + $0x1d0] sm:$0xff] }
 0x297   :  { %v3531_v56 = vld [vmem:[%s8128_s1 + $0x1c0] sm:$0xff]  ;;  %v3532_v6 = vld [vmem:[%s8128_s1 + $0x1c8] sm:$0xff]  ;;  %v3534_v1 = vld [vmem:[%s8128_s1 + $0x1d8] sm:$0xff] }
 0x298   :  { %v3381_v43 = vrot.slane %v2592_v14, %v6991_v10  ;;  %v3475_v10 = vld [vmem:[%s8128_s1] sm:$0xff]  ;;  %v5155_v14 = vpack.c.bf16 %v3500_v47, %v3499_v34  ;;  %v3536_v35 = vld [vmem:[%s8128_s1 + $0x1e8] sm:$0xff]  ;;  %v3537_v34 = vld [vmem:[%s8128_s1 + $0x1f0] sm:$0xff] }
 0x299   :  { %v5119_v30 = vpack.c.bf16 %v3476_v15, %v3475_v10  ;;  %v3508_v10 = vld [vmem:[%s8128_s1 + $0x108] sm:$0xff]  ;;  %v3535_v61 = vld [vmem:[%s8128_s1 + $0x1e0] sm:$0xff]  ;;  %v3538_v47 = vld [vmem:[%s8128_s1 + $0x1f8] sm:$0xff] }
 0x29a   :  { %v3382_v58 = vsel %vm2826_vm2, %v3381_v43, %v3377_v11  ;;  %v3503_v43 = vld [vmem:[%s8128_s1 + $0xe0] sm:$0xff]  ;;  %v3540_v9 = vld [vmem:[%s8128_s1 + $0x208] sm:$0xff] }
 0x29b   :  { %v3387_v25 = vsel %vm2833_vm0, %v3386_v39, %v3382_v58  ;;  %5120 = vmatpush3.bf16.msra.mxu1 %v5119_v30  ;;  %vm8146_vm0 = vmmov 0   ;;  %v3504_v39 = vld [vmem:[%s8128_s1 + $0xe8] sm:$0xff]  ;;  %v3505_v58 = vld [vmem:[%s8128_s1 + $0xf0] sm:$0xff] }
 0x29c   :  { %v3401_v12 = vsel %vm3400_vm6, %v3387_v25, %v3399_v52  ;;  %5121 = vmatprep.subr.bf16.mxu1 %v5576_v3  ;;  %v5161_v11 = vpack.c.bf16 %v3504_v39, %v3503_v43  ;;  %v3506_v25 = vld [vmem:[%s8128_s1 + $0xf8] sm:$0xff]  ;;  %v3509_v30 = vld [vmem:[%s8128_s1 + $0x110] sm:$0xff] }
 0x29d   :  { %v3403_v46 = vsel %vm2595_vm7, %v3401_v12, -inf  ;;  %v5164_v52 = vpack.c.bf16 %v3506_v25, %v3505_v58  ;;  %v3541_v39 = vld [vmem:[%s8128_s1 + $0x210] sm:$0xff]  ;;  %v3543_v25 = vld [vmem:[%s8128_s1 + $0x220] sm:$0xff] }
 0x29e   :  { %3404 = vmax.xlane.f32.xlu0 %v3403_v46 }
 0x29f   :  { %5123 = vmatpush3.bf16.msra.mxu1 %v5122_v22  ;;  %v5170_v22 = vpack.c.bf16 %v3510_v37, %v3509_v30  ;;  %v3548_v30 = vld [vmem:[%s8128_s1 + $0x248] sm:$0xff] }
 0x2a0   :  { %5124 = vmatprep.subr.bf16.mxu1 %v5576_v3 }
 0x2a3   :  { %5126 = vmatpush3.bf16.msra.mxu1 %v5125_v49  ;;  %v5173_v49 = vpack.c.bf16 %v3512_v50, %v3511_v7  ;;  %v3550_v7 = vld [vmem:[%s8128_s1 + $0x258] sm:$0xff] }
 0x2a4   :  { %5127 = vmatprep.subr.bf16.mxu1 %v5576_v3 }
 0x2a7   :  { %5129 = vmatpush3.bf16.msra.mxu1 %v5128_v53  ;;  %v5176_v53 = vpack.c.bf16 %v3514_v16, %v3513_v41  ;;  %v3552_v41 = vld [vmem:[%s8128_s1 + $0x268] sm:$0xff] }
 0x2a8   :  { %5130 = vmatprep.subr.bf16.mxu1 %v5576_v3 }
 0x2ab   :  { %5132 = vmatpush3.bf16.msra.mxu1 %v5131_v36  ;;  %v3520_v36 = vld [vmem:[%s8128_s1 + $0x168] sm:$0xff] }
 0x2ac   :  { %5133 = vmatprep.subr.bf16.mxu1 %v5576_v3  ;;  %v5185_v44 = vpack.c.bf16 %v3520_v36, %v3519_v2 }
 0x2af   :  { %5135 = vmatpush3.bf16.msra.mxu1 %v5134_v13  ;;  %v3521_v13 = vld [vmem:[%s8128_s1 + $0x170] sm:$0xff] }
 0x2b0   :  { %5136 = vmatprep.subr.bf16.mxu1 %v5576_v3  ;;  %v5188_v54 = vpack.c.bf16 %v3522_v31, %v3521_v13  ;;  %v3559_v31 = vld [vmem:[%s8128_s1 + $0x2a0] sm:$0xff] }
 0x2b3   :  { %5138 = vmatpush3.bf16.msra.mxu1 %v5137_v42  ;;  %v3523_v42 = vld [vmem:[%s8128_s1 + $0x180] sm:$0xff] }
 0x2b4   :  { %5139 = vmatprep.subr.bf16.mxu1 %v5576_v3  ;;  %v5191_v38 = vpack.c.bf16 %v3524_v32, %v3523_v42  ;;  %v3561_v32 = vld [vmem:[%s8128_s1 + $0x2b0] sm:$0xff] }
 0x2b7   :  { %5141 = vmatpush3.bf16.msra.mxu1 %v5140_v33 }
 0x2b8   :  { %5142 = vmatprep.subr.bf16.mxu1 %v5576_v3 }
 0x32b   :  { %v3405_v28 = vpop.xlane.xlu0 %3404 }
 0x32c   :  { %v3406_v55 = vsub.f32 %v3403_v46, %v3405_v28  ;;  %v3507_v46 = vld [vmem:[%s8128_s1 + $0x100] sm:$0xff] }
 0x32d   :  { %v5167_v15 = vpack.c.bf16 %v3508_v10, %v3507_v46  ;;  %v3515_v28 = vld [vmem:[%s8128_s1 + $0x140] sm:$0xff]  ;;  %v3545_v46 = vld [vmem:[%s8128_s1 + $0x230] sm:$0xff]  ;;  %v3546_v10 = vld [vmem:[%s8128_s1 + $0x238] sm:$0xff] }
 0x32e   :  { %v3407_v20 = vmul.f32 1.442695, %v3406_v55  ;;  %v3516_v55 = vld [vmem:[%s8128_s1 + $0x148] sm:$0xff] }
 0x330   :  { %5570 = vpow2.f32 %v3407_v20  ;;  %v5179_v20 = vpack.c.bf16 %v3516_v55, %v3515_v28  ;;  %v3554_v28 = vld [vmem:[%s8128_s1 + $0x278] sm:$0xff] }
 0x33a   :  { %v5571_v23 = vpop.eup %5570 }
 0x33b   :  { %3409 = vadd.xlane.f32.xlu1 %v5571_v23 }
 0x3c8   :  { %v3410_v57 = vpop.xlane.xlu1 %3409 }
 0x3c9   :  { %5572 = vrcp.f32 %v3410_v57  ;;  %v3525_v57 = vld [vmem:[%s8128_s1 + $0x190] sm:$0xff] }
 0x3d3   :  { %v5573_v27 = vpop.eup %5572 }
 0x3d4   :  { %v7666_v29 = vmul.f32 %v5573_v27, %v5571_v23  ;;  %v3517_v23 = vld [vmem:[%s8128_s1 + $0x150] sm:$0xff]  ;;  %v3526_v27 = vld [vmem:[%s8128_s1 + $0x198] sm:$0xff] }
 0x3d5   :  { %v5182_v21 = vpack.c.bf16 %v3518_v19, %v3517_v23  ;;  %v3555_v19 = vld [vmem:[%s8128_s1 + $0x280] sm:$0xff] }
 0x3d6   :  { %3413 = vst [vmem:[%s8130_s11] sm:$0xff] %v7666_v29  ;;  %v3415_v5 = vadd.f32 %v3414_v8, %v7666_v29  ;;  %v3425_v51 = vrot.slane %v7666_v29, %v6091_v62  ;;  %v5194_v8 = vpack.c.bf16 %v3526_v27, %v3525_v57  ;;  %v3418_v55 = vcombine.high %v7666_v29, %v7666_v29  ;;  %v3557_v29 = vld [vmem:[%s8128_s1 + $0x290] sm:$0xff]  ;;  %v3563_v57 = vld [vmem:[%s8128_s1 + $0x2c0] sm:$0xff]  ;;  %v3564_v27 = vld [vmem:[%s8128_s1 + $0x2c8] sm:$0xff] }
 0x3d8   :  { %3416 = vst [vmem:[%s8131_s12] sm:$0xff] %v3415_v5  ;;  %v7685_v45 = vrot.slane %v3425_v51, %v6091_v62  ;;  %v3433_v12 = vcombine.high %v3425_v51, %v3425_v51  ;;  %v5197_v5 = vpack.c.bf16 %v3528_v0, %v3527_v60  ;;  %v3529_v51 = vld [vmem:[%s8128_s1 + $0x1b0] sm:$0xff]  ;;  %v3432_v23 = vrot.slane %v3418_v55, %v6091_v62  ;;  %v3566_v0 = vld [vmem:[%s8128_s1 + $0x2d8] sm:$0xff]  ;;  %v3592_v55 = vld [vmem:[%s8128_s1 + $0x3a8] sm:$0xff] }
 0x3d9   :  { %v3565_v60 = vld [vmem:[%s8128_s1 + $0x2d0] sm:$0xff] }
 0x3da   :  { %4852 = vmatmul.mubr.f32.vlgmr.msra.gmra.mrb[2].mxu1 %v7685_v45  ;;  %v7746_v48 = vrot.slane %v3433_v12, %v6091_v62  ;;  %v3463_v33 = vcombine.high %v7685_v45, %v7685_v45  ;;  %v7931_v36 = vrot.slane %v3432_v23, %v6091_v62 }
 0x3db   :  { %5144 = vmatpush3.bf16.msra.mxu1 %v5143_v18  ;;  %4886 = vmatprep.mubr.msk.f32.mxu1 %vm8146_vm0, %v5578_v4  ;;  %v3530_v18 = vld [vmem:[%s8128_s1 + $0x1b8] sm:$0xff] }
 0x3dc   :  { %5145 = vmatprep.subr.bf16.mxu1 %v5576_v3  ;;  %v5200_v45 = vpack.c.bf16 %v3530_v18, %v3529_v51  ;;  %v3465_v43 = vcombine.high %v7746_v48, %v7746_v48  ;;  %v3567_v51 = vld [vmem:[%s8128_s1 + $0x2e0] sm:$0xff]  ;;  %v3568_v18 = vld [vmem:[%s8128_s1 + $0x2e8] sm:$0xff] }
 0x3df   :  { %5147 = vmatpush3.bf16.msra.mxu1 %v5146_v17  ;;  %v5203_v17 = vpack.c.bf16 %v3532_v6, %v3531_v56  ;;  %v3569_v56 = vld [vmem:[%s8128_s1 + $0x2f0] sm:$0xff]  ;;  %v3570_v6 = vld [vmem:[%s8128_s1 + $0x2f8] sm:$0xff] }
 0x3e0   :  { %5148 = vmatprep.subr.bf16.mxu1 %v5576_v3 }
 0x3e3   :  { %5150 = vmatpush3.bf16.msra.mxu1 %v5149_v26  ;;  %v5206_v26 = vpack.c.bf16 %v3534_v1, %v3533_v40  ;;  %v3434_v40 = vcombine.high %v3432_v23, %v3432_v23  ;;  %v3571_v1 = vld [vmem:[%s8128_s1 + $0x300] sm:$0xff]  ;;  %v3593_v23 = vld [vmem:[%s8128_s1 + $0x3b0] sm:$0xff] }
 0x3e4   :  { %5151 = vmatprep.subr.bf16.mxu1 %v5576_v3 }
 0x3e7   :  { %5153 = vmatpush3.bf16.msra.mxu1 %v5152_v24  ;;  %v5209_v24 = vpack.c.bf16 %v3536_v35, %v3535_v61  ;;  %v7993_v35 = vrot.slane %v3434_v40, %v6091_v62  ;;  %v3575_v62 = vld [vmem:[%s8128_s1 + $0x320] sm:$0xff] }
 0x3e8   :  { %5154 = vmatprep.subr.bf16.mxu1 %v5576_v3 }
 0x3eb   :  { %5156 = vmatpush3.bf16.msra.mxu1 %v5155_v14  ;;  %v5212_v14 = vpack.c.bf16 %v3538_v47, %v3537_v34  ;;  %v3574_v34 = vld [vmem:[%s8128_s1 + $0x318] sm:$0xff] }
 0x3ec   :  { %5157 = vmatprep.subr.bf16.mxu1 %v5576_v3 }
 0x3ef   :  { %5159 = vmatpush3.bf16.msra.mxu1 %v5158_v63  ;;  %v5215_v63 = vpack.c.bf16 %v3540_v9, %v3539_v59  ;;  %v3577_v9 = vld [vmem:[%s8128_s1 + $0x330] sm:$0xff] }
 0x3f0   :  { %5160 = vmatprep.subr.bf16.mxu1 %v5576_v3 }
 0x3f3   :  { %5162 = vmatpush3.bf16.msra.mxu1 %v5161_v11  ;;  %v3542_v11 = vld [vmem:[%s8128_s1 + $0x218] sm:$0xff] }
 0x3f4   :  { %5163 = vmatprep.subr.bf16.mxu1 %v5576_v3  ;;  %v5218_v58 = vpack.c.bf16 %v3542_v11, %v3541_v39  ;;  %v3579_v39 = vld [vmem:[%s8128_s1 + $0x340] sm:$0xff]  ;;  %v3580_v11 = vld [vmem:[%s8128_s1 + $0x348] sm:$0xff] }
 0x3f7   :  { %5165 = vmatpush3.bf16.msra.mxu1 %v5164_v52  ;;  %v3544_v52 = vld [vmem:[%s8128_s1 + $0x228] sm:$0xff] }
 0x3f8   :  { %5166 = vmatprep.subr.bf16.mxu1 %v5576_v3  ;;  %v5221_v12 = vpack.c.bf16 %v3544_v52, %v3543_v25  ;;  %v3581_v25 = vld [vmem:[%s8128_s1 + $0x350] sm:$0xff]  ;;  %v3582_v52 = vld [vmem:[%s8128_s1 + $0x358] sm:$0xff] }
 0x3fa   :  { %4887 = vmatmul.mubr.f32.vlgmr.msra.gmra.mrb[4].mxu1 %v7746_v48  ;;  %v3547_v48 = vld [vmem:[%s8128_s1 + $0x240] sm:$0xff] }
 0x3fb   :  { %5168 = vmatpush3.bf16.msra.mxu1 %v5167_v15  ;;  %4921 = vmatprep.mubr.msk.f32.mxu1 %vm8146_vm0, %v5578_v4  ;;  %v5224_v15 = vpack.c.bf16 %v3546_v10, %v3545_v46  ;;  %v5227_v37 = vpack.c.bf16 %v3548_v30, %v3547_v48  ;;  %v3583_v46 = vld [vmem:[%s8128_s1 + $0x360] sm:$0xff]  ;;  %v3584_v10 = vld [vmem:[%s8128_s1 + $0x368] sm:$0xff]  ;;  %v3585_v48 = vld [vmem:[%s8128_s1 + $0x370] sm:$0xff] }
 0x3fc   :  { %5169 = vmatprep.subr.bf16.mxu1 %v5576_v3  ;;  %v3586_v30 = vld [vmem:[%s8128_s1 + $0x378] sm:$0xff] }
 0x3ff   :  { %5171 = vmatpush3.bf16.msra.mxu1 %v5170_v22  ;;  %v3549_v22 = vld [vmem:[%s8128_s1 + $0x250] sm:$0xff] }
 0x400   :  { %5172 = vmatprep.subr.bf16.mxu1 %v5576_v3  ;;  %v5230_v50 = vpack.c.bf16 %v3550_v7, %v3549_v22  ;;  %v3587_v22 = vld [vmem:[%s8128_s1 + $0x380] sm:$0xff]  ;;  %v3588_v7 = vld [vmem:[%s8128_s1 + $0x388] sm:$0xff] }
 0x403   :  { %5174 = vmatpush3.bf16.msra.mxu1 %v5173_v49  ;;  %v3551_v49 = vld [vmem:[%s8128_s1 + $0x260] sm:$0xff] }
 0x404   :  { %5175 = vmatprep.subr.bf16.mxu1 %v5576_v3  ;;  %v5233_v16 = vpack.c.bf16 %v3552_v41, %v3551_v49  ;;  %v3464_v49 = vcombine.high %v7931_v36, %v7931_v36  ;;  %v3589_v41 = vld [vmem:[%s8128_s1 + $0x390] sm:$0xff] }
 0x407   :  { %5177 = vmatpush3.bf16.msra.mxu1 %v5176_v53  ;;  %v3553_v53 = vld [vmem:[%s8128_s1 + $0x270] sm:$0xff] }
 0x408   :  { %5178 = vmatprep.subr.bf16.mxu1 %v5576_v3 }
 0x40b   :  { %5180 = vmatpush3.bf16.msra.mxu1 %v5179_v20  ;;  %v5236_v20 = vpack.c.bf16 %v3554_v28, %v3553_v53  ;;  %v3591_v28 = vld [vmem:[%s8128_s1 + $0x3a0] sm:$0xff] }
 0x40c   :  { %5181 = vmatprep.subr.bf16.mxu1 %v5576_v3 }
 0x40f   :  { %5183 = vmatpush3.bf16.msra.mxu1 %v5182_v21  ;;  %v3556_v21 = vld [vmem:[%s8128_s1 + $0x288] sm:$0xff] }
 0x410   :  { %5184 = vmatprep.subr.bf16.mxu1 %v5576_v3  ;;  %v5239_v2 = vpack.c.bf16 %v3556_v21, %v3555_v19  ;;  %v3595_v21 = vld [vmem:[%s8128_s1 + $0x3c0] sm:$0xff] }
 0x413   :  { %5186 = vmatpush3.bf16.msra.mxu1 %v5185_v44  ;;  %v3558_v44 = vld [vmem:[%s8128_s1 + $0x298] sm:$0xff] }
 0x414   :  { %5187 = vmatprep.subr.bf16.mxu1 %v5576_v3  ;;  %v5242_v13 = vpack.c.bf16 %v3558_v44, %v3557_v29  ;;  %v3597_v29 = vld [vmem:[%s8128_s1 + $0x3d0] sm:$0xff]  ;;  %v3598_v44 = vld [vmem:[%s8128_s1 + $0x3d8] sm:$0xff] }
 0x417   :  { %5189 = vmatpush3.bf16.msra.mxu1 %v5188_v54  ;;  %v3560_v54 = vld [vmem:[%s8128_s1 + $0x2a8] sm:$0xff] }
 0x418   :  { %5190 = vmatprep.subr.bf16.mxu1 %v5576_v3  ;;  %v5245_v42 = vpack.c.bf16 %v3560_v54, %v3559_v31  ;;  %v3599_v31 = vld [vmem:[%s8128_s1 + $0x3e0] sm:$0xff]  ;;  %v3600_v54 = vld [vmem:[%s8128_s1 + $0x3e8] sm:$0xff] }
 0x41a   :  { %4922 = vmatmul.mubr.f32.vlgmr.msra.gmra.mrb[6].mxu1 %v3463_v33 }
 0x41b   :  { %5192 = vmatpush3.bf16.msra.mxu1 %v5191_v38  ;;  %4956 = vmatprep.mubr.msk.f32.mxu1 %vm8146_vm0, %v5578_v4  ;;  %v3562_v38 = vld [vmem:[%s8128_s1 + $0x2b8] sm:$0xff] }
 0x41c   :  { %5193 = vmatprep.subr.bf16.mxu1 %v5576_v3  ;;  %v5248_v33 = vpack.c.bf16 %v3562_v38, %v3561_v32  ;;  %v5305_v38 = vpack.c.bf16 %v3600_v54, %v3599_v31 }
 0x41f   :  { %5195 = vmatpush3.bf16.msra.mxu1 %v5194_v8  ;;  %v5251_v8 = vpack.c.bf16 %v3564_v27, %v3563_v57  ;;  %v3602_v57 = vld [vmem:[%s8128_s1 + $0x3f8] sm:$0xff] }
 0x420   :  { %5196 = vmatprep.subr.bf16.mxu1 %v5576_v3 }
 0x423   :  { %5198 = vmatpush3.bf16.msra.mxu1 %v5197_v5  ;;  %v5254_v5 = vpack.c.bf16 %v3566_v0, %v3565_v60 }
 0x424   :  { %5199 = vmatprep.subr.bf16.mxu1 %v5576_v3 }
 0x427   :  { %5201 = vmatpush3.bf16.msra.mxu1 %v5200_v45  ;;  %v5257_v45 = vpack.c.bf16 %v3568_v18, %v3567_v51 }
 0x428   :  { %5202 = vmatprep.subr.bf16.mxu1 %v5576_v3 }
 0x42b   :  { %5204 = vmatpush3.bf16.msra.mxu1 %v5203_v17  ;;  %v5260_v17 = vpack.c.bf16 %v3570_v6, %v3569_v56 }
 0x42c   :  { %5205 = vmatprep.subr.bf16.mxu1 %v5576_v3 }
 0x42f   :  { %5207 = vmatpush3.bf16.msra.mxu1 %v5206_v26  ;;  %v3572_v26 = vld [vmem:[%s8128_s1 + $0x308] sm:$0xff] }
 0x430   :  { %5208 = vmatprep.subr.bf16.mxu1 %v5576_v3  ;;  %v5263_v61 = vpack.c.bf16 %v3572_v26, %v3571_v1 }
 0x433   :  { %5210 = vmatpush3.bf16.msra.mxu1 %v5209_v24  ;;  %v3573_v24 = vld [vmem:[%s8128_s1 + $0x310] sm:$0xff] }
 0x434   :  { %5211 = vmatprep.subr.bf16.mxu1 %v5576_v3  ;;  %v5266_v47 = vpack.c.bf16 %v3574_v34, %v3573_v24 }
 0x437   :  { %5213 = vmatpush3.bf16.msra.mxu1 %v5212_v14  ;;  %v3576_v14 = vld [vmem:[%s8128_s1 + $0x328] sm:$0xff] }
 0x438   :  { %5214 = vmatprep.subr.bf16.mxu1 %v5576_v3  ;;  %v5269_v59 = vpack.c.bf16 %v3576_v14, %v3575_v62 }
 0x43a   :  { %4957 = vmatmul.mubr.f32.vlgmr.msra.gmra.mrb[8].mxu1 %v3465_v43 }
 0x43b   :  { %5216 = vmatpush3.bf16.msra.mxu1 %v5215_v63  ;;  %4991 = vmatprep.mubr.msk.f32.mxu1 %vm8146_vm0, %v5578_v4  ;;  %v3578_v63 = vld [vmem:[%s8128_s1 + $0x338] sm:$0xff] }
 0x43c   :  { %5217 = vmatprep.subr.bf16.mxu1 %v5576_v3  ;;  %v5272_v43 = vpack.c.bf16 %v3578_v63, %v3577_v9 }
 0x43f   :  { %5219 = vmatpush3.bf16.msra.mxu1 %v5218_v58  ;;  %v5275_v58 = vpack.c.bf16 %v3580_v11, %v3579_v39 }
 0x440   :  { %5220 = vmatprep.subr.bf16.mxu1 %v5576_v3 }
 0x443   :  { %5222 = vmatpush3.bf16.msra.mxu1 %v5221_v12  ;;  %v5278_v12 = vpack.c.bf16 %v3582_v52, %v3581_v25 }
 0x444   :  { %5223 = vmatprep.subr.bf16.mxu1 %v5576_v3 }
 0x447   :  { %5225 = vmatpush3.bf16.msra.mxu1 %v5224_v15  ;;  %v5281_v15 = vpack.c.bf16 %v3584_v10, %v3583_v46 }
 0x448   :  { %5226 = vmatprep.subr.bf16.mxu1 %v5576_v3 }
 0x44b   :  { %5228 = vmatpush3.bf16.msra.mxu1 %v5227_v37  ;;  %v5284_v37 = vpack.c.bf16 %v3586_v30, %v3585_v48 }
 0x44c   :  { %5229 = vmatprep.subr.bf16.mxu1 %v5576_v3 }
 0x44f   :  { %5231 = vmatpush3.bf16.msra.mxu1 %v5230_v50  ;;  %v5287_v50 = vpack.c.bf16 %v3588_v7, %v3587_v22 }
 0x450   :  { %5232 = vmatprep.subr.bf16.mxu1 %v5576_v3 }
 0x453   :  { %5234 = vmatpush3.bf16.msra.mxu1 %v5233_v16  ;;  %v3590_v16 = vld [vmem:[%s8128_s1 + $0x398] sm:$0xff] }
 0x454   :  { %5235 = vmatprep.subr.bf16.mxu1 %v5576_v3  ;;  %v5290_v53 = vpack.c.bf16 %v3590_v16, %v3589_v41 }
 0x457   :  { %5237 = vmatpush3.bf16.msra.mxu1 %v5236_v20  ;;  %v5293_v20 = vpack.c.bf16 %v3592_v55, %v3591_v28 }
 0x458   :  { %5238 = vmatprep.subr.bf16.mxu1 %v5576_v3 }
 0x45a   :  { %4992 = vmatmul.mubr.f32.vlgmr.msra.gmra.mrb[10].mxu1 %v7931_v36 }
 0x45b   :  { %5240 = vmatpush3.bf16.msra.mxu1 %v5239_v2  ;;  %5026 = vmatprep.mubr.msk.f32.mxu1 %vm8146_vm0, %v5578_v4  ;;  %v3596_v2 = vld [vmem:[%s8128_s1 + $0x3c8] sm:$0xff] }
 0x45c   :  { %5241 = vmatprep.subr.bf16.mxu1 %v5576_v3  ;;  %v5299_v36 = vpack.c.bf16 %v3596_v2, %v3595_v21 }
 0x45f   :  { %5243 = vmatpush3.bf16.msra.mxu1 %v5242_v13  ;;  %v5302_v13 = vpack.c.bf16 %v3598_v44, %v3597_v29 }
 0x460   :  { %5244 = vmatprep.subr.bf16.mxu1 %v5576_v3 }
 0x463   :  { %5246 = vmatpush3.bf16.msra.mxu1 %v5245_v42 }
 0x464   :  { %5247 = vmatprep.subr.bf16.mxu1 %v5576_v3 }
 0x467   :  { %5249 = vmatpush3.bf16.msra.mxu1 %v5248_v33  ;;  %v3601_v33 = vld [vmem:[%s8128_s1 + $0x3f0] sm:$0xff] }
 0x468   :  { %5250 = vmatprep.subr.bf16.mxu1 %v5576_v3  ;;  %v5308_v27 = vpack.c.bf16 %v3602_v57, %v3601_v33 }
 0x46b   :  { %5252 = vmatpush3.bf16.msra.mxu1 %v5251_v8  ;;  %v3466_v8 = vcombine.high %v7993_v35, %v7993_v35 }
 0x46c   :  { %5253 = vmatprep.subr.bf16.mxu1 %v5576_v3 }
 0x46f   :  { %5255 = vmatpush3.bf16.msra.mxu1 %v5254_v5 }
 0x470   :  { %5256 = vmatprep.subr.bf16.mxu1 %v5576_v3 }
 0x473   :  { %5258 = vmatpush3.bf16.msra.mxu1 %v5257_v45 }
 0x474   :  { %5259 = vmatprep.subr.bf16.mxu1 %v5576_v3 }
 0x477   :  { %5261 = vmatpush3.bf16.msra.mxu1 %v5260_v17 }
 0x478   :  { %5262 = vmatprep.subr.bf16.mxu1 %v5576_v3 }
 0x47a   :  { %5027 = vmatmul.mubr.f32.vlgmr.msra.gmra.mrb[12].mxu1 %v7993_v35 }
 0x47b   :  { %5264 = vmatpush3.bf16.msra.mxu1 %v5263_v61  ;;  %5061 = vmatprep.mubr.msk.f32.mxu1 %vm8146_vm0, %v5578_v4 }
 0x47c   :  { %5265 = vmatprep.subr.bf16.mxu1 %v5576_v3 }
 0x47f   :  { %5267 = vmatpush3.bf16.msra.mxu1 %v5266_v47 }
 0x480   :  { %5268 = vmatprep.subr.bf16.mxu1 %v5576_v3 }
 0x483   :  { %5270 = vmatpush3.bf16.msra.mxu1 %v5269_v59 }
 0x484   :  { %5271 = vmatprep.subr.bf16.mxu1 %v5576_v3 }
 0x487   :  { %5273 = vmatpush3.bf16.msra.mxu1 %v5272_v43 }
 0x488   :  { %5274 = vmatprep.subr.bf16.mxu1 %v5576_v3 }
 0x48b   :  { %5276 = vmatpush3.bf16.msra.mxu1 %v5275_v58 }
 0x48c   :  { %5277 = vmatprep.subr.bf16.mxu1 %v5576_v3 }
 0x48f   :  { %5279 = vmatpush3.bf16.msra.mxu1 %v5278_v12 }
 0x490   :  { %5280 = vmatprep.subr.bf16.mxu1 %v5576_v3 }
 0x493   :  { %5282 = vmatpush3.bf16.msra.mxu1 %v5281_v15 }
 0x494   :  { %5283 = vmatprep.subr.bf16.mxu1 %v5576_v3 }
 0x497   :  { %5285 = vmatpush3.bf16.msra.mxu1 %v5284_v37 }
 0x498   :  { %5286 = vmatprep.subr.bf16.mxu1 %v5576_v3 }
 0x49a   :  { %5062 = vmatmul.mubr.f32.vlgmr.msra.gmra.mrb[14].mxu1 %v3464_v49 }
 0x49b   :  { %5288 = vmatpush3.bf16.msra.mxu1 %v5287_v50  ;;  %5096 = vmatprep.mubr.msk.f32.mxu1 %vm8146_vm0, %v5578_v4  ;;  %v3594_v4 = vld [vmem:[%s8128_s1 + $0x3b8] sm:$0xff] }
 0x49c   :  { %5289 = vmatprep.subr.bf16.mxu1 %v5576_v3  ;;  %v5296_v19 = vpack.c.bf16 %v3594_v4, %v3593_v23 }
 0x49f   :  { %5291 = vmatpush3.bf16.msra.mxu1 %v5290_v53 }
 0x4a0   :  { %5292 = vmatprep.subr.bf16.mxu1 %v5576_v3 }
 0x4a3   :  { %5294 = vmatpush3.bf16.msra.mxu1 %v5293_v20 }
 0x4a4   :  { %5295 = vmatprep.subr.bf16.mxu1 %v5576_v3 }
 0x4a7   :  { %5297 = vmatpush3.bf16.msra.mxu1 %v5296_v19 }
 0x4a8   :  { %5298 = vmatprep.subr.bf16.mxu1 %v5576_v3 }
 0x4ab   :  { %5300 = vmatpush3.bf16.msra.mxu1 %v5299_v36 }
 0x4ac   :  { %5301 = vmatprep.subr.bf16.mxu1 %v5576_v3 }
 0x4ad   :  { %v3669_v42 = vpop.f32.mrb[2].mxu1 }
 0x4ae   :  { %v4853_v32 = vpop.f32.mrb[3].mxu1 }
 0x4af   :  { %5303 = vmatpush3.bf16.msra.mxu1 %v5302_v13 }
 0x4b0   :  { %5304 = vmatprep.subr.bf16.mxu1 %v5576_v3 }
 0x4b3   :  { %5306 = vmatpush3.bf16.msra.mxu1 %v5305_v38 }
 0x4b4   :  { %5307 = vmatprep.subr.bf16.mxu1 %v5576_v3 }
 0x4b7   :  { %5309 = vmatpush3.bf16.msra.mxu1 %v5308_v27 }
 0x4ba   :  { %5097 = vmatmul.mubr.f32.vlgmr.msra.gmra.mrb[16].mxu1 %v3466_v8 }
 0x4cd   :  { %v3739_v60 = vpop.f32.mrb[4].mxu1 }
 0x4ce   :  { %v4171_v0 = vrot.slane %v3739_v60, 7  ;;  %v4888_v5 = vpop.f32.mrb[5].mxu1 }
 0x4d0   :  { %v4172_v51 = vsel %vm8147_vm9, %v4171_v0, %v3669_v42 }
 0x4ed   :  { %v3809_v18 = vpop.f32.mrb[6].mxu1 }
 0x4ee   :  { %v4173_v45 = vrot.slane %v3809_v18, 6  ;;  %v4923_v56 = vpop.f32.mrb[7].mxu1 }
 0x4f0   :  { %v4174_v6 = vsel %vm3390_vm8, %v4173_v45, %v4172_v51 }
 0x50d   :  { %v3879_v17 = vpop.f32.mrb[8].mxu1 }
 0x50e   :  { %v4175_v40 = vrot.slane %v3879_v17, 5  ;;  %v4958_v1 = vpop.f32.mrb[9].mxu1 }
 0x510   :  { %v4176_v3 = vsel %vm8148_vm10, %v4175_v40, %v4174_v6 }
 0x52d   :  { %v3949_v26 = vpop.f32.mrb[10].mxu1 }
 0x52e   :  { %v4177_v61 = vrot.slane %v3949_v26, 4  ;;  %v4993_v24 = vpop.f32.mrb[11].mxu1 }
 0x530   :  { %v4178_v35 = vsel %vm8149_vm11, %v4177_v61, %v4176_v3 }
 0x54d   :  { %v4019_v34 = vpop.f32.mrb[12].mxu1 }
 0x54e   :  { %v4179_v47 = vrot.slane %v4019_v34, 3  ;;  %v5028_v62 = vpop.f32.mrb[13].mxu1 }
 0x550   :  { %v4180_v14 = vsel %vm8150_vm12, %v4179_v47, %v4178_v35 }
 0x56d   :  { %v4089_v59 = vpop.f32.mrb[14].mxu1 }
 0x56e   :  { %v4181_v9 = vrot.slane %v4089_v59, 2  ;;  %v5063_v63 = vpop.f32.mrb[15].mxu1 }
 0x570   :  { %v4182_v43 = vsel %vm3398_vm5, %v4181_v9, %v4180_v14 }
 0x58d   :  { %v4159_v39 = vpop.f32.mrb[16].mxu1 }
 0x58e   :  { %v4183_v11 = vrot.slane %v4159_v39, 1  ;;  %v5098_v58 = vpop.f32.mrb[17].mxu1 }
 0x590   :  { %v4184_v25 = vsel %vm3400_vm6, %v4183_v11, %v4182_v43 }
 0x591   :  { %4186 = vst [vmem:[%s8132_s10] sm:$0xff] %v4184_v25 }

</bundles_post_ra>
